<compile_context>
chip_gen: v7x
topology: tpu7x:2x2x1
jax: 0.10.0
libtpu: 0.0.40
codegen_flags: <defaults>
</compile_context>

<pallas_src>
import jax
import jax.numpy as jnp
import numpy as np
from jax.experimental import pallas as pl
from jax.experimental.pallas import tpu as pltpu

_SELU_ALPHA = 1.6732632423543772
_SELU_SCALE = 1.0507009873554805
_F = 10  # GCN hidden feature count (fixed by the module: 1 -> 10 -> 10 -> 1)


def _selu(v):
    return _SELU_SCALE * jnp.where(v > 0, v, _SELU_ALPHA * (jnp.exp(v) - 1.0))


def _round_up(v, m):
    return ((v + m - 1) // m) * m


def mixed_network_kernel(
    x_ref,      # (TB, Np)   batch-row block                          VMEM
    bspT_ref,   # (Np, Np)   B_sp.T (zero padded)                     VMEM
    bc_ref,     # (1, Np)    bc_value (zero padded)                   VMEM
    flag_ref,   # (1, Np)    interior_flag (zero padded)              VMEM
    adjT_ref,   # (Np, Np)   adj.T (zero padded)                      VMEM
    wg1_ref,    # (10,)      gc1.weight[0, :]                         SMEM
    bg1_ref,    # (10,)      gc1.bias                                 SMEM
    wg2_ref,    # (100,)     gc2.weight flattened row-major [g*10+f]  SMEM
    bg2_ref,    # (10,)      gc2.bias                                 SMEM
    wg3_ref,    # (10,)      gc3.weight[:, 0]                         SMEM
    bg3_ref,    # (1,)       gc3.bias                                 SMEM
    w1t_ref,    # (Np, Np)   fcc[0].weight.T (zero padded)            VMEM
    b1_ref,     # (1, Np)    fcc[0].bias (zero padded)                VMEM
    w2t_ref,    # (Np, Np)   fcc[2].weight.T (zero padded)            VMEM
    b2_ref,     # (1, Np)    fcc[2].bias (zero padded)                VMEM
    out_ref,    # (TB, Np)
):
    f32 = jnp.float32
    tb = x_ref.shape[0]

    x = x_ref[...]
    bc = bc_ref[...]
    flag = flag_ref[...]
    adjT = adjT_ref[...]

    # x = batch_mat_vec(B_sp, x); x = addcmul(bc_value, x, interior_flag)
    y = jnp.dot(x, bspT_ref[...], preferred_element_type=f32)          # (TB, Np)
    y = bc + y * flag

    # gc1 (1 -> 10, in < out): tmp = adj @ feat ; out = tmp @ W1 + b1
    # (1->10 expansion is an outer product -> plain VPU broadcast madds)
    a = jnp.dot(y, adjT, preferred_element_type=f32)                   # (TB, Np)
    h1 = [_selu(wg1_ref[f] * a + bg1_ref[f]) for f in range(_F)]       # 10 x (TB, Np)

    # gc2 (10 -> 10): tmp = feat @ W2 (K=10 mix on the VPU), out = adj @ tmp + b2.
    # The ten per-feature adjacency products are fused into ONE stacked matmul.
    mixed = []
    for f in range(_F):
        t = wg2_ref[f] * h1[0]                                          # g = 0
        for g in range(1, _F):
            t = t + wg2_ref[g * _F + f] * h1[g]
        mixed.append(t)
    stacked = jnp.concatenate(mixed, axis=0)                            # (10*TB, Np)
    stacked = jnp.dot(stacked, adjT, preferred_element_type=f32)        # (10*TB, Np)
    h2 = [_selu(stacked[f * tb:(f + 1) * tb, :] + bg2_ref[f]) for f in range(_F)]

    # gc3 (10 -> 1): tmp = feat @ W3 (K=10 mix on the VPU), out = adj @ tmp + b3
    t3 = wg3_ref[0] * h2[0]
    for g in range(1, _F):
        t3 = t3 + wg3_ref[g] * h2[g]
    h3 = _selu(jnp.dot(t3, adjT, preferred_element_type=f32) + bg3_ref[0])

    # fcc: Linear -> SELU -> Linear (weights pre-transposed: y = x @ W.T + b)
    z = _selu(jnp.dot(h3, w1t_ref[...], preferred_element_type=f32) + b1_ref[...])
    z = jnp.dot(z, w2t_ref[...], preferred_element_type=f32) + b2_ref[...]

    # final addcmul(bc_value, x, interior_flag)
    out_ref[...] = bc + z * flag


def mixed_network_forward(x, params, graph, *, tile_b=None):
    B, N = x.shape
    Np = _round_up(N, 128)                       # lane-dense node axis
    if tile_b is None:
        # Fill the MXU M dimension for large batches; pad tiny batches to one
        # sublane tile so sublane-axis concatenation/slicing stays layout-free.
        tile_b = 128 if B >= 128 else _round_up(max(B, 1), 8)
    B_pad = _round_up(B, tile_b)
    grid = (B_pad // tile_b,)

    f32 = jnp.float32

    def pad2(a, rows, cols):
        a = jnp.asarray(a, f32)
        return jnp.zeros((rows, cols), f32).at[: a.shape[0], : a.shape[1]].set(a)

    x_p  = pad2(x, B_pad, Np)
    bspT = pad2(jnp.asarray(graph["B_sp"], f32).T, Np, Np)
    bc   = pad2(jnp.asarray(graph["bc_value"], f32).reshape(1, N), 1, Np)
    flag = pad2(jnp.asarray(graph["interior_flag"], f32).reshape(1, N), 1, Np)
    adjT = pad2(jnp.asarray(graph["adj"], f32).T, Np, Np)
    w1t  = pad2(jnp.asarray(params["fc1_w"], f32).T, Np, Np)
    b1   = pad2(jnp.asarray(params["fc1_b"], f32).reshape(1, N), 1, Np)
    w2t  = pad2(jnp.asarray(params["fc2_w"], f32).T, Np, Np)
    b2   = pad2(jnp.asarray(params["fc2_b"], f32).reshape(1, N), 1, Np)

    wg1 = jnp.asarray(params["gc1_w"], f32).reshape(_F)        # (1, 10) -> (10,)
    bg1 = jnp.asarray(params["gc1_b"], f32).reshape(_F)
    wg2 = jnp.asarray(params["gc2_w"], f32).reshape(_F * _F)   # [g, f] -> g*10+f
    bg2 = jnp.asarray(params["gc2_b"], f32).reshape(_F)
    wg3 = jnp.asarray(params["gc3_w"], f32).reshape(_F)        # (10, 1) -> (10,)
    bg3 = jnp.asarray(params["gc3_b"], f32).reshape(1)

    def vmem_full(a):
        nd = a.ndim
        return pl.BlockSpec(a.shape, lambda b, _nd=nd: (0,) * _nd)

    smem = pl.BlockSpec(memory_space=pltpu.MemorySpace.SMEM)

    in_specs = [
        pl.BlockSpec((tile_b, Np), lambda b: (b, 0)),          # x block
        vmem_full(bspT), vmem_full(bc), vmem_full(flag), vmem_full(adjT),
        smem, smem, smem, smem, smem, smem,                    # GCN params
        vmem_full(w1t), vmem_full(b1), vmem_full(w2t), vmem_full(b2),
    ]
    out_specs = pl.BlockSpec((tile_b, Np), lambda b: (b, 0))

    # Rough roofline numbers so XLA schedules around the kernel sensibly.
    flops = int(2 * B_pad * Np * Np * (5 + _F) + 2 * B_pad * Np * (2 * _F * _F))
    transcendentals = int(B_pad * Np * (2 * _F + 2))
    bytes_accessed = int(4 * (2 * B_pad * Np + 4 * Np * Np + 6 * Np + 4 * _F * _F))
    cost = pl.CostEstimate(flops=flops, transcendentals=transcendentals,
                           bytes_accessed=bytes_accessed)

    # VMEM guard: the four Np x Np full-block matrices get double buffered;
    # size the scoped limit to the actual footprint (with headroom) so the
    # kernel stays portable if input_size grows (v7x has only 64 MiB VMEM).
    per_step_bytes = 4 * (2 * (4 * Np * Np + 2 * tile_b * Np + 6 * Np)
                          + (3 * _F + 4) * tile_b * Np)
    vmem_limit = int(min(64 * 1024 * 1024,
                         max(16 * 1024 * 1024, 4 * per_step_bytes)))

    out = pl.pallas_call(
        mixed_network_kernel,
        out_shape=jax.ShapeDtypeStruct((B_pad, Np), f32),
        grid=grid,
        in_specs=in_specs,
        out_specs=out_specs,
        compiler_params=pltpu.CompilerParams(
            dimension_semantics=("parallel",),
            vmem_limit_bytes=vmem_limit,
        ),
        cost_estimate=cost,
    )(x_p, bspT, bc, flag, adjT,
      wg1, bg1, wg2, bg2, wg3, bg3,
      w1t, b1, w2t, b2)

    return out[:B, :N]


def reference_forward(x, params, graph):
    """Pure-JAX reference mirroring the PyTorch forward exactly."""
    hp = jax.lax.Precision.HIGHEST
    bc, flag = graph["bc_value"], graph["interior_flag"]
    adj, bsp = graph["adj"], graph["B_sp"]

    y = jnp.matmul(x, bsp.T, precision=hp)                       # batch_mat_vec
    y = bc + y * flag                                            # addcmul
    h = y[:, :, None]                                            # unsqueeze(2)
    # gc1: in < out -> tmp = adj @ h ; out = tmp @ W + b
    tmp = jnp.einsum("ij,bjf->bif", adj, h, precision=hp)
    h = jax.nn.selu(jnp.matmul(tmp, params["gc1_w"], precision=hp) + params["gc1_b"])
    # gc2: tmp = h @ W ; out = adj @ tmp + b
    tmp = jnp.matmul(h, params["gc2_w"], precision=hp)
    h = jax.nn.selu(jnp.einsum("ij,bjf->bif", adj, tmp, precision=hp) + params["gc2_b"])
    # gc3: tmp = h @ W ; out = adj @ tmp + b
    tmp = jnp.matmul(h, params["gc3_w"], precision=hp)
    h = jax.nn.selu(jnp.einsum("ij,bjf->bif", adj, tmp, precision=hp) + params["gc3_b"])
    z = h[:, :, 0]                                               # squeeze
    z = jax.nn.selu(jnp.matmul(z, params["fc1_w"].T, precision=hp) + params["fc1_b"])
    z = jnp.matmul(z, params["fc2_w"].T, precision=hp) + params["fc2_b"]
    return bc + z * flag


if __name__ == "__main__":
    B, N = 2, 32  # batch=2, args.input_size = number of graph nodes = 32
    key = jax.random.PRNGKey(0)
    ks = jax.random.split(key, 16)
    u = lambda k, s: jax.random.uniform(k, s, jnp.float32, -0.1, 0.1)

    params = {
        "gc1_w": u(ks[0], (1, 10)),  "gc1_b": u(ks[1], (10,)),
        "gc2_w": u(ks[2], (10, 10)), "gc2_b": u(ks[3], (10,)),
        "gc3_w": u(ks[4], (10, 1)),  "gc3_b": u(ks[5], (1,)),
        "fc1_w": u(ks[6], (N, N)),   "fc1_b": u(ks[7], (N,)),
        "fc2_w": u(ks[8], (N, N)),   "fc2_b": u(ks[9], (N,)),
    }
    graph = {
        "bc_value": u(ks[10], (N,)),
        "interior_flag": (jax.random.uniform(ks[11], (N,)) > 0.2).astype(jnp.float32),
        "adj": u(ks[12], (N, N)),     # dense stand-in for the sparse normalized adjacency
        "B_sp": u(ks[13], (N, N)),    # dense stand-in for the sparse B matrix
    }
    x = jax.random.normal(ks[14], (B, N), jnp.float32)

    out = jax.block_until_ready(mixed_network_forward(x, params, graph))
    ref = reference_forward(x, params, graph)

    assert out.shape == (B, N)
    np.testing.assert_allclose(np.asarray(out), np.asarray(ref), rtol=2e-3, atol=2e-3)
    print("KERNEL_OK")
</pallas_src>

<mosaic_0001>
module attributes {stable_mosaic.version = 11 : i64} {
  func.func @mixed_network_kernel(%arg0: i32, %arg1: memref<8x128xf32, #tpu.memory_space<vmem>>, %arg2: memref<128x128xf32, #tpu.memory_space<vmem>>, %arg3: memref<1x128xf32, #tpu.memory_space<vmem>>, %arg4: memref<1x128xf32, #tpu.memory_space<vmem>>, %arg5: memref<128x128xf32, #tpu.memory_space<vmem>>, %arg6: memref<10xf32, #tpu.memory_space<smem>>, %arg7: memref<10xf32, #tpu.memory_space<smem>>, %arg8: memref<100xf32, #tpu.memory_space<smem>>, %arg9: memref<10xf32, #tpu.memory_space<smem>>, %arg10: memref<10xf32, #tpu.memory_space<smem>>, %arg11: memref<1xf32, #tpu.memory_space<smem>>, %arg12: memref<128x128xf32, #tpu.memory_space<vmem>>, %arg13: memref<1x128xf32, #tpu.memory_space<vmem>>, %arg14: memref<128x128xf32, #tpu.memory_space<vmem>>, %arg15: memref<1x128xf32, #tpu.memory_space<vmem>>, %arg16: memref<8x128xf32, #tpu.memory_space<vmem>>) attributes {dimension_semantics = [#tpu.dimension_semantics<parallel>], iteration_bounds = array<i64: 1>, scalar_prefetch = 0 : i64, scratch_operands = 0 : i64, tpu.core_type = #tpu.core_type<tc>, window_params = [{transform_indices = @transform_0, window_bounds = array<i64: 8, 128>}, {pipeline_mode = #tpu.pipeline_mode<synchronous>, transform_indices = @transform_1, window_bounds = array<i64: 128, 128>}, {pipeline_mode = #tpu.pipeline_mode<synchronous>, transform_indices = @transform_2, window_bounds = array<i64: 1, 128>}, {pipeline_mode = #tpu.pipeline_mode<synchronous>, transform_indices = @transform_3, window_bounds = array<i64: 1, 128>}, {pipeline_mode = #tpu.pipeline_mode<synchronous>, transform_indices = @transform_4, window_bounds = array<i64: 128, 128>}, {transform_indices = @transform_5, window_bounds = array<i64: 10>}, {transform_indices = @transform_6, window_bounds = array<i64: 10>}, {transform_indices = @transform_7, window_bounds = array<i64: 100>}, {transform_indices = @transform_8, window_bounds = array<i64: 10>}, {transform_indices = @transform_9, window_bounds = array<i64: 10>}, {transform_indices = @transform_10, window_bounds = array<i64: 1>}, {pipeline_mode = #tpu.pipeline_mode<synchronous>, transform_indices = @transform_11, window_bounds = array<i64: 128, 128>}, {pipeline_mode = #tpu.pipeline_mode<synchronous>, transform_indices = @transform_12, window_bounds = array<i64: 1, 128>}, {pipeline_mode = #tpu.pipeline_mode<synchronous>, transform_indices = @transform_13, window_bounds = array<i64: 128, 128>}, {pipeline_mode = #tpu.pipeline_mode<synchronous>, transform_indices = @transform_14, window_bounds = array<i64: 1, 128>}, {transform_indices = @transform_15, window_bounds = array<i64: 8, 128>}]} {
    %c0 = arith.constant 0 : index
    %c0_0 = arith.constant 0 : index
    %0 = vector.load %arg1[%c0, %c0_0] : memref<8x128xf32, #tpu.memory_space<vmem>>, vector<8x128xf32>
    %c0_1 = arith.constant 0 : index
    %c0_2 = arith.constant 0 : index
    %1 = vector.load %arg3[%c0_1, %c0_2] : memref<1x128xf32, #tpu.memory_space<vmem>>, vector<1x128xf32>
    %c0_3 = arith.constant 0 : index
    %c0_4 = arith.constant 0 : index
    %2 = vector.load %arg4[%c0_3, %c0_4] : memref<1x128xf32, #tpu.memory_space<vmem>>, vector<1x128xf32>
    %c0_5 = arith.constant 0 : index
    %c0_6 = arith.constant 0 : index
    %3 = vector.load %arg5[%c0_5, %c0_6] : memref<128x128xf32, #tpu.memory_space<vmem>>, vector<128x128xf32>
    %c0_7 = arith.constant 0 : index
    %c0_8 = arith.constant 0 : index
    %4 = vector.load %arg2[%c0_7, %c0_8] : memref<128x128xf32, #tpu.memory_space<vmem>>, vector<128x128xf32>
    %cst = arith.constant dense<0.000000e+00> : vector<8x128xf32>
    %5 = tpu.matmul %0, %4, %cst {dimension_numbers = #tpu.dot_dimension_numbers<[1], [0], [0], [1], [0, 0, 1, 1], [], []>} : vector<8x128xf32>, vector<128x128xf32>, vector<8x128xf32> -> vector<8x128xf32>
    %6 = vector.broadcast %2 : vector<1x128xf32> to vector<8x128xf32>
    %7 = arith.mulf %5, %6 : vector<8x128xf32>
    %8 = vector.broadcast %1 : vector<1x128xf32> to vector<8x128xf32>
    %9 = arith.addf %8, %7 : vector<8x128xf32>
    %cst_9 = arith.constant dense<0.000000e+00> : vector<8x128xf32>
    %10 = tpu.matmul %9, %3, %cst_9 {dimension_numbers = #tpu.dot_dimension_numbers<[1], [0], [0], [1], [0, 0, 1, 1], [], []>} : vector<8x128xf32>, vector<128x128xf32>, vector<8x128xf32> -> vector<8x128xf32>
    %c0_10 = arith.constant 0 : index
    %11 = memref.load %arg6[%c0_10] : memref<10xf32, #tpu.memory_space<smem>>
    %12 = vector.broadcast %11 : f32 to vector<8x128xf32>
    %13 = arith.mulf %12, %10 : vector<8x128xf32>
    %c0_11 = arith.constant 0 : index
    %14 = memref.load %arg7[%c0_11] : memref<10xf32, #tpu.memory_space<smem>>
    %15 = vector.broadcast %14 : f32 to vector<8x128xf32>
    %16 = arith.addf %13, %15 : vector<8x128xf32>
    %cst_12 = arith.constant 0.000000e+00 : f32
    %17 = vector.broadcast %cst_12 : f32 to vector<8x128xf32>
    %18 = arith.cmpf ogt, %16, %17 : vector<8x128xf32>
    %19 = math.exp %16 : vector<8x128xf32>
    %cst_13 = arith.constant 1.000000e+00 : f32
    %20 = vector.broadcast %cst_13 : f32 to vector<8x128xf32>
    %21 = arith.subf %19, %20 : vector<8x128xf32>
    %cst_14 = arith.constant 1.67326319 : f32
    %22 = vector.broadcast %cst_14 : f32 to vector<8x128xf32>
    %23 = arith.mulf %22, %21 : vector<8x128xf32>
    %24 = arith.select %18, %16, %23 : vector<8x128xi1>, vector<8x128xf32>
    %cst_15 = arith.constant 1.05070102 : f32
    %25 = vector.broadcast %cst_15 : f32 to vector<8x128xf32>
    %26 = arith.mulf %25, %24 : vector<8x128xf32>
    %c1 = arith.constant 1 : index
    %27 = memref.load %arg6[%c1] : memref<10xf32, #tpu.memory_space<smem>>
    %28 = vector.broadcast %27 : f32 to vector<8x128xf32>
    %29 = arith.mulf %28, %10 : vector<8x128xf32>
    %c1_16 = arith.constant 1 : index
    %30 = memref.load %arg7[%c1_16] : memref<10xf32, #tpu.memory_space<smem>>
    %31 = vector.broadcast %30 : f32 to vector<8x128xf32>
    %32 = arith.addf %29, %31 : vector<8x128xf32>
    %cst_17 = arith.constant 0.000000e+00 : f32
    %33 = vector.broadcast %cst_17 : f32 to vector<8x128xf32>
    %34 = arith.cmpf ogt, %32, %33 : vector<8x128xf32>
    %35 = math.exp %32 : vector<8x128xf32>
    %cst_18 = arith.constant 1.000000e+00 : f32
    %36 = vector.broadcast %cst_18 : f32 to vector<8x128xf32>
    %37 = arith.subf %35, %36 : vector<8x128xf32>
    %cst_19 = arith.constant 1.67326319 : f32
    %38 = vector.broadcast %cst_19 : f32 to vector<8x128xf32>
    %39 = arith.mulf %38, %37 : vector<8x128xf32>
    %40 = arith.select %34, %32, %39 : vector<8x128xi1>, vector<8x128xf32>
    %cst_20 = arith.constant 1.05070102 : f32
    %41 = vector.broadcast %cst_20 : f32 to vector<8x128xf32>
    %42 = arith.mulf %41, %40 : vector<8x128xf32>
    %c2 = arith.constant 2 : index
    %43 = memref.load %arg6[%c2] : memref<10xf32, #tpu.memory_space<smem>>
    %44 = vector.broadcast %43 : f32 to vector<8x128xf32>
    %45 = arith.mulf %44, %10 : vector<8x128xf32>
    %c2_21 = arith.constant 2 : index
    %46 = memref.load %arg7[%c2_21] : memref<10xf32, #tpu.memory_space<smem>>
    %47 = vector.broadcast %46 : f32 to vector<8x128xf32>
    %48 = arith.addf %45, %47 : vector<8x128xf32>
    %cst_22 = arith.constant 0.000000e+00 : f32
    %49 = vector.broadcast %cst_22 : f32 to vector<8x128xf32>
    %50 = arith.cmpf ogt, %48, %49 : vector<8x128xf32>
    %51 = math.exp %48 : vector<8x128xf32>
    %cst_23 = arith.constant 1.000000e+00 : f32
    %52 = vector.broadcast %cst_23 : f32 to vector<8x128xf32>
    %53 = arith.subf %51, %52 : vector<8x128xf32>
    %cst_24 = arith.constant 1.67326319 : f32
    %54 = vector.broadcast %cst_24 : f32 to vector<8x128xf32>
    %55 = arith.mulf %54, %53 : vector<8x128xf32>
    %56 = arith.select %50, %48, %55 : vector<8x128xi1>, vector<8x128xf32>
    %cst_25 = arith.constant 1.05070102 : f32
    %57 = vector.broadcast %cst_25 : f32 to vector<8x128xf32>
    %58 = arith.mulf %57, %56 : vector<8x128xf32>
    %c3 = arith.constant 3 : index
    %59 = memref.load %arg6[%c3] : memref<10xf32, #tpu.memory_space<smem>>
    %60 = vector.broadcast %59 : f32 to vector<8x128xf32>
    %61 = arith.mulf %60, %10 : vector<8x128xf32>
    %c3_26 = arith.constant 3 : index
    %62 = memref.load %arg7[%c3_26] : memref<10xf32, #tpu.memory_space<smem>>
    %63 = vector.broadcast %62 : f32 to vector<8x128xf32>
    %64 = arith.addf %61, %63 : vector<8x128xf32>
    %cst_27 = arith.constant 0.000000e+00 : f32
    %65 = vector.broadcast %cst_27 : f32 to vector<8x128xf32>
    %66 = arith.cmpf ogt, %64, %65 : vector<8x128xf32>
    %67 = math.exp %64 : vector<8x128xf32>
    %cst_28 = arith.constant 1.000000e+00 : f32
    %68 = vector.broadcast %cst_28 : f32 to vector<8x128xf32>
    %69 = arith.subf %67, %68 : vector<8x128xf32>
    %cst_29 = arith.constant 1.67326319 : f32
    %70 = vector.broadcast %cst_29 : f32 to vector<8x128xf32>
    %71 = arith.mulf %70, %69 : vector<8x128xf32>
    %72 = arith.select %66, %64, %71 : vector<8x128xi1>, vector<8x128xf32>
    %cst_30 = arith.constant 1.05070102 : f32
    %73 = vector.broadcast %cst_30 : f32 to vector<8x128xf32>
    %74 = arith.mulf %73, %72 : vector<8x128xf32>
    %c4 = arith.constant 4 : index
    %75 = memref.load %arg6[%c4] : memref<10xf32, #tpu.memory_space<smem>>
    %76 = vector.broadcast %75 : f32 to vector<8x128xf32>
    %77 = arith.mulf %76, %10 : vector<8x128xf32>
    %c4_31 = arith.constant 4 : index
    %78 = memref.load %arg7[%c4_31] : memref<10xf32, #tpu.memory_space<smem>>
    %79 = vector.broadcast %78 : f32 to vector<8x128xf32>
    %80 = arith.addf %77, %79 : vector<8x128xf32>
    %cst_32 = arith.constant 0.000000e+00 : f32
    %81 = vector.broadcast %cst_32 : f32 to vector<8x128xf32>
    %82 = arith.cmpf ogt, %80, %81 : vector<8x128xf32>
    %83 = math.exp %80 : vector<8x128xf32>
    %cst_33 = arith.constant 1.000000e+00 : f32
    %84 = vector.broadcast %cst_33 : f32 to vector<8x128xf32>
    %85 = arith.subf %83, %84 : vector<8x128xf32>
    %cst_34 = arith.constant 1.67326319 : f32
    %86 = vector.broadcast %cst_34 : f32 to vector<8x128xf32>
    %87 = arith.mulf %86, %85 : vector<8x128xf32>
    %88 = arith.select %82, %80, %87 : vector<8x128xi1>, vector<8x128xf32>
    %cst_35 = arith.constant 1.05070102 : f32
    %89 = vector.broadcast %cst_35 : f32 to vector<8x128xf32>
    %90 = arith.mulf %89, %88 : vector<8x128xf32>
    %c5 = arith.constant 5 : index
    %91 = memref.load %arg6[%c5] : memref<10xf32, #tpu.memory_space<smem>>
    %92 = vector.broadcast %91 : f32 to vector<8x128xf32>
    %93 = arith.mulf %92, %10 : vector<8x128xf32>
    %c5_36 = arith.constant 5 : index
    %94 = memref.load %arg7[%c5_36] : memref<10xf32, #tpu.memory_space<smem>>
    %95 = vector.broadcast %94 : f32 to vector<8x128xf32>
    %96 = arith.addf %93, %95 : vector<8x128xf32>
    %cst_37 = arith.constant 0.000000e+00 : f32
    %97 = vector.broadcast %cst_37 : f32 to vector<8x128xf32>
    %98 = arith.cmpf ogt, %96, %97 : vector<8x128xf32>
    %99 = math.exp %96 : vector<8x128xf32>
    %cst_38 = arith.constant 1.000000e+00 : f32
    %100 = vector.broadcast %cst_38 : f32 to vector<8x128xf32>
    %101 = arith.subf %99, %100 : vector<8x128xf32>
    %cst_39 = arith.constant 1.67326319 : f32
    %102 = vector.broadcast %cst_39 : f32 to vector<8x128xf32>
    %103 = arith.mulf %102, %101 : vector<8x128xf32>
    %104 = arith.select %98, %96, %103 : vector<8x128xi1>, vector<8x128xf32>
    %cst_40 = arith.constant 1.05070102 : f32
    %105 = vector.broadcast %cst_40 : f32 to vector<8x128xf32>
    %106 = arith.mulf %105, %104 : vector<8x128xf32>
    %c6 = arith.constant 6 : index
    %107 = memref.load %arg6[%c6] : memref<10xf32, #tpu.memory_space<smem>>
    %108 = vector.broadcast %107 : f32 to vector<8x128xf32>
    %109 = arith.mulf %108, %10 : vector<8x128xf32>
    %c6_41 = arith.constant 6 : index
    %110 = memref.load %arg7[%c6_41] : memref<10xf32, #tpu.memory_space<smem>>
    %111 = vector.broadcast %110 : f32 to vector<8x128xf32>
    %112 = arith.addf %109, %111 : vector<8x128xf32>
    %cst_42 = arith.constant 0.000000e+00 : f32
    %113 = vector.broadcast %cst_42 : f32 to vector<8x128xf32>
    %114 = arith.cmpf ogt, %112, %113 : vector<8x128xf32>
    %115 = math.exp %112 : vector<8x128xf32>
    %cst_43 = arith.constant 1.000000e+00 : f32
    %116 = vector.broadcast %cst_43 : f32 to vector<8x128xf32>
    %117 = arith.subf %115, %116 : vector<8x128xf32>
    %cst_44 = arith.constant 1.67326319 : f32
    %118 = vector.broadcast %cst_44 : f32 to vector<8x128xf32>
    %119 = arith.mulf %118, %117 : vector<8x128xf32>
    %120 = arith.select %114, %112, %119 : vector<8x128xi1>, vector<8x128xf32>
    %cst_45 = arith.constant 1.05070102 : f32
    %121 = vector.broadcast %cst_45 : f32 to vector<8x128xf32>
    %122 = arith.mulf %121, %120 : vector<8x128xf32>
    %c7 = arith.constant 7 : index
    %123 = memref.load %arg6[%c7] : memref<10xf32, #tpu.memory_space<smem>>
    %124 = vector.broadcast %123 : f32 to vector<8x128xf32>
    %125 = arith.mulf %124, %10 : vector<8x128xf32>
    %c7_46 = arith.constant 7 : index
    %126 = memref.load %arg7[%c7_46] : memref<10xf32, #tpu.memory_space<smem>>
    %127 = vector.broadcast %126 : f32 to vector<8x128xf32>
    %128 = arith.addf %125, %127 : vector<8x128xf32>
    %cst_47 = arith.constant 0.000000e+00 : f32
    %129 = vector.broadcast %cst_47 : f32 to vector<8x128xf32>
    %130 = arith.cmpf ogt, %128, %129 : vector<8x128xf32>
    %131 = math.exp %128 : vector<8x128xf32>
    %cst_48 = arith.constant 1.000000e+00 : f32
    %132 = vector.broadcast %cst_48 : f32 to vector<8x128xf32>
    %133 = arith.subf %131, %132 : vector<8x128xf32>
    %cst_49 = arith.constant 1.67326319 : f32
    %134 = vector.broadcast %cst_49 : f32 to vector<8x128xf32>
    %135 = arith.mulf %134, %133 : vector<8x128xf32>
    %136 = arith.select %130, %128, %135 : vector<8x128xi1>, vector<8x128xf32>
    %cst_50 = arith.constant 1.05070102 : f32
    %137 = vector.broadcast %cst_50 : f32 to vector<8x128xf32>
    %138 = arith.mulf %137, %136 : vector<8x128xf32>
    %c8 = arith.constant 8 : index
    %139 = memref.load %arg6[%c8] : memref<10xf32, #tpu.memory_space<smem>>
    %140 = vector.broadcast %139 : f32 to vector<8x128xf32>
    %141 = arith.mulf %140, %10 : vector<8x128xf32>
    %c8_51 = arith.constant 8 : index
    %142 = memref.load %arg7[%c8_51] : memref<10xf32, #tpu.memory_space<smem>>
    %143 = vector.broadcast %142 : f32 to vector<8x128xf32>
    %144 = arith.addf %141, %143 : vector<8x128xf32>
    %cst_52 = arith.constant 0.000000e+00 : f32
    %145 = vector.broadcast %cst_52 : f32 to vector<8x128xf32>
    %146 = arith.cmpf ogt, %144, %145 : vector<8x128xf32>
    %147 = math.exp %144 : vector<8x128xf32>
    %cst_53 = arith.constant 1.000000e+00 : f32
    %148 = vector.broadcast %cst_53 : f32 to vector<8x128xf32>
    %149 = arith.subf %147, %148 : vector<8x128xf32>
    %cst_54 = arith.constant 1.67326319 : f32
    %150 = vector.broadcast %cst_54 : f32 to vector<8x128xf32>
    %151 = arith.mulf %150, %149 : vector<8x128xf32>
    %152 = arith.select %146, %144, %151 : vector<8x128xi1>, vector<8x128xf32>
    %cst_55 = arith.constant 1.05070102 : f32
    %153 = vector.broadcast %cst_55 : f32 to vector<8x128xf32>
    %154 = arith.mulf %153, %152 : vector<8x128xf32>
    %c9 = arith.constant 9 : index
    %155 = memref.load %arg6[%c9] : memref<10xf32, #tpu.memory_space<smem>>
    %156 = vector.broadcast %155 : f32 to vector<8x128xf32>
    %157 = arith.mulf %156, %10 : vector<8x128xf32>
    %c9_56 = arith.constant 9 : index
    %158 = memref.load %arg7[%c9_56] : memref<10xf32, #tpu.memory_space<smem>>
    %159 = vector.broadcast %158 : f32 to vector<8x128xf32>
    %160 = arith.addf %157, %159 : vector<8x128xf32>
    %cst_57 = arith.constant 0.000000e+00 : f32
    %161 = vector.broadcast %cst_57 : f32 to vector<8x128xf32>
    %162 = arith.cmpf ogt, %160, %161 : vector<8x128xf32>
    %163 = math.exp %160 : vector<8x128xf32>
    %cst_58 = arith.constant 1.000000e+00 : f32
    %164 = vector.broadcast %cst_58 : f32 to vector<8x128xf32>
    %165 = arith.subf %163, %164 : vector<8x128xf32>
    %cst_59 = arith.constant 1.67326319 : f32
    %166 = vector.broadcast %cst_59 : f32 to vector<8x128xf32>
    %167 = arith.mulf %166, %165 : vector<8x128xf32>
    %168 = arith.select %162, %160, %167 : vector<8x128xi1>, vector<8x128xf32>
    %cst_60 = arith.constant 1.05070102 : f32
    %169 = vector.broadcast %cst_60 : f32 to vector<8x128xf32>
    %170 = arith.mulf %169, %168 : vector<8x128xf32>
    %c0_61 = arith.constant 0 : index
    %171 = memref.load %arg8[%c0_61] : memref<100xf32, #tpu.memory_space<smem>>
    %172 = vector.broadcast %171 : f32 to vector<8x128xf32>
    %173 = arith.mulf %172, %26 : vector<8x128xf32>
    %c10 = arith.constant 10 : index
    %174 = memref.load %arg8[%c10] : memref<100xf32, #tpu.memory_space<smem>>
    %175 = vector.broadcast %174 : f32 to vector<8x128xf32>
    %176 = arith.mulf %175, %42 : vector<8x128xf32>
    %177 = arith.addf %173, %176 : vector<8x128xf32>
    %c20 = arith.constant 20 : index
    %178 = memref.load %arg8[%c20] : memref<100xf32, #tpu.memory_space<smem>>
    %179 = vector.broadcast %178 : f32 to vector<8x128xf32>
    %180 = arith.mulf %179, %58 : vector<8x128xf32>
    %181 = arith.addf %177, %180 : vector<8x128xf32>
    %c30 = arith.constant 30 : index
    %182 = memref.load %arg8[%c30] : memref<100xf32, #tpu.memory_space<smem>>
    %183 = vector.broadcast %182 : f32 to vector<8x128xf32>
    %184 = arith.mulf %183, %74 : vector<8x128xf32>
    %185 = arith.addf %181, %184 : vector<8x128xf32>
    %c40 = arith.constant 40 : index
    %186 = memref.load %arg8[%c40] : memref<100xf32, #tpu.memory_space<smem>>
    %187 = vector.broadcast %186 : f32 to vector<8x128xf32>
    %188 = arith.mulf %187, %90 : vector<8x128xf32>
    %189 = arith.addf %185, %188 : vector<8x128xf32>
    %c50 = arith.constant 50 : index
    %190 = memref.load %arg8[%c50] : memref<100xf32, #tpu.memory_space<smem>>
    %191 = vector.broadcast %190 : f32 to vector<8x128xf32>
    %192 = arith.mulf %191, %106 : vector<8x128xf32>
    %193 = arith.addf %189, %192 : vector<8x128xf32>
    %c60 = arith.constant 60 : index
    %194 = memref.load %arg8[%c60] : memref<100xf32, #tpu.memory_space<smem>>
    %195 = vector.broadcast %194 : f32 to vector<8x128xf32>
    %196 = arith.mulf %195, %122 : vector<8x128xf32>
    %197 = arith.addf %193, %196 : vector<8x128xf32>
    %c70 = arith.constant 70 : index
    %198 = memref.load %arg8[%c70] : memref<100xf32, #tpu.memory_space<smem>>
    %199 = vector.broadcast %198 : f32 to vector<8x128xf32>
    %200 = arith.mulf %199, %138 : vector<8x128xf32>
    %201 = arith.addf %197, %200 : vector<8x128xf32>
    %c80 = arith.constant 80 : index
    %202 = memref.load %arg8[%c80] : memref<100xf32, #tpu.memory_space<smem>>
    %203 = vector.broadcast %202 : f32 to vector<8x128xf32>
    %204 = arith.mulf %203, %154 : vector<8x128xf32>
    %205 = arith.addf %201, %204 : vector<8x128xf32>
    %c90 = arith.constant 90 : index
    %206 = memref.load %arg8[%c90] : memref<100xf32, #tpu.memory_space<smem>>
    %207 = vector.broadcast %206 : f32 to vector<8x128xf32>
    %208 = arith.mulf %207, %170 : vector<8x128xf32>
    %209 = arith.addf %205, %208 : vector<8x128xf32>
    %c1_62 = arith.constant 1 : index
    %210 = memref.load %arg8[%c1_62] : memref<100xf32, #tpu.memory_space<smem>>
    %211 = vector.broadcast %210 : f32 to vector<8x128xf32>
    %212 = arith.mulf %211, %26 : vector<8x128xf32>
    %c11 = arith.constant 11 : index
    %213 = memref.load %arg8[%c11] : memref<100xf32, #tpu.memory_space<smem>>
    %214 = vector.broadcast %213 : f32 to vector<8x128xf32>
    %215 = arith.mulf %214, %42 : vector<8x128xf32>
    %216 = arith.addf %212, %215 : vector<8x128xf32>
    %c21 = arith.constant 21 : index
    %217 = memref.load %arg8[%c21] : memref<100xf32, #tpu.memory_space<smem>>
    %218 = vector.broadcast %217 : f32 to vector<8x128xf32>
    %219 = arith.mulf %218, %58 : vector<8x128xf32>
    %220 = arith.addf %216, %219 : vector<8x128xf32>
    %c31 = arith.constant 31 : index
    %221 = memref.load %arg8[%c31] : memref<100xf32, #tpu.memory_space<smem>>
    %222 = vector.broadcast %221 : f32 to vector<8x128xf32>
    %223 = arith.mulf %222, %74 : vector<8x128xf32>
    %224 = arith.addf %220, %223 : vector<8x128xf32>
    %c41 = arith.constant 41 : index
    %225 = memref.load %arg8[%c41] : memref<100xf32, #tpu.memory_space<smem>>
    %226 = vector.broadcast %225 : f32 to vector<8x128xf32>
    %227 = arith.mulf %226, %90 : vector<8x128xf32>
    %228 = arith.addf %224, %227 : vector<8x128xf32>
    %c51 = arith.constant 51 : index
    %229 = memref.load %arg8[%c51] : memref<100xf32, #tpu.memory_space<smem>>
    %230 = vector.broadcast %229 : f32 to vector<8x128xf32>
    %231 = arith.mulf %230, %106 : vector<8x128xf32>
    %232 = arith.addf %228, %231 : vector<8x128xf32>
    %c61 = arith.constant 61 : index
    %233 = memref.load %arg8[%c61] : memref<100xf32, #tpu.memory_space<smem>>
    %234 = vector.broadcast %233 : f32 to vector<8x128xf32>
    %235 = arith.mulf %234, %122 : vector<8x128xf32>
    %236 = arith.addf %232, %235 : vector<8x128xf32>
    %c71 = arith.constant 71 : index
    %237 = memref.load %arg8[%c71] : memref<100xf32, #tpu.memory_space<smem>>
    %238 = vector.broadcast %237 : f32 to vector<8x128xf32>
    %239 = arith.mulf %238, %138 : vector<8x128xf32>
    %240 = arith.addf %236, %239 : vector<8x128xf32>
    %c81 = arith.constant 81 : index
    %241 = memref.load %arg8[%c81] : memref<100xf32, #tpu.memory_space<smem>>
    %242 = vector.broadcast %241 : f32 to vector<8x128xf32>
    %243 = arith.mulf %242, %154 : vector<8x128xf32>
    %244 = arith.addf %240, %243 : vector<8x128xf32>
    %c91 = arith.constant 91 : index
    %245 = memref.load %arg8[%c91] : memref<100xf32, #tpu.memory_space<smem>>
    %246 = vector.broadcast %245 : f32 to vector<8x128xf32>
    %247 = arith.mulf %246, %170 : vector<8x128xf32>
    %248 = arith.addf %244, %247 : vector<8x128xf32>
    %c2_63 = arith.constant 2 : index
    %249 = memref.load %arg8[%c2_63] : memref<100xf32, #tpu.memory_space<smem>>
    %250 = vector.broadcast %249 : f32 to vector<8x128xf32>
    %251 = arith.mulf %250, %26 : vector<8x128xf32>
    %c12 = arith.constant 12 : index
    %252 = memref.load %arg8[%c12] : memref<100xf32, #tpu.memory_space<smem>>
    %253 = vector.broadcast %252 : f32 to vector<8x128xf32>
    %254 = arith.mulf %253, %42 : vector<8x128xf32>
    %255 = arith.addf %251, %254 : vector<8x128xf32>
    %c22 = arith.constant 22 : index
    %256 = memref.load %arg8[%c22] : memref<100xf32, #tpu.memory_space<smem>>
    %257 = vector.broadcast %256 : f32 to vector<8x128xf32>
    %258 = arith.mulf %257, %58 : vector<8x128xf32>
    %259 = arith.addf %255, %258 : vector<8x128xf32>
    %c32 = arith.constant 32 : index
    %260 = memref.load %arg8[%c32] : memref<100xf32, #tpu.memory_space<smem>>
    %261 = vector.broadcast %260 : f32 to vector<8x128xf32>
    %262 = arith.mulf %261, %74 : vector<8x128xf32>
    %263 = arith.addf %259, %262 : vector<8x128xf32>
    %c42 = arith.constant 42 : index
    %264 = memref.load %arg8[%c42] : memref<100xf32, #tpu.memory_space<smem>>
    %265 = vector.broadcast %264 : f32 to vector<8x128xf32>
    %266 = arith.mulf %265, %90 : vector<8x128xf32>
    %267 = arith.addf %263, %266 : vector<8x128xf32>
    %c52 = arith.constant 52 : index
    %268 = memref.load %arg8[%c52] : memref<100xf32, #tpu.memory_space<smem>>
    %269 = vector.broadcast %268 : f32 to vector<8x128xf32>
    %270 = arith.mulf %269, %106 : vector<8x128xf32>
    %271 = arith.addf %267, %270 : vector<8x128xf32>
    %c62 = arith.constant 62 : index
    %272 = memref.load %arg8[%c62] : memref<100xf32, #tpu.memory_space<smem>>
    %273 = vector.broadcast %272 : f32 to vector<8x128xf32>
    %274 = arith.mulf %273, %122 : vector<8x128xf32>
    %275 = arith.addf %271, %274 : vector<8x128xf32>
    %c72 = arith.constant 72 : index
    %276 = memref.load %arg8[%c72] : memref<100xf32, #tpu.memory_space<smem>>
    %277 = vector.broadcast %276 : f32 to vector<8x128xf32>
    %278 = arith.mulf %277, %138 : vector<8x128xf32>
    %279 = arith.addf %275, %278 : vector<8x128xf32>
    %c82 = arith.constant 82 : index
    %280 = memref.load %arg8[%c82] : memref<100xf32, #tpu.memory_space<smem>>
    %281 = vector.broadcast %280 : f32 to vector<8x128xf32>
    %282 = arith.mulf %281, %154 : vector<8x128xf32>
    %283 = arith.addf %279, %282 : vector<8x128xf32>
    %c92 = arith.constant 92 : index
    %284 = memref.load %arg8[%c92] : memref<100xf32, #tpu.memory_space<smem>>
    %285 = vector.broadcast %284 : f32 to vector<8x128xf32>
    %286 = arith.mulf %285, %170 : vector<8x128xf32>
    %287 = arith.addf %283, %286 : vector<8x128xf32>
    %c3_64 = arith.constant 3 : index
    %288 = memref.load %arg8[%c3_64] : memref<100xf32, #tpu.memory_space<smem>>
    %289 = vector.broadcast %288 : f32 to vector<8x128xf32>
    %290 = arith.mulf %289, %26 : vector<8x128xf32>
    %c13 = arith.constant 13 : index
    %291 = memref.load %arg8[%c13] : memref<100xf32, #tpu.memory_space<smem>>
    %292 = vector.broadcast %291 : f32 to vector<8x128xf32>
    %293 = arith.mulf %292, %42 : vector<8x128xf32>
    %294 = arith.addf %290, %293 : vector<8x128xf32>
    %c23 = arith.constant 23 : index
    %295 = memref.load %arg8[%c23] : memref<100xf32, #tpu.memory_space<smem>>
    %296 = vector.broadcast %295 : f32 to vector<8x128xf32>
    %297 = arith.mulf %296, %58 : vector<8x128xf32>
    %298 = arith.addf %294, %297 : vector<8x128xf32>
    %c33 = arith.constant 33 : index
    %299 = memref.load %arg8[%c33] : memref<100xf32, #tpu.memory_space<smem>>
    %300 = vector.broadcast %299 : f32 to vector<8x128xf32>
    %301 = arith.mulf %300, %74 : vector<8x128xf32>
    %302 = arith.addf %298, %301 : vector<8x128xf32>
    %c43 = arith.constant 43 : index
    %303 = memref.load %arg8[%c43] : memref<100xf32, #tpu.memory_space<smem>>
    %304 = vector.broadcast %303 : f32 to vector<8x128xf32>
    %305 = arith.mulf %304, %90 : vector<8x128xf32>
    %306 = arith.addf %302, %305 : vector<8x128xf32>
    %c53 = arith.constant 53 : index
    %307 = memref.load %arg8[%c53] : memref<100xf32, #tpu.memory_space<smem>>
    %308 = vector.broadcast %307 : f32 to vector<8x128xf32>
    %309 = arith.mulf %308, %106 : vector<8x128xf32>
    %310 = arith.addf %306, %309 : vector<8x128xf32>
    %c63 = arith.constant 63 : index
    %311 = memref.load %arg8[%c63] : memref<100xf32, #tpu.memory_space<smem>>
    %312 = vector.broadcast %311 : f32 to vector<8x128xf32>
    %313 = arith.mulf %312, %122 : vector<8x128xf32>
    %314 = arith.addf %310, %313 : vector<8x128xf32>
    %c73 = arith.constant 73 : index
    %315 = memref.load %arg8[%c73] : memref<100xf32, #tpu.memory_space<smem>>
    %316 = vector.broadcast %315 : f32 to vector<8x128xf32>
    %317 = arith.mulf %316, %138 : vector<8x128xf32>
    %318 = arith.addf %314, %317 : vector<8x128xf32>
    %c83 = arith.constant 83 : index
    %319 = memref.load %arg8[%c83] : memref<100xf32, #tpu.memory_space<smem>>
    %320 = vector.broadcast %319 : f32 to vector<8x128xf32>
    %321 = arith.mulf %320, %154 : vector<8x128xf32>
    %322 = arith.addf %318, %321 : vector<8x128xf32>
    %c93 = arith.constant 93 : index
    %323 = memref.load %arg8[%c93] : memref<100xf32, #tpu.memory_space<smem>>
    %324 = vector.broadcast %323 : f32 to vector<8x128xf32>
    %325 = arith.mulf %324, %170 : vector<8x128xf32>
    %326 = arith.addf %322, %325 : vector<8x128xf32>
    %c4_65 = arith.constant 4 : index
    %327 = memref.load %arg8[%c4_65] : memref<100xf32, #tpu.memory_space<smem>>
    %328 = vector.broadcast %327 : f32 to vector<8x128xf32>
    %329 = arith.mulf %328, %26 : vector<8x128xf32>
    %c14 = arith.constant 14 : index
    %330 = memref.load %arg8[%c14] : memref<100xf32, #tpu.memory_space<smem>>
    %331 = vector.broadcast %330 : f32 to vector<8x128xf32>
    %332 = arith.mulf %331, %42 : vector<8x128xf32>
    %333 = arith.addf %329, %332 : vector<8x128xf32>
    %c24 = arith.constant 24 : index
    %334 = memref.load %arg8[%c24] : memref<100xf32, #tpu.memory_space<smem>>
    %335 = vector.broadcast %334 : f32 to vector<8x128xf32>
    %336 = arith.mulf %335, %58 : vector<8x128xf32>
    %337 = arith.addf %333, %336 : vector<8x128xf32>
    %c34 = arith.constant 34 : index
    %338 = memref.load %arg8[%c34] : memref<100xf32, #tpu.memory_space<smem>>
    %339 = vector.broadcast %338 : f32 to vector<8x128xf32>
    %340 = arith.mulf %339, %74 : vector<8x128xf32>
    %341 = arith.addf %337, %340 : vector<8x128xf32>
    %c44 = arith.constant 44 : index
    %342 = memref.load %arg8[%c44] : memref<100xf32, #tpu.memory_space<smem>>
    %343 = vector.broadcast %342 : f32 to vector<8x128xf32>
    %344 = arith.mulf %343, %90 : vector<8x128xf32>
    %345 = arith.addf %341, %344 : vector<8x128xf32>
    %c54 = arith.constant 54 : index
    %346 = memref.load %arg8[%c54] : memref<100xf32, #tpu.memory_space<smem>>
    %347 = vector.broadcast %346 : f32 to vector<8x128xf32>
    %348 = arith.mulf %347, %106 : vector<8x128xf32>
    %349 = arith.addf %345, %348 : vector<8x128xf32>
    %c64 = arith.constant 64 : index
    %350 = memref.load %arg8[%c64] : memref<100xf32, #tpu.memory_space<smem>>
    %351 = vector.broadcast %350 : f32 to vector<8x128xf32>
    %352 = arith.mulf %351, %122 : vector<8x128xf32>
    %353 = arith.addf %349, %352 : vector<8x128xf32>
    %c74 = arith.constant 74 : index
    %354 = memref.load %arg8[%c74] : memref<100xf32, #tpu.memory_space<smem>>
    %355 = vector.broadcast %354 : f32 to vector<8x128xf32>
    %356 = arith.mulf %355, %138 : vector<8x128xf32>
    %357 = arith.addf %353, %356 : vector<8x128xf32>
    %c84 = arith.constant 84 : index
    %358 = memref.load %arg8[%c84] : memref<100xf32, #tpu.memory_space<smem>>
    %359 = vector.broadcast %358 : f32 to vector<8x128xf32>
    %360 = arith.mulf %359, %154 : vector<8x128xf32>
    %361 = arith.addf %357, %360 : vector<8x128xf32>
    %c94 = arith.constant 94 : index
    %362 = memref.load %arg8[%c94] : memref<100xf32, #tpu.memory_space<smem>>
    %363 = vector.broadcast %362 : f32 to vector<8x128xf32>
    %364 = arith.mulf %363, %170 : vector<8x128xf32>
    %365 = arith.addf %361, %364 : vector<8x128xf32>
    %c5_66 = arith.constant 5 : index
    %366 = memref.load %arg8[%c5_66] : memref<100xf32, #tpu.memory_space<smem>>
    %367 = vector.broadcast %366 : f32 to vector<8x128xf32>
    %368 = arith.mulf %367, %26 : vector<8x128xf32>
    %c15 = arith.constant 15 : index
    %369 = memref.load %arg8[%c15] : memref<100xf32, #tpu.memory_space<smem>>
    %370 = vector.broadcast %369 : f32 to vector<8x128xf32>
    %371 = arith.mulf %370, %42 : vector<8x128xf32>
    %372 = arith.addf %368, %371 : vector<8x128xf32>
    %c25 = arith.constant 25 : index
    %373 = memref.load %arg8[%c25] : memref<100xf32, #tpu.memory_space<smem>>
    %374 = vector.broadcast %373 : f32 to vector<8x128xf32>
    %375 = arith.mulf %374, %58 : vector<8x128xf32>
    %376 = arith.addf %372, %375 : vector<8x128xf32>
    %c35 = arith.constant 35 : index
    %377 = memref.load %arg8[%c35] : memref<100xf32, #tpu.memory_space<smem>>
    %378 = vector.broadcast %377 : f32 to vector<8x128xf32>
    %379 = arith.mulf %378, %74 : vector<8x128xf32>
    %380 = arith.addf %376, %379 : vector<8x128xf32>
    %c45 = arith.constant 45 : index
    %381 = memref.load %arg8[%c45] : memref<100xf32, #tpu.memory_space<smem>>
    %382 = vector.broadcast %381 : f32 to vector<8x128xf32>
    %383 = arith.mulf %382, %90 : vector<8x128xf32>
    %384 = arith.addf %380, %383 : vector<8x128xf32>
    %c55 = arith.constant 55 : index
    %385 = memref.load %arg8[%c55] : memref<100xf32, #tpu.memory_space<smem>>
    %386 = vector.broadcast %385 : f32 to vector<8x128xf32>
    %387 = arith.mulf %386, %106 : vector<8x128xf32>
    %388 = arith.addf %384, %387 : vector<8x128xf32>
    %c65 = arith.constant 65 : index
    %389 = memref.load %arg8[%c65] : memref<100xf32, #tpu.memory_space<smem>>
    %390 = vector.broadcast %389 : f32 to vector<8x128xf32>
    %391 = arith.mulf %390, %122 : vector<8x128xf32>
    %392 = arith.addf %388, %391 : vector<8x128xf32>
    %c75 = arith.constant 75 : index
    %393 = memref.load %arg8[%c75] : memref<100xf32, #tpu.memory_space<smem>>
    %394 = vector.broadcast %393 : f32 to vector<8x128xf32>
    %395 = arith.mulf %394, %138 : vector<8x128xf32>
    %396 = arith.addf %392, %395 : vector<8x128xf32>
    %c85 = arith.constant 85 : index
    %397 = memref.load %arg8[%c85] : memref<100xf32, #tpu.memory_space<smem>>
    %398 = vector.broadcast %397 : f32 to vector<8x128xf32>
    %399 = arith.mulf %398, %154 : vector<8x128xf32>
    %400 = arith.addf %396, %399 : vector<8x128xf32>
    %c95 = arith.constant 95 : index
    %401 = memref.load %arg8[%c95] : memref<100xf32, #tpu.memory_space<smem>>
    %402 = vector.broadcast %401 : f32 to vector<8x128xf32>
    %403 = arith.mulf %402, %170 : vector<8x128xf32>
    %404 = arith.addf %400, %403 : vector<8x128xf32>
    %c6_67 = arith.constant 6 : index
    %405 = memref.load %arg8[%c6_67] : memref<100xf32, #tpu.memory_space<smem>>
    %406 = vector.broadcast %405 : f32 to vector<8x128xf32>
    %407 = arith.mulf %406, %26 : vector<8x128xf32>
    %c16 = arith.constant 16 : index
    %408 = memref.load %arg8[%c16] : memref<100xf32, #tpu.memory_space<smem>>
    %409 = vector.broadcast %408 : f32 to vector<8x128xf32>
    %410 = arith.mulf %409, %42 : vector<8x128xf32>
    %411 = arith.addf %407, %410 : vector<8x128xf32>
    %c26 = arith.constant 26 : index
    %412 = memref.load %arg8[%c26] : memref<100xf32, #tpu.memory_space<smem>>
    %413 = vector.broadcast %412 : f32 to vector<8x128xf32>
    %414 = arith.mulf %413, %58 : vector<8x128xf32>
    %415 = arith.addf %411, %414 : vector<8x128xf32>
    %c36 = arith.constant 36 : index
    %416 = memref.load %arg8[%c36] : memref<100xf32, #tpu.memory_space<smem>>
    %417 = vector.broadcast %416 : f32 to vector<8x128xf32>
    %418 = arith.mulf %417, %74 : vector<8x128xf32>
    %419 = arith.addf %415, %418 : vector<8x128xf32>
    %c46 = arith.constant 46 : index
    %420 = memref.load %arg8[%c46] : memref<100xf32, #tpu.memory_space<smem>>
    %421 = vector.broadcast %420 : f32 to vector<8x128xf32>
    %422 = arith.mulf %421, %90 : vector<8x128xf32>
    %423 = arith.addf %419, %422 : vector<8x128xf32>
    %c56 = arith.constant 56 : index
    %424 = memref.load %arg8[%c56] : memref<100xf32, #tpu.memory_space<smem>>
    %425 = vector.broadcast %424 : f32 to vector<8x128xf32>
    %426 = arith.mulf %425, %106 : vector<8x128xf32>
    %427 = arith.addf %423, %426 : vector<8x128xf32>
    %c66 = arith.constant 66 : index
    %428 = memref.load %arg8[%c66] : memref<100xf32, #tpu.memory_space<smem>>
    %429 = vector.broadcast %428 : f32 to vector<8x128xf32>
    %430 = arith.mulf %429, %122 : vector<8x128xf32>
    %431 = arith.addf %427, %430 : vector<8x128xf32>
    %c76 = arith.constant 76 : index
    %432 = memref.load %arg8[%c76] : memref<100xf32, #tpu.memory_space<smem>>
    %433 = vector.broadcast %432 : f32 to vector<8x128xf32>
    %434 = arith.mulf %433, %138 : vector<8x128xf32>
    %435 = arith.addf %431, %434 : vector<8x128xf32>
    %c86 = arith.constant 86 : index
    %436 = memref.load %arg8[%c86] : memref<100xf32, #tpu.memory_space<smem>>
    %437 = vector.broadcast %436 : f32 to vector<8x128xf32>
    %438 = arith.mulf %437, %154 : vector<8x128xf32>
    %439 = arith.addf %435, %438 : vector<8x128xf32>
    %c96 = arith.constant 96 : index
    %440 = memref.load %arg8[%c96] : memref<100xf32, #tpu.memory_space<smem>>
    %441 = vector.broadcast %440 : f32 to vector<8x128xf32>
    %442 = arith.mulf %441, %170 : vector<8x128xf32>
    %443 = arith.addf %439, %442 : vector<8x128xf32>
    %c7_68 = arith.constant 7 : index
    %444 = memref.load %arg8[%c7_68] : memref<100xf32, #tpu.memory_space<smem>>
    %445 = vector.broadcast %444 : f32 to vector<8x128xf32>
    %446 = arith.mulf %445, %26 : vector<8x128xf32>
    %c17 = arith.constant 17 : index
    %447 = memref.load %arg8[%c17] : memref<100xf32, #tpu.memory_space<smem>>
    %448 = vector.broadcast %447 : f32 to vector<8x128xf32>
    %449 = arith.mulf %448, %42 : vector<8x128xf32>
    %450 = arith.addf %446, %449 : vector<8x128xf32>
    %c27 = arith.constant 27 : index
    %451 = memref.load %arg8[%c27] : memref<100xf32, #tpu.memory_space<smem>>
    %452 = vector.broadcast %451 : f32 to vector<8x128xf32>
    %453 = arith.mulf %452, %58 : vector<8x128xf32>
    %454 = arith.addf %450, %453 : vector<8x128xf32>
    %c37 = arith.constant 37 : index
    %455 = memref.load %arg8[%c37] : memref<100xf32, #tpu.memory_space<smem>>
    %456 = vector.broadcast %455 : f32 to vector<8x128xf32>
    %457 = arith.mulf %456, %74 : vector<8x128xf32>
    %458 = arith.addf %454, %457 : vector<8x128xf32>
    %c47 = arith.constant 47 : index
    %459 = memref.load %arg8[%c47] : memref<100xf32, #tpu.memory_space<smem>>
    %460 = vector.broadcast %459 : f32 to vector<8x128xf32>
    %461 = arith.mulf %460, %90 : vector<8x128xf32>
    %462 = arith.addf %458, %461 : vector<8x128xf32>
    %c57 = arith.constant 57 : index
    %463 = memref.load %arg8[%c57] : memref<100xf32, #tpu.memory_space<smem>>
    %464 = vector.broadcast %463 : f32 to vector<8x128xf32>
    %465 = arith.mulf %464, %106 : vector<8x128xf32>
    %466 = arith.addf %462, %465 : vector<8x128xf32>
    %c67 = arith.constant 67 : index
    %467 = memref.load %arg8[%c67] : memref<100xf32, #tpu.memory_space<smem>>
    %468 = vector.broadcast %467 : f32 to vector<8x128xf32>
    %469 = arith.mulf %468, %122 : vector<8x128xf32>
    %470 = arith.addf %466, %469 : vector<8x128xf32>
    %c77 = arith.constant 77 : index
    %471 = memref.load %arg8[%c77] : memref<100xf32, #tpu.memory_space<smem>>
    %472 = vector.broadcast %471 : f32 to vector<8x128xf32>
    %473 = arith.mulf %472, %138 : vector<8x128xf32>
    %474 = arith.addf %470, %473 : vector<8x128xf32>
    %c87 = arith.constant 87 : index
    %475 = memref.load %arg8[%c87] : memref<100xf32, #tpu.memory_space<smem>>
    %476 = vector.broadcast %475 : f32 to vector<8x128xf32>
    %477 = arith.mulf %476, %154 : vector<8x128xf32>
    %478 = arith.addf %474, %477 : vector<8x128xf32>
    %c97 = arith.constant 97 : index
    %479 = memref.load %arg8[%c97] : memref<100xf32, #tpu.memory_space<smem>>
    %480 = vector.broadcast %479 : f32 to vector<8x128xf32>
    %481 = arith.mulf %480, %170 : vector<8x128xf32>
    %482 = arith.addf %478, %481 : vector<8x128xf32>
    %c8_69 = arith.constant 8 : index
    %483 = memref.load %arg8[%c8_69] : memref<100xf32, #tpu.memory_space<smem>>
    %484 = vector.broadcast %483 : f32 to vector<8x128xf32>
    %485 = arith.mulf %484, %26 : vector<8x128xf32>
    %c18 = arith.constant 18 : index
    %486 = memref.load %arg8[%c18] : memref<100xf32, #tpu.memory_space<smem>>
    %487 = vector.broadcast %486 : f32 to vector<8x128xf32>
    %488 = arith.mulf %487, %42 : vector<8x128xf32>
    %489 = arith.addf %485, %488 : vector<8x128xf32>
    %c28 = arith.constant 28 : index
    %490 = memref.load %arg8[%c28] : memref<100xf32, #tpu.memory_space<smem>>
    %491 = vector.broadcast %490 : f32 to vector<8x128xf32>
    %492 = arith.mulf %491, %58 : vector<8x128xf32>
    %493 = arith.addf %489, %492 : vector<8x128xf32>
    %c38 = arith.constant 38 : index
    %494 = memref.load %arg8[%c38] : memref<100xf32, #tpu.memory_space<smem>>
    %495 = vector.broadcast %494 : f32 to vector<8x128xf32>
    %496 = arith.mulf %495, %74 : vector<8x128xf32>
    %497 = arith.addf %493, %496 : vector<8x128xf32>
    %c48 = arith.constant 48 : index
    %498 = memref.load %arg8[%c48] : memref<100xf32, #tpu.memory_space<smem>>
    %499 = vector.broadcast %498 : f32 to vector<8x128xf32>
    %500 = arith.mulf %499, %90 : vector<8x128xf32>
    %501 = arith.addf %497, %500 : vector<8x128xf32>
    %c58 = arith.constant 58 : index
    %502 = memref.load %arg8[%c58] : memref<100xf32, #tpu.memory_space<smem>>
    %503 = vector.broadcast %502 : f32 to vector<8x128xf32>
    %504 = arith.mulf %503, %106 : vector<8x128xf32>
    %505 = arith.addf %501, %504 : vector<8x128xf32>
    %c68 = arith.constant 68 : index
    %506 = memref.load %arg8[%c68] : memref<100xf32, #tpu.memory_space<smem>>
    %507 = vector.broadcast %506 : f32 to vector<8x128xf32>
    %508 = arith.mulf %507, %122 : vector<8x128xf32>
    %509 = arith.addf %505, %508 : vector<8x128xf32>
    %c78 = arith.constant 78 : index
    %510 = memref.load %arg8[%c78] : memref<100xf32, #tpu.memory_space<smem>>
    %511 = vector.broadcast %510 : f32 to vector<8x128xf32>
    %512 = arith.mulf %511, %138 : vector<8x128xf32>
    %513 = arith.addf %509, %512 : vector<8x128xf32>
    %c88 = arith.constant 88 : index
    %514 = memref.load %arg8[%c88] : memref<100xf32, #tpu.memory_space<smem>>
    %515 = vector.broadcast %514 : f32 to vector<8x128xf32>
    %516 = arith.mulf %515, %154 : vector<8x128xf32>
    %517 = arith.addf %513, %516 : vector<8x128xf32>
    %c98 = arith.constant 98 : index
    %518 = memref.load %arg8[%c98] : memref<100xf32, #tpu.memory_space<smem>>
    %519 = vector.broadcast %518 : f32 to vector<8x128xf32>
    %520 = arith.mulf %519, %170 : vector<8x128xf32>
    %521 = arith.addf %517, %520 : vector<8x128xf32>
    %c9_70 = arith.constant 9 : index
    %522 = memref.load %arg8[%c9_70] : memref<100xf32, #tpu.memory_space<smem>>
    %523 = vector.broadcast %522 : f32 to vector<8x128xf32>
    %524 = arith.mulf %523, %26 : vector<8x128xf32>
    %c19 = arith.constant 19 : index
    %525 = memref.load %arg8[%c19] : memref<100xf32, #tpu.memory_space<smem>>
    %526 = vector.broadcast %525 : f32 to vector<8x128xf32>
    %527 = arith.mulf %526, %42 : vector<8x128xf32>
    %528 = arith.addf %524, %527 : vector<8x128xf32>
    %c29 = arith.constant 29 : index
    %529 = memref.load %arg8[%c29] : memref<100xf32, #tpu.memory_space<smem>>
    %530 = vector.broadcast %529 : f32 to vector<8x128xf32>
    %531 = arith.mulf %530, %58 : vector<8x128xf32>
    %532 = arith.addf %528, %531 : vector<8x128xf32>
    %c39 = arith.constant 39 : index
    %533 = memref.load %arg8[%c39] : memref<100xf32, #tpu.memory_space<smem>>
    %534 = vector.broadcast %533 : f32 to vector<8x128xf32>
    %535 = arith.mulf %534, %74 : vector<8x128xf32>
    %536 = arith.addf %532, %535 : vector<8x128xf32>
    %c49 = arith.constant 49 : index
    %537 = memref.load %arg8[%c49] : memref<100xf32, #tpu.memory_space<smem>>
    %538 = vector.broadcast %537 : f32 to vector<8x128xf32>
    %539 = arith.mulf %538, %90 : vector<8x128xf32>
    %540 = arith.addf %536, %539 : vector<8x128xf32>
    %c59 = arith.constant 59 : index
    %541 = memref.load %arg8[%c59] : memref<100xf32, #tpu.memory_space<smem>>
    %542 = vector.broadcast %541 : f32 to vector<8x128xf32>
    %543 = arith.mulf %542, %106 : vector<8x128xf32>
    %544 = arith.addf %540, %543 : vector<8x128xf32>
    %c69 = arith.constant 69 : index
    %545 = memref.load %arg8[%c69] : memref<100xf32, #tpu.memory_space<smem>>
    %546 = vector.broadcast %545 : f32 to vector<8x128xf32>
    %547 = arith.mulf %546, %122 : vector<8x128xf32>
    %548 = arith.addf %544, %547 : vector<8x128xf32>
    %c79 = arith.constant 79 : index
    %549 = memref.load %arg8[%c79] : memref<100xf32, #tpu.memory_space<smem>>
    %550 = vector.broadcast %549 : f32 to vector<8x128xf32>
    %551 = arith.mulf %550, %138 : vector<8x128xf32>
    %552 = arith.addf %548, %551 : vector<8x128xf32>
    %c89 = arith.constant 89 : index
    %553 = memref.load %arg8[%c89] : memref<100xf32, #tpu.memory_space<smem>>
    %554 = vector.broadcast %553 : f32 to vector<8x128xf32>
    %555 = arith.mulf %554, %154 : vector<8x128xf32>
    %556 = arith.addf %552, %555 : vector<8x128xf32>
    %c99 = arith.constant 99 : index
    %557 = memref.load %arg8[%c99] : memref<100xf32, #tpu.memory_space<smem>>
    %558 = vector.broadcast %557 : f32 to vector<8x128xf32>
    %559 = arith.mulf %558, %170 : vector<8x128xf32>
    %560 = arith.addf %556, %559 : vector<8x128xf32>
    %561 = tpu.concatenate %209, %248, %287, %326, %365, %404, %443, %482, %521, %560 in 0 : vector<8x128xf32>, vector<8x128xf32>, vector<8x128xf32>, vector<8x128xf32>, vector<8x128xf32>, vector<8x128xf32>, vector<8x128xf32>, vector<8x128xf32>, vector<8x128xf32>, vector<8x128xf32> -> vector<80x128xf32>
    %cst_71 = arith.constant dense<0.000000e+00> : vector<80x128xf32>
    %562 = tpu.matmul %561, %3, %cst_71 {dimension_numbers = #tpu.dot_dimension_numbers<[1], [0], [0], [1], [0, 0, 1, 1], [], []>} : vector<80x128xf32>, vector<128x128xf32>, vector<80x128xf32> -> vector<80x128xf32>
    %563 = vector.extract_strided_slice %562 {offsets = [0, 0], sizes = [8, 128], strides = [1, 1]} : vector<80x128xf32> to vector<8x128xf32>
    %c0_72 = arith.constant 0 : index
    %564 = memref.load %arg9[%c0_72] : memref<10xf32, #tpu.memory_space<smem>>
    %565 = vector.broadcast %564 : f32 to vector<8x128xf32>
    %566 = arith.addf %563, %565 : vector<8x128xf32>
    %cst_73 = arith.constant 0.000000e+00 : f32
    %567 = vector.broadcast %cst_73 : f32 to vector<8x128xf32>
    %568 = arith.cmpf ogt, %566, %567 : vector<8x128xf32>
    %569 = math.exp %566 : vector<8x128xf32>
    %cst_74 = arith.constant 1.000000e+00 : f32
    %570 = vector.broadcast %cst_74 : f32 to vector<8x128xf32>
    %571 = arith.subf %569, %570 : vector<8x128xf32>
    %cst_75 = arith.constant 1.67326319 : f32
    %572 = vector.broadcast %cst_75 : f32 to vector<8x128xf32>
    %573 = arith.mulf %572, %571 : vector<8x128xf32>
    %574 = arith.select %568, %566, %573 : vector<8x128xi1>, vector<8x128xf32>
    %cst_76 = arith.constant 1.05070102 : f32
    %575 = vector.broadcast %cst_76 : f32 to vector<8x128xf32>
    %576 = arith.mulf %575, %574 : vector<8x128xf32>
    %577 = vector.extract_strided_slice %562 {offsets = [8, 0], sizes = [8, 128], strides = [1, 1]} : vector<80x128xf32> to vector<8x128xf32>
    %c1_77 = arith.constant 1 : index
    %578 = memref.load %arg9[%c1_77] : memref<10xf32, #tpu.memory_space<smem>>
    %579 = vector.broadcast %578 : f32 to vector<8x128xf32>
    %580 = arith.addf %577, %579 : vector<8x128xf32>
    %cst_78 = arith.constant 0.000000e+00 : f32
    %581 = vector.broadcast %cst_78 : f32 to vector<8x128xf32>
    %582 = arith.cmpf ogt, %580, %581 : vector<8x128xf32>
    %583 = math.exp %580 : vector<8x128xf32>
    %cst_79 = arith.constant 1.000000e+00 : f32
    %584 = vector.broadcast %cst_79 : f32 to vector<8x128xf32>
    %585 = arith.subf %583, %584 : vector<8x128xf32>
    %cst_80 = arith.constant 1.67326319 : f32
    %586 = vector.broadcast %cst_80 : f32 to vector<8x128xf32>
    %587 = arith.mulf %586, %585 : vector<8x128xf32>
    %588 = arith.select %582, %580, %587 : vector<8x128xi1>, vector<8x128xf32>
    %cst_81 = arith.constant 1.05070102 : f32
    %589 = vector.broadcast %cst_81 : f32 to vector<8x128xf32>
    %590 = arith.mulf %589, %588 : vector<8x128xf32>
    %591 = vector.extract_strided_slice %562 {offsets = [16, 0], sizes = [8, 128], strides = [1, 1]} : vector<80x128xf32> to vector<8x128xf32>
    %c2_82 = arith.constant 2 : index
    %592 = memref.load %arg9[%c2_82] : memref<10xf32, #tpu.memory_space<smem>>
    %593 = vector.broadcast %592 : f32 to vector<8x128xf32>
    %594 = arith.addf %591, %593 : vector<8x128xf32>
    %cst_83 = arith.constant 0.000000e+00 : f32
    %595 = vector.broadcast %cst_83 : f32 to vector<8x128xf32>
    %596 = arith.cmpf ogt, %594, %595 : vector<8x128xf32>
    %597 = math.exp %594 : vector<8x128xf32>
    %cst_84 = arith.constant 1.000000e+00 : f32
    %598 = vector.broadcast %cst_84 : f32 to vector<8x128xf32>
    %599 = arith.subf %597, %598 : vector<8x128xf32>
    %cst_85 = arith.constant 1.67326319 : f32
    %600 = vector.broadcast %cst_85 : f32 to vector<8x128xf32>
    %601 = arith.mulf %600, %599 : vector<8x128xf32>
    %602 = arith.select %596, %594, %601 : vector<8x128xi1>, vector<8x128xf32>
    %cst_86 = arith.constant 1.05070102 : f32
    %603 = vector.broadcast %cst_86 : f32 to vector<8x128xf32>
    %604 = arith.mulf %603, %602 : vector<8x128xf32>
    %605 = vector.extract_strided_slice %562 {offsets = [24, 0], sizes = [8, 128], strides = [1, 1]} : vector<80x128xf32> to vector<8x128xf32>
    %c3_87 = arith.constant 3 : index
    %606 = memref.load %arg9[%c3_87] : memref<10xf32, #tpu.memory_space<smem>>
    %607 = vector.broadcast %606 : f32 to vector<8x128xf32>
    %608 = arith.addf %605, %607 : vector<8x128xf32>
    %cst_88 = arith.constant 0.000000e+00 : f32
    %609 = vector.broadcast %cst_88 : f32 to vector<8x128xf32>
    %610 = arith.cmpf ogt, %608, %609 : vector<8x128xf32>
    %611 = math.exp %608 : vector<8x128xf32>
    %cst_89 = arith.constant 1.000000e+00 : f32
    %612 = vector.broadcast %cst_89 : f32 to vector<8x128xf32>
    %613 = arith.subf %611, %612 : vector<8x128xf32>
    %cst_90 = arith.constant 1.67326319 : f32
    %614 = vector.broadcast %cst_90 : f32 to vector<8x128xf32>
    %615 = arith.mulf %614, %613 : vector<8x128xf32>
    %616 = arith.select %610, %608, %615 : vector<8x128xi1>, vector<8x128xf32>
    %cst_91 = arith.constant 1.05070102 : f32
    %617 = vector.broadcast %cst_91 : f32 to vector<8x128xf32>
    %618 = arith.mulf %617, %616 : vector<8x128xf32>
    %619 = vector.extract_strided_slice %562 {offsets = [32, 0], sizes = [8, 128], strides = [1, 1]} : vector<80x128xf32> to vector<8x128xf32>
    %c4_92 = arith.constant 4 : index
    %620 = memref.load %arg9[%c4_92] : memref<10xf32, #tpu.memory_space<smem>>
    %621 = vector.broadcast %620 : f32 to vector<8x128xf32>
    %622 = arith.addf %619, %621 : vector<8x128xf32>
    %cst_93 = arith.constant 0.000000e+00 : f32
    %623 = vector.broadcast %cst_93 : f32 to vector<8x128xf32>
    %624 = arith.cmpf ogt, %622, %623 : vector<8x128xf32>
    %625 = math.exp %622 : vector<8x128xf32>
    %cst_94 = arith.constant 1.000000e+00 : f32
    %626 = vector.broadcast %cst_94 : f32 to vector<8x128xf32>
    %627 = arith.subf %625, %626 : vector<8x128xf32>
    %cst_95 = arith.constant 1.67326319 : f32
    %628 = vector.broadcast %cst_95 : f32 to vector<8x128xf32>
    %629 = arith.mulf %628, %627 : vector<8x128xf32>
    %630 = arith.select %624, %622, %629 : vector<8x128xi1>, vector<8x128xf32>
    %cst_96 = arith.constant 1.05070102 : f32
    %631 = vector.broadcast %cst_96 : f32 to vector<8x128xf32>
    %632 = arith.mulf %631, %630 : vector<8x128xf32>
    %633 = vector.extract_strided_slice %562 {offsets = [40, 0], sizes = [8, 128], strides = [1, 1]} : vector<80x128xf32> to vector<8x128xf32>
    %c5_97 = arith.constant 5 : index
    %634 = memref.load %arg9[%c5_97] : memref<10xf32, #tpu.memory_space<smem>>
    %635 = vector.broadcast %634 : f32 to vector<8x128xf32>
    %636 = arith.addf %633, %635 : vector<8x128xf32>
    %cst_98 = arith.constant 0.000000e+00 : f32
    %637 = vector.broadcast %cst_98 : f32 to vector<8x128xf32>
    %638 = arith.cmpf ogt, %636, %637 : vector<8x128xf32>
    %639 = math.exp %636 : vector<8x128xf32>
    %cst_99 = arith.constant 1.000000e+00 : f32
    %640 = vector.broadcast %cst_99 : f32 to vector<8x128xf32>
    %641 = arith.subf %639, %640 : vector<8x128xf32>
    %cst_100 = arith.constant 1.67326319 : f32
    %642 = vector.broadcast %cst_100 : f32 to vector<8x128xf32>
    %643 = arith.mulf %642, %641 : vector<8x128xf32>
    %644 = arith.select %638, %636, %643 : vector<8x128xi1>, vector<8x128xf32>
    %cst_101 = arith.constant 1.05070102 : f32
    %645 = vector.broadcast %cst_101 : f32 to vector<8x128xf32>
    %646 = arith.mulf %645, %644 : vector<8x128xf32>
    %647 = vector.extract_strided_slice %562 {offsets = [48, 0], sizes = [8, 128], strides = [1, 1]} : vector<80x128xf32> to vector<8x128xf32>
    %c6_102 = arith.constant 6 : index
    %648 = memref.load %arg9[%c6_102] : memref<10xf32, #tpu.memory_space<smem>>
    %649 = vector.broadcast %648 : f32 to vector<8x128xf32>
    %650 = arith.addf %647, %649 : vector<8x128xf32>
    %cst_103 = arith.constant 0.000000e+00 : f32
    %651 = vector.broadcast %cst_103 : f32 to vector<8x128xf32>
    %652 = arith.cmpf ogt, %650, %651 : vector<8x128xf32>
    %653 = math.exp %650 : vector<8x128xf32>
    %cst_104 = arith.constant 1.000000e+00 : f32
    %654 = vector.broadcast %cst_104 : f32 to vector<8x128xf32>
    %655 = arith.subf %653, %654 : vector<8x128xf32>
    %cst_105 = arith.constant 1.67326319 : f32
    %656 = vector.broadcast %cst_105 : f32 to vector<8x128xf32>
    %657 = arith.mulf %656, %655 : vector<8x128xf32>
    %658 = arith.select %652, %650, %657 : vector<8x128xi1>, vector<8x128xf32>
    %cst_106 = arith.constant 1.05070102 : f32
    %659 = vector.broadcast %cst_106 : f32 to vector<8x128xf32>
    %660 = arith.mulf %659, %658 : vector<8x128xf32>
    %661 = vector.extract_strided_slice %562 {offsets = [56, 0], sizes = [8, 128], strides = [1, 1]} : vector<80x128xf32> to vector<8x128xf32>
    %c7_107 = arith.constant 7 : index
    %662 = memref.load %arg9[%c7_107] : memref<10xf32, #tpu.memory_space<smem>>
    %663 = vector.broadcast %662 : f32 to vector<8x128xf32>
    %664 = arith.addf %661, %663 : vector<8x128xf32>
    %cst_108 = arith.constant 0.000000e+00 : f32
    %665 = vector.broadcast %cst_108 : f32 to vector<8x128xf32>
    %666 = arith.cmpf ogt, %664, %665 : vector<8x128xf32>
    %667 = math.exp %664 : vector<8x128xf32>
    %cst_109 = arith.constant 1.000000e+00 : f32
    %668 = vector.broadcast %cst_109 : f32 to vector<8x128xf32>
    %669 = arith.subf %667, %668 : vector<8x128xf32>
    %cst_110 = arith.constant 1.67326319 : f32
    %670 = vector.broadcast %cst_110 : f32 to vector<8x128xf32>
    %671 = arith.mulf %670, %669 : vector<8x128xf32>
    %672 = arith.select %666, %664, %671 : vector<8x128xi1>, vector<8x128xf32>
    %cst_111 = arith.constant 1.05070102 : f32
    %673 = vector.broadcast %cst_111 : f32 to vector<8x128xf32>
    %674 = arith.mulf %673, %672 : vector<8x128xf32>
    %675 = vector.extract_strided_slice %562 {offsets = [64, 0], sizes = [8, 128], strides = [1, 1]} : vector<80x128xf32> to vector<8x128xf32>
    %c8_112 = arith.constant 8 : index
    %676 = memref.load %arg9[%c8_112] : memref<10xf32, #tpu.memory_space<smem>>
    %677 = vector.broadcast %676 : f32 to vector<8x128xf32>
    %678 = arith.addf %675, %677 : vector<8x128xf32>
    %cst_113 = arith.constant 0.000000e+00 : f32
    %679 = vector.broadcast %cst_113 : f32 to vector<8x128xf32>
    %680 = arith.cmpf ogt, %678, %679 : vector<8x128xf32>
    %681 = math.exp %678 : vector<8x128xf32>
    %cst_114 = arith.constant 1.000000e+00 : f32
    %682 = vector.broadcast %cst_114 : f32 to vector<8x128xf32>
    %683 = arith.subf %681, %682 : vector<8x128xf32>
    %cst_115 = arith.constant 1.67326319 : f32
    %684 = vector.broadcast %cst_115 : f32 to vector<8x128xf32>
    %685 = arith.mulf %684, %683 : vector<8x128xf32>
    %686 = arith.select %680, %678, %685 : vector<8x128xi1>, vector<8x128xf32>
    %cst_116 = arith.constant 1.05070102 : f32
    %687 = vector.broadcast %cst_116 : f32 to vector<8x128xf32>
    %688 = arith.mulf %687, %686 : vector<8x128xf32>
    %689 = vector.extract_strided_slice %562 {offsets = [72, 0], sizes = [8, 128], strides = [1, 1]} : vector<80x128xf32> to vector<8x128xf32>
    %c9_117 = arith.constant 9 : index
    %690 = memref.load %arg9[%c9_117] : memref<10xf32, #tpu.memory_space<smem>>
    %691 = vector.broadcast %690 : f32 to vector<8x128xf32>
    %692 = arith.addf %689, %691 : vector<8x128xf32>
    %cst_118 = arith.constant 0.000000e+00 : f32
    %693 = vector.broadcast %cst_118 : f32 to vector<8x128xf32>
    %694 = arith.cmpf ogt, %692, %693 : vector<8x128xf32>
    %695 = math.exp %692 : vector<8x128xf32>
    %cst_119 = arith.constant 1.000000e+00 : f32
    %696 = vector.broadcast %cst_119 : f32 to vector<8x128xf32>
    %697 = arith.subf %695, %696 : vector<8x128xf32>
    %cst_120 = arith.constant 1.67326319 : f32
    %698 = vector.broadcast %cst_120 : f32 to vector<8x128xf32>
    %699 = arith.mulf %698, %697 : vector<8x128xf32>
    %700 = arith.select %694, %692, %699 : vector<8x128xi1>, vector<8x128xf32>
    %cst_121 = arith.constant 1.05070102 : f32
    %701 = vector.broadcast %cst_121 : f32 to vector<8x128xf32>
    %702 = arith.mulf %701, %700 : vector<8x128xf32>
    %c0_122 = arith.constant 0 : index
    %703 = memref.load %arg10[%c0_122] : memref<10xf32, #tpu.memory_space<smem>>
    %704 = vector.broadcast %703 : f32 to vector<8x128xf32>
    %705 = arith.mulf %704, %576 : vector<8x128xf32>
    %c1_123 = arith.constant 1 : index
    %706 = memref.load %arg10[%c1_123] : memref<10xf32, #tpu.memory_space<smem>>
    %707 = vector.broadcast %706 : f32 to vector<8x128xf32>
    %708 = arith.mulf %707, %590 : vector<8x128xf32>
    %709 = arith.addf %705, %708 : vector<8x128xf32>
    %c2_124 = arith.constant 2 : index
    %710 = memref.load %arg10[%c2_124] : memref<10xf32, #tpu.memory_space<smem>>
    %711 = vector.broadcast %710 : f32 to vector<8x128xf32>
    %712 = arith.mulf %711, %604 : vector<8x128xf32>
    %713 = arith.addf %709, %712 : vector<8x128xf32>
    %c3_125 = arith.constant 3 : index
    %714 = memref.load %arg10[%c3_125] : memref<10xf32, #tpu.memory_space<smem>>
    %715 = vector.broadcast %714 : f32 to vector<8x128xf32>
    %716 = arith.mulf %715, %618 : vector<8x128xf32>
    %717 = arith.addf %713, %716 : vector<8x128xf32>
    %c4_126 = arith.constant 4 : index
    %718 = memref.load %arg10[%c4_126] : memref<10xf32, #tpu.memory_space<smem>>
    %719 = vector.broadcast %718 : f32 to vector<8x128xf32>
    %720 = arith.mulf %719, %632 : vector<8x128xf32>
    %721 = arith.addf %717, %720 : vector<8x128xf32>
    %c5_127 = arith.constant 5 : index
    %722 = memref.load %arg10[%c5_127] : memref<10xf32, #tpu.memory_space<smem>>
    %723 = vector.broadcast %722 : f32 to vector<8x128xf32>
    %724 = arith.mulf %723, %646 : vector<8x128xf32>
    %725 = arith.addf %721, %724 : vector<8x128xf32>
    %c6_128 = arith.constant 6 : index
    %726 = memref.load %arg10[%c6_128] : memref<10xf32, #tpu.memory_space<smem>>
    %727 = vector.broadcast %726 : f32 to vector<8x128xf32>
    %728 = arith.mulf %727, %660 : vector<8x128xf32>
    %729 = arith.addf %725, %728 : vector<8x128xf32>
    %c7_129 = arith.constant 7 : index
    %730 = memref.load %arg10[%c7_129] : memref<10xf32, #tpu.memory_space<smem>>
    %731 = vector.broadcast %730 : f32 to vector<8x128xf32>
    %732 = arith.mulf %731, %674 : vector<8x128xf32>
    %733 = arith.addf %729, %732 : vector<8x128xf32>
    %c8_130 = arith.constant 8 : index
    %734 = memref.load %arg10[%c8_130] : memref<10xf32, #tpu.memory_space<smem>>
    %735 = vector.broadcast %734 : f32 to vector<8x128xf32>
    %736 = arith.mulf %735, %688 : vector<8x128xf32>
    %737 = arith.addf %733, %736 : vector<8x128xf32>
    %c9_131 = arith.constant 9 : index
    %738 = memref.load %arg10[%c9_131] : memref<10xf32, #tpu.memory_space<smem>>
    %739 = vector.broadcast %738 : f32 to vector<8x128xf32>
    %740 = arith.mulf %739, %702 : vector<8x128xf32>
    %741 = arith.addf %737, %740 : vector<8x128xf32>
    %cst_132 = arith.constant dense<0.000000e+00> : vector<8x128xf32>
    %742 = tpu.matmul %741, %3, %cst_132 {dimension_numbers = #tpu.dot_dimension_numbers<[1], [0], [0], [1], [0, 0, 1, 1], [], []>} : vector<8x128xf32>, vector<128x128xf32>, vector<8x128xf32> -> vector<8x128xf32>
    %c0_133 = arith.constant 0 : index
    %743 = memref.load %arg11[%c0_133] : memref<1xf32, #tpu.memory_space<smem>>
    %744 = vector.broadcast %743 : f32 to vector<8x128xf32>
    %745 = arith.addf %742, %744 : vector<8x128xf32>
    %cst_134 = arith.constant 0.000000e+00 : f32
    %746 = vector.broadcast %cst_134 : f32 to vector<8x128xf32>
    %747 = arith.cmpf ogt, %745, %746 : vector<8x128xf32>
    %748 = math.exp %745 : vector<8x128xf32>
    %cst_135 = arith.constant 1.000000e+00 : f32
    %749 = vector.broadcast %cst_135 : f32 to vector<8x128xf32>
    %750 = arith.subf %748, %749 : vector<8x128xf32>
    %cst_136 = arith.constant 1.67326319 : f32
    %751 = vector.broadcast %cst_136 : f32 to vector<8x128xf32>
    %752 = arith.mulf %751, %750 : vector<8x128xf32>
    %753 = arith.select %747, %745, %752 : vector<8x128xi1>, vector<8x128xf32>
    %cst_137 = arith.constant 1.05070102 : f32
    %754 = vector.broadcast %cst_137 : f32 to vector<8x128xf32>
    %755 = arith.mulf %754, %753 : vector<8x128xf32>
    %c0_138 = arith.constant 0 : index
    %c0_139 = arith.constant 0 : index
    %756 = vector.load %arg12[%c0_138, %c0_139] : memref<128x128xf32, #tpu.memory_space<vmem>>, vector<128x128xf32>
    %cst_140 = arith.constant dense<0.000000e+00> : vector<8x128xf32>
    %757 = tpu.matmul %755, %756, %cst_140 {dimension_numbers = #tpu.dot_dimension_numbers<[1], [0], [0], [1], [0, 0, 1, 1], [], []>} : vector<8x128xf32>, vector<128x128xf32>, vector<8x128xf32> -> vector<8x128xf32>
    %c0_141 = arith.constant 0 : index
    %c0_142 = arith.constant 0 : index
    %758 = vector.load %arg13[%c0_141, %c0_142] : memref<1x128xf32, #tpu.memory_space<vmem>>, vector<1x128xf32>
    %759 = vector.broadcast %758 : vector<1x128xf32> to vector<8x128xf32>
    %760 = arith.addf %757, %759 : vector<8x128xf32>
    %cst_143 = arith.constant 0.000000e+00 : f32
    %761 = vector.broadcast %cst_143 : f32 to vector<8x128xf32>
    %762 = arith.cmpf ogt, %760, %761 : vector<8x128xf32>
    %763 = math.exp %760 : vector<8x128xf32>
    %cst_144 = arith.constant 1.000000e+00 : f32
    %764 = vector.broadcast %cst_144 : f32 to vector<8x128xf32>
    %765 = arith.subf %763, %764 : vector<8x128xf32>
    %cst_145 = arith.constant 1.67326319 : f32
    %766 = vector.broadcast %cst_145 : f32 to vector<8x128xf32>
    %767 = arith.mulf %766, %765 : vector<8x128xf32>
    %768 = arith.select %762, %760, %767 : vector<8x128xi1>, vector<8x128xf32>
    %cst_146 = arith.constant 1.05070102 : f32
    %769 = vector.broadcast %cst_146 : f32 to vector<8x128xf32>
    %770 = arith.mulf %769, %768 : vector<8x128xf32>
    %c0_147 = arith.constant 0 : index
    %c0_148 = arith.constant 0 : index
    %771 = vector.load %arg14[%c0_147, %c0_148] : memref<128x128xf32, #tpu.memory_space<vmem>>, vector<128x128xf32>
    %cst_149 = arith.constant dense<0.000000e+00> : vector<8x128xf32>
    %772 = tpu.matmul %770, %771, %cst_149 {dimension_numbers = #tpu.dot_dimension_numbers<[1], [0], [0], [1], [0, 0, 1, 1], [], []>} : vector<8x128xf32>, vector<128x128xf32>, vector<8x128xf32> -> vector<8x128xf32>
    %c0_150 = arith.constant 0 : index
    %c0_151 = arith.constant 0 : index
    %773 = vector.load %arg15[%c0_150, %c0_151] : memref<1x128xf32, #tpu.memory_space<vmem>>, vector<1x128xf32>
    %774 = vector.broadcast %773 : vector<1x128xf32> to vector<8x128xf32>
    %775 = arith.addf %772, %774 : vector<8x128xf32>
    %776 = vector.broadcast %2 : vector<1x128xf32> to vector<8x128xf32>
    %777 = arith.mulf %775, %776 : vector<8x128xf32>
    %778 = vector.broadcast %1 : vector<1x128xf32> to vector<8x128xf32>
    %779 = arith.addf %778, %777 : vector<8x128xf32>
    %c0_152 = arith.constant 0 : index
    %c0_153 = arith.constant 0 : index
    %780 = vector.load %arg16[%c0_152, %c0_153] : memref<8x128xf32, #tpu.memory_space<vmem>>, vector<8x128xf32>
    tpu.vector_store %arg16[%c0_152, %c0_153], %779 {strides = array<i32>} : memref<8x128xf32, #tpu.memory_space<vmem>>, vector<8x128xf32>,
    return
  }
  func.func @transform_0(%arg0: i32) -> (i32, i32) {
    %c0_i32 = arith.constant 0 : i32
    %c0_i32_0 = arith.constant 0 : i32
    return %arg0, %c0_i32 : i32, i32
  }
  func.func @transform_1(%arg0: i32) -> (i32, i32) {
    %c0_i32 = arith.constant 0 : i32
    %c0_i32_0 = arith.constant 0 : i32
    %c0_i32_1 = arith.constant 0 : i32
    return %c0_i32, %c0_i32_0 : i32, i32
  }
  func.func @transform_2(%arg0: i32) -> (i32, i32) {
    %c0_i32 = arith.constant 0 : i32
    %c0_i32_0 = arith.constant 0 : i32
    %c0_i32_1 = arith.constant 0 : i32
    return %c0_i32, %c0_i32_0 : i32, i32
  }
  func.func @transform_3(%arg0: i32) -> (i32, i32) {
    %c0_i32 = arith.constant 0 : i32
    %c0_i32_0 = arith.constant 0 : i32
    %c0_i32_1 = arith.constant 0 : i32
    return %c0_i32, %c0_i32_0 : i32, i32
  }
  func.func @transform_4(%arg0: i32) -> (i32, i32) {
    %c0_i32 = arith.constant 0 : i32
    %c0_i32_0 = arith.constant 0 : i32
    %c0_i32_1 = arith.constant 0 : i32
    return %c0_i32, %c0_i32_0 : i32, i32
  }
  func.func @transform_5(%arg0: i32) -> i32 {
    %c0_i32 = arith.constant 0 : i32
    %c0_i32_0 = arith.constant 0 : i32
    return %c0_i32 : i32
  }
  func.func @transform_6(%arg0: i32) -> i32 {
    %c0_i32 = arith.constant 0 : i32
    %c0_i32_0 = arith.constant 0 : i32
    return %c0_i32 : i32
  }
  func.func @transform_7(%arg0: i32) -> i32 {
    %c0_i32 = arith.constant 0 : i32
    %c0_i32_0 = arith.constant 0 : i32
    return %c0_i32 : i32
  }
  func.func @transform_8(%arg0: i32) -> i32 {
    %c0_i32 = arith.constant 0 : i32
    %c0_i32_0 = arith.constant 0 : i32
    return %c0_i32 : i32
  }
  func.func @transform_9(%arg0: i32) -> i32 {
    %c0_i32 = arith.constant 0 : i32
    %c0_i32_0 = arith.constant 0 : i32
    return %c0_i32 : i32
  }
  func.func @transform_10(%arg0: i32) -> i32 {
    %c0_i32 = arith.constant 0 : i32
    %c0_i32_0 = arith.constant 0 : i32
    return %c0_i32 : i32
  }
  func.func @transform_11(%arg0: i32) -> (i32, i32) {
    %c0_i32 = arith.constant 0 : i32
    %c0_i32_0 = arith.constant 0 : i32
    %c0_i32_1 = arith.constant 0 : i32
    return %c0_i32, %c0_i32_0 : i32, i32
  }
  func.func @transform_12(%arg0: i32) -> (i32, i32) {
    %c0_i32 = arith.constant 0 : i32
    %c0_i32_0 = arith.constant 0 : i32
    %c0_i32_1 = arith.constant 0 : i32
    return %c0_i32, %c0_i32_0 : i32, i32
  }
  func.func @transform_13(%arg0: i32) -> (i32, i32) {
    %c0_i32 = arith.constant 0 : i32
    %c0_i32_0 = arith.constant 0 : i32
    %c0_i32_1 = arith.constant 0 : i32
    return %c0_i32, %c0_i32_0 : i32, i32
  }
  func.func @transform_14(%arg0: i32) -> (i32, i32) {
    %c0_i32 = arith.constant 0 : i32
    %c0_i32_0 = arith.constant 0 : i32
    %c0_i32_1 = arith.constant 0 : i32
    return %c0_i32, %c0_i32_0 : i32, i32
  }
  func.func @transform_15(%arg0: i32) -> (i32, i32) {
    %c0_i32 = arith.constant 0 : i32
    %c0_i32_0 = arith.constant 0 : i32
    return %arg0, %c0_i32 : i32, i32
  }
}

</mosaic_0001>

<bundles_post_ra>
// kernel: tpu_custom_call.1
= control target key start
LH: loop header
LB: loop body
LE: loop exit
PB: predicated region body
PF: predicated region fallthrough
CT: control target
= control target key end

     0   :  { %s3426_s0 = inlined_call_operand.hbm [shape: f32[8,128], index: 0, kind: input, shape index: {}]   ;;  %s3427_s1 = inlined_call_operand.hbm [shape: f32[128,128], index: 1, kind: input, shape index: {}]   ;;  %s3428_s2 = inlined_call_operand.vmem [shape: f32[1,128], index: 2, kind: input, shape index: {}]   ;;  %s3429_s3 = inlined_call_operand.vmem [shape: f32[1,128], index: 3, kind: input, shape index: {}]   ;;  %s3430_s4 = inlined_call_operand.hbm [shape: f32[128,128], index: 4, kind: input, shape index: {}]   ;;  %s3431_s5 = inlined_call_operand.vmem [shape: f32[10], index: 5, kind: input, shape index: {}]   ;;  %s3432_s6 = inlined_call_operand.vmem [shape: f32[10], index: 6, kind: input, shape index: {}]   ;;  %s3433_s7 = inlined_call_operand.vmem [shape: f32[100], index: 7, kind: input, shape index: {}]   ;;  %s3434_s8 = inlined_call_operand.vmem [shape: f32[10], index: 8, kind: input, shape index: {}]   ;;  %s3435_s9 = inlined_call_operand.vmem [shape: f32[10], index: 9, kind: input, shape index: {}]   ;;  %s3436_s10 = inlined_call_operand.<no memory space> [shape: f32[1], index: 10, kind: input, shape index: {}]   ;;  %s3437_s11 = inlined_call_operand.hbm [shape: f32[128,128], index: 11, kind: input, shape index: {}]   ;;  %s3438_s12 = inlined_call_operand.vmem [shape: f32[1,128], index: 12, kind: input, shape index: {}]   ;;  %s3439_s13 = inlined_call_operand.hbm [shape: f32[128,128], index: 13, kind: input, shape index: {}]   ;;  %s3440_s14 = inlined_call_operand.vmem [shape: f32[1,128], index: 14, kind: input, shape index: {}]   ;;  %s3441_s15 = inlined_call_operand.hbm [shape: f32[8,128], index: 15, kind: output, shape index: {}]  }
   0x1   :  { %3543 = sst [smem:[#allocation105_spill]] %s3428_s2 }
   0x2   :  { %3544 = sst [smem:[#allocation106_spill]] %s3429_s3 }
   0x3   :  { %3545 = sst [smem:[#allocation107_spill]] %s3436_s10 }
   0x4   :  { %3546 = sst [smem:[#allocation108_spill]] %s3438_s12 }
   0x5   :  { %3547 = sst [smem:[#allocation109_spill]] %s3440_s14 }
   0x6   :  { %3548 = sst [smem:[#allocation110_spill]] %s3441_s15 }
   0x7   :  { %21 = vsyncpa [#allocation4], 0 }
   0x8   :  { %22 = vsyncpa [#allocation8], 0 }
   0x9   :  { %23 = vsyncpa [#allocation6], 0 }
   0xa   :  { %24 = vsyncpa [#allocation12], 0 }
   0xb   :  { %25 = vsyncpa [#allocation15], 0 }
   0xc   :  { %26 = vsyncpa [#allocation18], 0 }
   0xd   :  { %27 = vsyncpa [#allocation5], 0  ;;  %s2349_s18 = smov [#allocation7]   ;;  %s82_s22 = sshll.u32 %s3432_s6, 4  ;;  %s83_s22 = int_to_ptr.vmem [resolvable:$true] %s82_s22 }
   0xe   :  { %s43_s19 = sshll.u32 %s2349_s18, 4  ;;  %s2143_s25 = scalar_lea.hbm %s3427_s1, 2048  ;;  %s44_s19 = int_to_ptr.vmem [resolvable:$true] %s43_s19 }
   0xf   :  { %p2144_p0 = scmp.ne.s32.totalorder %s3427_s1, %s2143_s25  ;;  %p2147_p1 = scmp.lt.u32.totalorder %s2143_s25, %s3427_s1 }
  0x11   :  { %p2149_p2 = pnand %p2147_p1, %p2144_p0 }
  0x13   :  { %2152 = shalt.err (!%p2149_p2)
}
  0x14   :  { %s2153_s30 = scalar_lea.vmem %s44_s19, 2048  ;;  %p2158_p4 = scmp.lt.s32.totalorder %s44_s19, %s44_s19 }
  0x15   :  { %p2154_p3 = scmp.ne.s32.totalorder %s44_s19, %s2153_s30  ;;  %p2159_p5 = scmp.lt.s32.totalorder %s2153_s30, %s2153_s30 }
  0x17   :  { %p2160_p6 = por %p2159_p5, %p2158_p4 }
  0x19   :  { %p2161_p7 = pnand %p2160_p6, %p2154_p3 }
  0x1b   :  { %2164 = shalt.err (!%p2161_p7)
}
  0x1c   :  { %s2350_s6 = smov 128   ;;  %s2351_s16 = smov 8  }
  0x1d   :  { %49 = dma.hbm_to_vmem [thread:$0]  %s3427_s1, 2048, %s44_s19, [#allocation8], %s2350_s6, %s2350_s6, %s2351_s16  }
  0x1e   :  { %s2165_s20 = scalar_lea.vmem %s83_s22, 16  ;;  %p2170_p9 = scmp.lt.s32.totalorder %s83_s22, %s83_s22 }
  0x1f   :  { %p2166_p8 = scmp.ne.s32.totalorder %s83_s22, %s2165_s20  ;;  %p2171_p10 = scmp.lt.s32.totalorder %s2165_s20, %s2165_s20 }
  0x21   :  { %p2172_p11 = por %p2171_p10, %p2170_p9 }
  0x23   :  { %p2173_p12 = pnand %p2172_p11, %p2166_p8 }
  0x25   :  { %2176 = shalt.err (!%p2173_p12)
}
  0x26   :  { %s2352_s21 = smov [#allocation11]   ;;  %s102_s25 = sshll.u32 %s3434_s8, 4  ;;  %s103_s25 = int_to_ptr.vmem [resolvable:$true] %s102_s25 }
  0x27   :  { %85 = dma.vmem_to_smem %s83_s22, 16, %s2352_s21, [#allocation12]  }
  0x28   :  { %s2177_s26 = scalar_lea.vmem %s103_s25, 16  ;;  %p2182_p0 = scmp.lt.s32.totalorder %s103_s25, %s103_s25 }
  0x29   :  { %p2178_p13 = scmp.ne.s32.totalorder %s103_s25, %s2177_s26  ;;  %p2183_p1 = scmp.lt.s32.totalorder %s2177_s26, %s2177_s26 }
  0x2b   :  { %p2184_p2 = por %p2183_p1, %p2182_p0 }
  0x2d   :  { %p2185_p3 = pnand %p2184_p2, %p2178_p13 }
  0x2f   :  { %2188 = shalt.err (!%p2185_p3)
}
  0x30   :  { %s2353_s1 = smov [#allocation14]   ;;  %s2354_s19 = smov [#allocation17]  }
  0x31   :  { %105 = dma.vmem_to_smem %s103_s25, 16, %s2353_s1, [#allocation15]  }
  0x32   :  { %s123_s27 = sshll.u32 %s2354_s19, 4  ;;  %s2355_s28 = smov [#allocation3]   ;;  %s124_s27 = int_to_ptr.vmem [resolvable:$true] %s123_s27 }
  0x33   :  { %s34_s29 = sshll.u32 %s2355_s28, 4  ;;  %s2189_s17 = scalar_lea.hbm %s3437_s11, 2048  ;;  %s35_s29 = int_to_ptr.vmem [resolvable:$true] %s34_s29 }
  0x34   :  { %p2190_p4 = scmp.ne.s32.totalorder %s3437_s11, %s2189_s17  ;;  %p2193_p5 = scmp.lt.u32.totalorder %s2189_s17, %s3437_s11 }
  0x36   :  { %p2195_p6 = pnand %p2193_p5, %p2190_p4 }
  0x38   :  { %2198 = shalt.err (!%p2195_p6)
}
  0x39   :  { %s2199_s23 = scalar_lea.vmem %s124_s27, 2048  ;;  %p2204_p8 = scmp.lt.s32.totalorder %s124_s27, %s124_s27 }
  0x3a   :  { %p2200_p7 = scmp.ne.s32.totalorder %s124_s27, %s2199_s23  ;;  %p2205_p9 = scmp.lt.s32.totalorder %s2199_s23, %s2199_s23 }
  0x3c   :  { %p2206_p10 = por %p2205_p9, %p2204_p8 }
  0x3e   :  { %p2207_p11 = pnand %p2206_p10, %p2200_p7 }
  0x40   :  { %2210 = shalt.err (!%p2207_p11)
}
  0x41   :  { %129 = dma.hbm_to_vmem [thread:$0]  %s3437_s11, 2048, %s124_s27, [#allocation18], %s2350_s6, %s2350_s6, %s2351_s16  }
  0x42   :  { %s2211_s19 = scalar_lea.hbm %s3426_s0, 128 }
  0x43   :  { %p2212_p12 = scmp.ne.s32.totalorder %s3426_s0, %s2211_s19  ;;  %p2215_p13 = scmp.lt.u32.totalorder %s2211_s19, %s3426_s0 }
  0x45   :  { %p2217_p0 = pnand %p2215_p13, %p2212_p12 }
  0x47   :  { %2220 = shalt.err (!%p2217_p0)
}
  0x48   :  { %s2221_s8 = scalar_lea.vmem %s35_s29, 128  ;;  %p2226_p2 = scmp.lt.s32.totalorder %s35_s29, %s35_s29 }
  0x49   :  { %p2222_p1 = scmp.ne.s32.totalorder %s35_s29, %s2221_s8  ;;  %p2227_p3 = scmp.lt.s32.totalorder %s2221_s8, %s2221_s8 }
  0x4b   :  { %p2228_p4 = por %p2227_p3, %p2226_p2 }
  0x4d   :  { %p2229_p5 = pnand %p2228_p4, %p2222_p1 }
  0x4f   :  { %2232 = shalt.err (!%p2229_p5)
}
  0x50   :  { %37 = dma.hbm_to_vmem [thread:$0]  %s3426_s0, 128, %s35_s29, [#allocation4]  }
  0x51   :  { %s2356_s18 = smov [#allocation9]   ;;  %s72_s24 = sshll.u32 %s3431_s5, 4  ;;  %s73_s24 = int_to_ptr.vmem [resolvable:$true] %s72_s24 }
  0x52   :  { %s59_s20 = sshll.u32 %s2356_s18, 4  ;;  %s2233_s1 = scalar_lea.hbm %s3430_s4, 2048  ;;  %s60_s20 = int_to_ptr.vmem [resolvable:$true] %s59_s20 }
  0x53   :  { %p2234_p6 = scmp.ne.s32.totalorder %s3430_s4, %s2233_s1  ;;  %p2237_p7 = scmp.lt.u32.totalorder %s2233_s1, %s3430_s4 }
  0x55   :  { %p2239_p8 = pnand %p2237_p7, %p2234_p6 }
  0x57   :  { %2242 = shalt.err (!%p2239_p8)
}
  0x58   :  { %s2243_s0 = scalar_lea.vmem %s60_s20, 2048  ;;  %p2248_p10 = scmp.lt.s32.totalorder %s60_s20, %s60_s20 }
  0x59   :  { %p2244_p9 = scmp.ne.s32.totalorder %s60_s20, %s2243_s0  ;;  %p2249_p11 = scmp.lt.s32.totalorder %s2243_s0, %s2243_s0 }
  0x5b   :  { %p2250_p12 = por %p2249_p11, %p2248_p10 }
  0x5d   :  { %p2251_p13 = pnand %p2250_p12, %p2244_p9 }
  0x5f   :  { %2254 = shalt.err (!%p2251_p13)
}
  0x60   :  { %65 = dma.hbm_to_vmem [thread:$0]  %s3430_s4, 2048, %s60_s20, [#allocation8], %s2350_s6, %s2350_s6, %s2351_s16  }
  0x61   :  { %s92_s11 = sshll.u32 %s3433_s7, 4  ;;  %s2255_s27 = scalar_lea.vmem %s73_s24, 16  ;;  %s93_s11 = int_to_ptr.vmem [resolvable:$true] %s92_s11 }
  0x62   :  { %p2256_p0 = scmp.ne.s32.totalorder %s73_s24, %s2255_s27  ;;  %p2260_p1 = scmp.lt.s32.totalorder %s73_s24, %s73_s24 }
  0x63   :  { %p2261_p2 = scmp.lt.s32.totalorder %s2255_s27, %s2255_s27 }
  0x65   :  { %p2262_p3 = por %p2261_p2, %p2260_p1 }
  0x67   :  { %p2263_p4 = pnand %p2262_p3, %p2256_p0 }
  0x69   :  { %2266 = shalt.err (!%p2263_p4)
}
  0x6a   :  { %s2357_s18 = smov [#allocation10]   ;;  %s2267_s21 = scalar_lea.vmem %s93_s11, 16 }
  0x6b   :  { %75 = dma.vmem_to_smem %s73_s24, 16, %s2357_s18, [#allocation6]  }
  0x6c   :  { %p2268_p5 = scmp.ne.s32.totalorder %s93_s11, %s2267_s21  ;;  %p2272_p6 = scmp.lt.s32.totalorder %s93_s11, %s93_s11 }
  0x6d   :  { %p2273_p7 = scmp.lt.s32.totalorder %s2267_s21, %s2267_s21 }
  0x6f   :  { %p2274_p8 = por %p2273_p7, %p2272_p6 }
  0x71   :  { %p2275_p9 = pnand %p2274_p8, %p2268_p5 }
  0x73   :  { %2278 = shalt.err (!%p2275_p9)
}
  0x74   :  { %s2358_s4 = smov [#allocation13]   ;;  %s112_s23 = sshll.u32 %s3435_s9, 4  ;;  %s113_s23 = int_to_ptr.vmem [resolvable:$true] %s112_s23 }
  0x75   :  { %95 = dma.vmem_to_smem %s93_s11, 16, %s2358_s4, [#allocation12]  }
  0x76   :  { %s2279_s25 = scalar_lea.vmem %s113_s23, 16  ;;  %p2284_p11 = scmp.lt.s32.totalorder %s113_s23, %s113_s23 }
  0x77   :  { %p2280_p10 = scmp.ne.s32.totalorder %s113_s23, %s2279_s25  ;;  %p2285_p12 = scmp.lt.s32.totalorder %s2279_s25, %s2279_s25 }
  0x79   :  { %p2286_p13 = por %p2285_p12, %p2284_p11 }
  0x7b   :  { %p2287_p0 = pnand %p2286_p13, %p2280_p10 }
  0x7d   :  { %2290 = shalt.err (!%p2287_p0)
}
  0x7e   :  { %s2359_s24 = smov [#allocation16]   ;;  %s2360_s26 = smov [#allocation19]  }
  0x7f   :  { %115 = dma.vmem_to_smem %s113_s23, 16, %s2359_s24, [#allocation15]  }
  0x80   :  { %s137_s1 = sshll.u32 %s2360_s26, 4  ;;  %s2291_s22 = scalar_lea.hbm %s3439_s13, 2048  ;;  %s138_s1 = int_to_ptr.vmem [resolvable:$true] %s137_s1 }
  0x81   :  { %p2292_p1 = scmp.ne.s32.totalorder %s3439_s13, %s2291_s22  ;;  %p2295_p2 = scmp.lt.u32.totalorder %s2291_s22, %s3439_s13 }
  0x83   :  { %p2297_p3 = pnand %p2295_p2, %p2292_p1 }
  0x85   :  { %2300 = shalt.err (!%p2297_p3)
}
  0x86   :  { %s2301_s29 = scalar_lea.vmem %s138_s1, 2048  ;;  %p2306_p5 = scmp.lt.s32.totalorder %s138_s1, %s138_s1 }
  0x87   :  { %p2302_p4 = scmp.ne.s32.totalorder %s138_s1, %s2301_s29  ;;  %p2307_p6 = scmp.lt.s32.totalorder %s2301_s29, %s2301_s29 }
  0x89   :  { %p2308_p7 = por %p2307_p6, %p2306_p5 }
  0x8b   :  { %p2309_p8 = pnand %p2308_p7, %p2302_p4 }
  0x8d   :  { %2312 = shalt.err (!%p2309_p8)
}
  0x8e   :  { %143 = dma.hbm_to_vmem [thread:$0]  %s3439_s13, 2048, %s138_s1, [#allocation18], %s2350_s6, %s2350_s6, %s2351_s16  }
  0x8f   :  { %2335 = dma.done.wait [#allocation4], 128  }
  0x90   :  { %2336 = vsyncadd [#allocation4], 4294967168 }
  0x91   :  { %2337 = dma.done.wait [#allocation8], 4096  }
  0x92   :  { %2338 = vsyncadd [#allocation8], 4294963200 }
  0x93   :  { %2339 = dma.done.wait [#allocation6], 16  }
  0x94   :  { %2340 = vsyncadd [#allocation6], 4294967280 }
  0x95   :  { %2341 = dma.done.wait [#allocation12], 32  }
  0x96   :  { %2342 = vsyncadd [#allocation12], 4294967264 }
  0x97   :  { %2343 = dma.done.wait [#allocation15], 32  }
  0x98   :  { %2344 = vsyncadd [#allocation15], 4294967264 }
  0x99   :  { %2345 = dma.done.wait [#allocation18], 4096  }
  0x9a   :  { %2346 = vsyncadd [#allocation18], 4294963200 }
  0x9b   :  { %176 = sfence }
  0x9c   :  { %v196_v0 = vld [vmem:[#allocation7] sm:$0xff]  ;;  %v197_v1 = vld [vmem:[#allocation7 + $0x8] sm:$0xff]  ;;  %v198_v2 = vld [vmem:[#allocation7 + $0x10] sm:$0xff]  ;;  %v3502_v3 = vmov 0.0|0.0   ;;  %vm2362_vm0 = vmmov 0   ;;  %v3504_v6 = vmov 0.0  }
  0x9d   :  { %1929 = vmatprep.subr.bf16.mxu0 %v3502_v3  ;;  %v1930_v4 = vpack.c.bf16 %v197_v1, %v196_v0  ;;  %v199_v5 = vld [vmem:[#allocation7 + $0x18] sm:$0xff]  ;;  %1739 = vmatprep.mubr.msk.f32.mxu0 %vm2362_vm0, %v3504_v6  ;;  %v200_v8 = vld [vmem:[#allocation7 + $0x20] sm:$0xff]  ;;  %v201_v9 = vld [vmem:[#allocation7 + $0x28] sm:$0xff]  ;;  %s2594_s27 = sld [smem:[#allocation10]]  ;;  %s2596_s18 = sld [smem:[#allocation10 + $0x1]] }
  0x9e   :  { %1953 = vmatprep.subr.bf16.mxu1 %v3502_v3  ;;  %1774 = vmatprep.mubr.msk.f32.mxu1 %vm2362_vm0, %v3504_v6  ;;  %v1933_v7 = vpack.c.bf16 %v199_v5, %v198_v2  ;;  %v180_v10 = vld [vmem:[#allocation9] sm:$0xff]  ;;  %v181_v11 = vld [vmem:[#allocation9 + $0x8] sm:$0xff]  ;;  %v182_v12 = vld [vmem:[#allocation9 + $0x10] sm:$0xff]  ;;  %v1936_v14 = vpack.c.bf16 %v201_v9, %v200_v8  ;;  %s2598_s21 = sld [smem:[#allocation11]]  ;;  %s2600_s4 = sld [smem:[#allocation10 + $0x2]] }
  0x9f   :  { %1931 = vmatpush3.bf16.msra.mxu0 %v1930_v4  ;;  %v183_v13 = vld [vmem:[#allocation9 + $0x18] sm:$0xff]  ;;  %v2539_v15 = vpack.c.bf16 %v181_v11, %v180_v10  ;;  %v202_v16 = vld [vmem:[#allocation7 + $0x30] sm:$0xff]  ;;  %v184_v19 = vld [vmem:[#allocation9 + $0x20] sm:$0xff]  ;;  %s2602_s7 = sld [smem:[#allocation11 + $0x1]]  ;;  %s2604_s20 = sld [smem:[#allocation11 + $0x2]] }
  0xa0   :  { %1932 = vmatprep.subr.bf16.mxu0 %v3502_v3  ;;  %v203_v17 = vld [vmem:[#allocation7 + $0x38] sm:$0xff]  ;;  %v2543_v18 = vpack.c.bf16 %v183_v13, %v182_v12  ;;  %v185_v20 = vld [vmem:[#allocation9 + $0x28] sm:$0xff]  ;;  %v204_v22 = vld [vmem:[#allocation7 + $0x40] sm:$0xff]  ;;  %s2606_s23 = sld [smem:[#allocation10 + $0x3]]  ;;  %s2610_s24 = sld [smem:[#allocation10 + $0x4]] }
  0xa1   :  { %1955 = vmatpush3.bf16.msra.mxu1 %v2539_v15  ;;  %v1939_v21 = vpack.c.bf16 %v203_v17, %v202_v16  ;;  %v205_v23 = vld [vmem:[#allocation7 + $0x48] sm:$0xff]  ;;  %v2548_v24 = vpack.c.bf16 %v185_v20, %v184_v19  ;;  %v186_v25 = vld [vmem:[#allocation9 + $0x30] sm:$0xff]  ;;  %v187_v26 = vld [vmem:[#allocation9 + $0x38] sm:$0xff]  ;;  %s2608_s25 = sld [smem:[#allocation11 + $0x3]]  ;;  %s2612_s26 = sld [smem:[#allocation11 + $0x4]] }
  0xa2   :  { %1956 = vmatprep.subr.bf16.mxu1 %v3502_v3  ;;  %v1942_v27 = vpack.c.bf16 %v205_v23, %v204_v22  ;;  %v206_v28 = vld [vmem:[#allocation7 + $0x50] sm:$0xff]  ;;  %v207_v29 = vld [vmem:[#allocation7 + $0x58] sm:$0xff]  ;;  %v2553_v30 = vpack.c.bf16 %v187_v26, %v186_v25  ;;  %v188_v31 = vld [vmem:[#allocation9 + $0x40] sm:$0xff]  ;;  %s2614_s1 = sld [smem:[#allocation10 + $0x5]]  ;;  %s2618_s28 = sld [smem:[#allocation10 + $0x6]] }
  0xa3   :  { %1934 = vmatpush3.bf16.msra.mxu0 %v1933_v7  ;;  %v189_v32 = vld [vmem:[#allocation9 + $0x48] sm:$0xff]  ;;  %v1945_v33 = vpack.c.bf16 %v207_v29, %v206_v28  ;;  %v208_v34 = vld [vmem:[#allocation7 + $0x60] sm:$0xff]  ;;  %v190_v37 = vld [vmem:[#allocation9 + $0x50] sm:$0xff]  ;;  %3549 = sst [smem:[#allocation28_spill]] %s2594_s27  ;;  %s2616_s19 = sld [smem:[#allocation11 + $0x5]]  ;;  %v367_v57 = vstv %s2594_s27  ;;  %v380_v59 = vstv %s2596_s18 }
  0xa4   :  { %1935 = vmatprep.subr.bf16.mxu0 %v3502_v3  ;;  %v209_v35 = vld [vmem:[#allocation7 + $0x68] sm:$0xff]  ;;  %v1966_v36 = vpack.c.bf16 %v189_v32, %v188_v31  ;;  %v191_v38 = vld [vmem:[#allocation9 + $0x58] sm:$0xff]  ;;  %v210_v40 = vld [vmem:[#allocation7 + $0x70] sm:$0xff]  ;;  %3550 = sst [smem:[#allocation29_spill]] %s2596_s18  ;;  %s2620_s22 = sld [smem:[#allocation11 + $0x6]]  ;;  %v370_v58 = vstv %s2598_s21  ;;  %v393_v60 = vstv %s2600_s4 }
  0xa5   :  { %1958 = vmatpush3.bf16.msra.mxu1 %v2543_v18  ;;  %v1948_v39 = vpack.c.bf16 %v209_v35, %v208_v34  ;;  %v211_v41 = vld [vmem:[#allocation7 + $0x78] sm:$0xff]  ;;  %v1969_v42 = vpack.c.bf16 %v191_v38, %v190_v37  ;;  %v192_v43 = vld [vmem:[#allocation9 + $0x60] sm:$0xff]  ;;  %v193_v44 = vld [vmem:[#allocation9 + $0x68] sm:$0xff]  ;;  %3551 = sst [smem:[#allocation30_spill]] %s2598_s21  ;;  %s2622_s30 = sld [smem:[#allocation10 + $0x7]]  ;;  %v383_v61 = vstv %s2602_s7  ;;  %v396_v62 = vstv %s2604_s20 }
  0xa6   :  { %1959 = vmatprep.subr.bf16.mxu1 %v3502_v3  ;;  %v1951_v45 = vpack.c.bf16 %v211_v41, %v210_v40  ;;  %v1972_v46 = vpack.c.bf16 %v193_v44, %v192_v43  ;;  %v177_v47 = vld [vmem:[#allocation3] sm:$0xff]  ;;  %v194_v48 = vld [vmem:[#allocation9 + $0x70] sm:$0xff]  ;;  %3552 = sst [smem:[#allocation31_spill]] %s2600_s4  ;;  %s2624_s0 = sld [smem:[#allocation11 + $0x7]]  ;;  %v406_v63 = vstv %s2606_s23  ;;  %v419_v1 = vstv %s2610_s24 }
  0xa7   :  { %1937 = vmatpush3.bf16.msra.mxu0 %v1936_v14  ;;  %v195_v49 = vld [vmem:[#allocation9 + $0x78] sm:$0xff]  ;;  %3553 = sst [smem:[#allocation32_spill]] %s2602_s7  ;;  %s2626_s9 = sld [smem:[#allocation10 + $0x8]]  ;;  %v409_v0 = vstv %s2608_s25  ;;  %v422_v2 = vstv %s2612_s26 }
  0xa8   :  { %1938 = vmatprep.subr.bf16.mxu0 %v3502_v3  ;;  %v1975_v50 = vpack.c.bf16 %v195_v49, %v194_v48  ;;  %v1435_v51 = vld [vmem:[%s3429_s3] ss:$0 sm:$0xff]  ;;  %3554 = sst [smem:[#allocation33_spill]] %s2604_s20  ;;  %s2628_s5 = sld [smem:[#allocation10 + $0x9]]  ;;  %v432_v4 = vstv %s2614_s1  ;;  %v445_v7 = vstv %s2618_s28 }
  0xa9   :  { %1961 = vmatpush3.bf16.msra.mxu1 %v2548_v24  ;;  %v1436_v52 = vld [vmem:[%s3428_s2] ss:$0 sm:$0xff]  ;;  %3555 = sst [smem:[#allocation34_spill]] %s2606_s23  ;;  %s2630_s29 = sld [smem:[#allocation11 + $0x8]]  ;;  %v435_v5 = vstv %s2616_s19 }
  0xaa   :  { %1962 = vmatprep.subr.bf16.mxu1 %v3502_v3  ;;  %3556 = sst [smem:[#allocation35_spill]] %s2608_s25  ;;  %s2632_s17 = sld [smem:[#allocation11 + $0x9]]  ;;  %v448_v8 = vstv %s2620_s22 }
  0xab   :  { %1940 = vmatpush3.bf16.msra.mxu0 %v1939_v21  ;;  %3557 = sst [smem:[#allocation36_spill]] %s2610_s24  ;;  %s2636_s13 = sld [smem:[#allocation13 + $0xa]]  ;;  %v458_v9 = vstv %s2622_s30 }
  0xac   :  { %1941 = vmatprep.subr.bf16.mxu0 %v3502_v3  ;;  %3558 = sst [smem:[#allocation37_spill]] %s2612_s26  ;;  %s2634_s8 = sld [smem:[#allocation13]]  ;;  %v461_v10 = vstv %s2624_s0 }
  0xad   :  { %1964 = vmatpush3.bf16.msra.mxu1 %v2553_v30  ;;  %3559 = sst [smem:[#allocation38_spill]] %s2614_s1  ;;  %s2638_s6 = sld [smem:[#allocation13 + $0x14]]  ;;  %v471_v11 = vstv %s2626_s9 }
  0xae   :  { %1965 = vmatprep.subr.bf16.mxu1 %v3502_v3  ;;  %3560 = sst [smem:[#allocation39_spill]] %s2616_s19  ;;  %s2640_s16 = sld [smem:[#allocation13 + $0x1e]]  ;;  %v484_v13 = vstv %s2628_s5 }
  0xaf   :  { %1943 = vmatpush3.bf16.msra.mxu0 %v1942_v27  ;;  %3561 = sst [smem:[#allocation40_spill]] %s2618_s28  ;;  %s2642_s11 = sld [smem:[#allocation13 + $0x28]]  ;;  %v474_v12 = vstv %s2630_s29 }
  0xb0   :  { %1944 = vmatprep.subr.bf16.mxu0 %v3502_v3  ;;  %3562 = sst [smem:[#allocation41_spill]] %s2620_s22  ;;  %s2644_s15 = sld [smem:[#allocation13 + $0x32]]  ;;  %v487_v14 = vstv %s2632_s17 }
  0xb1   :  { %1967 = vmatpush3.bf16.msra.mxu1 %v1966_v36  ;;  %3563 = sst [smem:[#allocation42_spill]] %s2622_s30  ;;  %s2646_s2 = sld [smem:[#allocation13 + $0x3c]] }
  0xb2   :  { %1968 = vmatprep.subr.bf16.mxu1 %v3502_v3  ;;  %3564 = sst [smem:[#allocation43_spill]] %s2624_s0  ;;  %s2648_s3 = sld [smem:[#allocation13 + $0x46]] }
  0xb3   :  { %1946 = vmatpush3.bf16.msra.mxu0 %v1945_v33  ;;  %3565 = sst [smem:[#allocation44_spill]] %s2626_s9  ;;  %s2652_s12 = sld [smem:[#allocation13 + $0x5a]] }
  0xb4   :  { %1947 = vmatprep.subr.bf16.mxu0 %v3502_v3  ;;  %3566 = sst [smem:[#allocation45_spill]] %s2628_s5  ;;  %s2650_s14 = sld [smem:[#allocation13 + $0x50]] }
  0xb5   :  { %1970 = vmatpush3.bf16.msra.mxu1 %v1969_v42  ;;  %3567 = sst [smem:[#allocation46_spill]] %s2630_s29  ;;  %s2654_s10 = sld [smem:[#allocation13 + $0x1]] }
  0xb6   :  { %1971 = vmatprep.subr.bf16.mxu1 %v3502_v3  ;;  %3568 = sst [smem:[#allocation47_spill]] %s2632_s17  ;;  %s2712_s21 = sld [smem:[#allocation13 + $0x35]] }
  0xb7   :  { %1949 = vmatpush3.bf16.msra.mxu0 %v1948_v39  ;;  %3569 = sst [smem:[#allocation48_spill]] %s2634_s8  ;;  %s2656_s8 = sld [smem:[#allocation13 + $0xb]]  ;;  %v520_v21 = vstv %s2646_s2 }
  0xb8   :  { %1950 = vmatprep.subr.bf16.mxu0 %v3502_v3  ;;  %3570 = sst [smem:[#allocation49_spill]] %s2636_s13  ;;  %s3604_s4 = sld [smem:[#allocation48_spill]] }
  0xb9   :  { %1973 = vmatpush3.bf16.msra.mxu1 %v1972_v46  ;;  %3571 = sst [smem:[#allocation50_spill]] %s2638_s6  ;;  %s2658_s13 = sld [smem:[#allocation13 + $0x15]] }
  0xba   :  { %1974 = vmatprep.subr.bf16.mxu1 %v3502_v3  ;;  %3572 = sst [smem:[#allocation51_spill]] %s2640_s16  ;;  %s2662_s16 = sld [smem:[#allocation13 + $0x29]] }
  0xbb   :  { %1952 = vmatpush3.bf16.msra.mxu0 %v1951_v45  ;;  %3573 = sst [smem:[#allocation52_spill]] %s2642_s11  ;;  %s2660_s6 = sld [smem:[#allocation13 + $0x1f]] }
  0xbc   :  { %1978 = vmatprep.subr.bf16.mxu0 %v2539_v15  ;;  %3574 = sst [smem:[#allocation53_spill]] %s2644_s15  ;;  %s2664_s11 = sld [smem:[#allocation13 + $0x33]] }
  0xbd   :  { %1976 = vmatpush3.bf16.msra.mxu1 %v1975_v50  ;;  %3575 = sst [smem:[#allocation54_spill]] %s2646_s2  ;;  %s2666_s15 = sld [smem:[#allocation13 + $0x3d]] }
  0xbe   :  { %1740 = vmatmul.mubr.f32.vlgmr.msra.gmra.mrb[0].mxu0 %v177_v47  ;;  %2009 = vmatprep.subr.bf16.mxu1 %v3502_v3  ;;  %3576 = sst [smem:[#allocation55_spill]] %s2648_s3  ;;  %s2668_s3 = sld [smem:[#allocation13 + $0x47]] }
  0xbf   :  { %1980 = vmatpush3.bf16.msra.mxu0 %v2539_v15  ;;  %3577 = sst [smem:[#allocation56_spill]] %s2650_s14  ;;  %s2670_s14 = sld [smem:[#allocation13 + $0x51]] }
  0xc0   :  { %1982 = vmatprep.subr.bf16.mxu0 %v2543_v18  ;;  %3578 = sst [smem:[#allocation57_spill]] %s2652_s12  ;;  %s2718_s27 = sld [smem:[#allocation13 + $0x3f]] }
  0xc1   :  { %3579 = sst [smem:[#allocation58_spill]] %s2654_s10  ;;  %s2672_s10 = sld [smem:[#allocation13 + $0x5b]] }
  0xc2   :  { %3580 = sst [smem:[#allocation59_spill]] %s2656_s8  ;;  %s2674_s8 = sld [smem:[#allocation13 + $0x2]] }
  0xc3   :  { %1984 = vmatpush3.bf16.msra.mxu0 %v2543_v18  ;;  %3581 = sst [smem:[#allocation60_spill]] %s2658_s13  ;;  %s2676_s13 = sld [smem:[#allocation13 + $0xc]] }
  0xc4   :  { %1986 = vmatprep.subr.bf16.mxu0 %v2548_v24  ;;  %3582 = sst [smem:[#allocation61_spill]] %s2660_s6  ;;  %s2678_s6 = sld [smem:[#allocation13 + $0x16]] }
  0xc5   :  { %3583 = sst [smem:[#allocation62_spill]] %s2662_s16  ;;  %s3605_s18 = sld [smem:[#allocation49_spill]] }
  0xc6   :  { %3584 = sst [smem:[#allocation63_spill]] %s2664_s11  ;;  %s2680_s11 = sld [smem:[#allocation13 + $0x20]] }
  0xc7   :  { %1988 = vmatpush3.bf16.msra.mxu0 %v2548_v24  ;;  %3585 = sst [smem:[#allocation64_spill]] %s2666_s15  ;;  %s2682_s15 = sld [smem:[#allocation13 + $0x2a]] }
  0xc8   :  { %1990 = vmatprep.subr.bf16.mxu0 %v2553_v30  ;;  %3586 = sst [smem:[#allocation65_spill]] %s2668_s3  ;;  %s2684_s3 = sld [smem:[#allocation13 + $0x34]]  ;;  %v575_v35 = vstv %s2674_s8 }
  0xc9   :  { %3587 = sst [smem:[#allocation66_spill]] %s2670_s14  ;;  %s2690_s16 = sld [smem:[#allocation13 + $0x52]] }
  0xca   :  { %3588 = sst [smem:[#allocation67_spill]] %s2672_s10  ;;  %s2686_s14 = sld [smem:[#allocation13 + $0x3e]] }
  0xcb   :  { %1992 = vmatpush3.bf16.msra.mxu0 %v2553_v30  ;;  %3589 = sst [smem:[#allocation68_spill]] %s2676_s13  ;;  %s2692_s13 = sld [smem:[#allocation13 + $0x5c]]  ;;  %v500_v16 = vstv %s3605_s18 }
  0xcc   :  { %1994 = vmatprep.subr.bf16.mxu0 %v1966_v36  ;;  %3590 = sst [smem:[#allocation69_spill]] %s2678_s6  ;;  %s2688_s10 = sld [smem:[#allocation13 + $0x48]] }
  0xcd   :  { %3591 = sst [smem:[#allocation70_spill]] %s2680_s11  ;;  %s2694_s6 = sld [smem:[#allocation13 + $0x3]]  ;;  %v590_v39 = vstv %s2682_s15 }
  0xce   :  { %3592 = sst [smem:[#allocation71_spill]] %s2682_s15  ;;  %s2696_s11 = sld [smem:[#allocation13 + $0xd]]  ;;  %v594_v40 = vstv %s2684_s3 }
  0xcf   :  { %1996 = vmatpush3.bf16.msra.mxu0 %v1966_v36  ;;  %3593 = sst [smem:[#allocation72_spill]] %s2684_s3  ;;  %s3607_s7 = sld [smem:[#allocation50_spill]] }
  0xd0   :  { %1998 = vmatprep.subr.bf16.mxu0 %v1969_v42  ;;  %3594 = sst [smem:[#allocation73_spill]] %s2686_s14  ;;  %s2702_s14 = sld [smem:[#allocation13 + $0x17]] }
  0xd1   :  { %3596 = sst [smem:[#allocation75_spill]] %s2690_s16  ;;  %s2704_s16 = sld [smem:[#allocation13 + $0x21]] }
  0xd2   :  { %3595 = sst [smem:[#allocation74_spill]] %s2688_s10  ;;  %s2720_s20 = sld [smem:[#allocation13 + $0x49]] }
  0xd3   :  { %2000 = vmatpush3.bf16.msra.mxu0 %v1969_v42  ;;  %3597 = sst [smem:[#allocation76_spill]] %s2692_s13  ;;  %s3609_s23 = sld [smem:[#allocation51_spill]]  ;;  %v614_v45 = vstv %s2694_s6 }
  0xd4   :  { %2002 = vmatprep.subr.bf16.mxu0 %v1972_v46  ;;  %3598 = sst [smem:[#allocation77_spill]] %s2694_s6  ;;  %s3610_s25 = sld [smem:[#allocation52_spill]] }
  0xd5   :  { %3599 = sst [smem:[#allocation78_spill]] %s2696_s11  ;;  %s2710_s11 = sld [smem:[#allocation13 + $0x2b]]  ;;  %v504_v17 = vstv %s3607_s7 }
  0xd6   :  { %3600 = sst [smem:[#allocation79_spill]] %s2702_s14  ;;  %s2728_s26 = sld [smem:[#allocation13 + $0x5d]]  ;;  %v621_v47 = vstv %s2702_s14 }
  0xd7   :  { %2004 = vmatpush3.bf16.msra.mxu0 %v1972_v46  ;;  %3601 = sst [smem:[#allocation80_spill]] %s2704_s16  ;;  %s3614_s1 = sld [smem:[#allocation55_spill]]  ;;  %v625_v48 = vstv %s2704_s16 }
  0xd8   :  { %2006 = vmatprep.subr.bf16.mxu0 %v1975_v50  ;;  %3603 = sst [smem:[#allocation82_spill]] %s2712_s21  ;;  %s2726_s21 = sld [smem:[#allocation13 + $0x53]] }
  0xd9   :  { %3606 = sst [smem:[#allocation83_spill]] %s2718_s27  ;;  %s3615_s19 = sld [smem:[#allocation56_spill]] }
  0xda   :  { %3608 = sst [smem:[#allocation84_spill]] %s2720_s20  ;;  %s2734_s24 = sld [smem:[#allocation13 + $0x4]]  ;;  %v512_v19 = vstv %s3610_s25 }
  0xdb   :  { %2008 = vmatpush3.bf16.msra.mxu0 %v1975_v50  ;;  %3602 = sst [smem:[#allocation81_spill]] %s2710_s11  ;;  %s3611_s11 = sld [smem:[#allocation53_spill]] }
  0xdc   :  { %2033 = vmatprep.subr.bf16.mxu0 %v3502_v3  ;;  %3613 = sst [smem:[#allocation86_spill]] %s2728_s26  ;;  %s3617_s28 = sld [smem:[#allocation58_spill]] }
  0xdd   :  { %s2736_s22 = sld [smem:[#allocation13 + $0xe]]  ;;  %s3619_s30 = sld [smem:[#allocation59_spill]]  ;;  %v524_v22 = vstv %s3614_s1 }
  0xde   :  { %3612 = sst [smem:[#allocation85_spill]] %s2726_s21  ;;  %s3620_s0 = sld [smem:[#allocation60_spill]] }
  0xdf   :  { %s3621_s21 = sld [smem:[#allocation61_spill]]  ;;  %s2742_s26 = sld [smem:[#allocation13 + $0x18]]  ;;  %v528_v23 = vstv %s3615_s19 }
  0xe0   :  { %3616 = sst [smem:[#allocation87_spill]] %s2734_s24  ;;  %s3623_s9 = sld [smem:[#allocation62_spill]] }
  0xe1   :  { %s2744_s29 = sld [smem:[#allocation13 + $0x22]]  ;;  %s3625_s5 = sld [smem:[#allocation63_spill]]  ;;  %v516_v20 = vstv %s3611_s11 }
  0xe2   :  { %s3626_s17 = sld [smem:[#allocation64_spill]]  ;;  %s3627_s24 = sld [smem:[#allocation65_spill]]  ;;  %v536_v25 = vstv %s3617_s28 }
  0xe3   :  { %3618 = sst [smem:[#allocation88_spill]] %s2736_s22  ;;  %s2752_s18 = sld [smem:[#allocation13 + $0x36]]  ;;  %v539_v26 = vstv %s3619_s30 }
  0xe4   :  { %s2750_s22 = sld [smem:[#allocation13 + $0x2c]]  ;;  %s3631_s7 = sld [smem:[#allocation67_spill]]  ;;  %v543_v27 = vstv %s3620_s0 }
  0xe5   :  { %3622 = sst [smem:[#allocation89_spill]] %s2742_s26  ;;  %s3634_s25 = sld [smem:[#allocation69_spill]]  ;;  %v547_v28 = vstv %s3621_s21 }
  0xe6   :  { %s2760_s11 = sld [smem:[#allocation13 + $0x4a]]  ;;  %v551_v29 = vstv %s3623_s9  ;;  %s3637_s1 = sld [smem:[#allocation73_spill]] }
  0xe7   :  { %3624 = sst [smem:[#allocation90_spill]] %s2744_s29  ;;  %s2758_s29 = sld [smem:[#allocation13 + $0x40]] }
  0xe8   :  { %s3636_s2 = sld [smem:[#allocation70_spill]]  ;;  %s2766_s19 = sld [smem:[#allocation13 + $0x54]]  ;;  %v559_v31 = vstv %s3626_s17  ;;  %v563_v32 = vstv %s3627_s24 }
  0xe9   :  { %3630 = sst [smem:[#allocation92_spill]] %s2752_s18  ;;  %s3641_s28 = sld [smem:[#allocation78_spill]] }
  0xea   :  { %3628 = sst [smem:[#allocation91_spill]] %s2750_s22  ;;  %v571_v34 = vstv %s3631_s7  ;;  %s2774_s0 = sld [smem:[#allocation13 + $0x5]] }
  0xeb   :  { %s2776_s21 = sld [smem:[#allocation13 + $0xf]]  ;;  %v582_v37 = vstv %s3634_s25  ;;  %s2786_s7 = sld [smem:[#allocation13 + $0x19]] }
  0xec   :  { %3635 = sst [smem:[#allocation94_spill]] %s2760_s11  ;;  %v598_v41 = vstv %s3637_s1  ;;  %s2788_s24 = sld [smem:[#allocation13 + $0x23]] }
  0xed   :  { %3633 = sst [smem:[#allocation93_spill]] %s2758_s29  ;;  %s3649_s25 = sld [smem:[#allocation88_spill]] }
  0xee   :  { %3638 = sst [smem:[#allocation95_spill]] %s2766_s19  ;;  %v586_v38 = vstv %s3636_s2  ;;  %s2794_s2 = sld [smem:[#allocation13 + $0x2d]] }
  0xef   :  { %s2796_s3 = sld [smem:[#allocation13 + $0x37]]  ;;  %s2804_s13 = sld [smem:[#allocation13 + $0x4b]] }
  0xf0   :  { %3642 = sst [smem:[#allocation97_spill]] %s2774_s0  ;;  %s2812_s15 = sld [smem:[#allocation13 + $0x5f]] }
  0xf1   :  { %3643 = sst [smem:[#allocation98_spill]] %s2776_s21  ;;  %s2810_s30 = sld [smem:[#allocation13 + $0x55]] }
  0xf2   :  { %s2820_s27 = sld [smem:[#allocation13 + $0x10]]  ;;  %s2826_s20 = sld [smem:[#allocation13 + $0x1a]] }
  0xf3   :  { %s2834_s6 = sld [smem:[#allocation13 + $0x2e]]  ;;  %s2836_s18 = sld [smem:[#allocation13 + $0x38]] }
  0xf4   :  { %3650 = sst [smem:[#allocation99_spill]] %s2794_s2  ;;  %s2846_s21 = sld [smem:[#allocation13 + $0x42]] }
  0xf5   :  { %3651 = sst [smem:[#allocation100_spill]] %s2796_s3  ;;  %s2880_s26 = sld [smem:[#allocation13 + $0x11]] }
  0xf6   :  { %3654 = sst [smem:[#allocation102_spill]] %s2804_s13  ;;  %s2860_s17 = sld [smem:[#allocation13 + $0x60]] }
  0xf7   :  { %3655 = sst [smem:[#allocation103_spill]] %s2810_s30  ;;  %s2912_s22 = sld [smem:[#allocation13 + $0x39]] }
  0xf8   :  { %3656 = sst [smem:[#allocation104_spill]] %s2812_s15  ;;  %s2892_s1 = sld [smem:[#allocation13 + $0x1b]] }
  0xf9   :  { %s2917_s29 = sld [smem:[#allocation13 + $0x43]]  ;;  %s2919_s11 = sld [smem:[#allocation13 + $0x4d]] }
  0xfa   :  { %s2924_s14 = sld [smem:[#allocation13 + $0x57]]  ;;  %s2926_s3 = sld [smem:[#allocation13 + $0x61]] }
  0xfb   :  { %s2934_s2 = sld [smem:[#allocation13 + $0x12]]  ;;  %s2940_s15 = sld [smem:[#allocation13 + $0x1c]] }
  0xfc   :  { %3674 = sst [smem:[#allocation31_spill]] %s2860_s17  ;;  %s2942_s19 = sld [smem:[#allocation13 + $0x26]] }
  0xfd   :  { %3678 = sst [smem:[#allocation36_spill]] %s2912_s22  ;;  %s2952_s16 = sld [smem:[#allocation13 + $0x3a]] }
  0xfe   :  { %s2950_s30 = sld [smem:[#allocation13 + $0x30]]  ;;  %s2960_s9 = sld [smem:[#allocation13 + $0x44]] }
  0xff   :  { %3679 = sst [smem:[#allocation38_spill]] %s2917_s29  ;;  %s2984_s13 = sld [smem:[#allocation13 + $0x4e]] }
 0x100   :  { %3681 = sst [smem:[#allocation40_spill]] %s2919_s11  ;;  %s3731_s8 = sld [smem:[#allocation83_spill]] }
 0x101   :  { %3683 = sst [smem:[#allocation42_spill]] %s2924_s14  ;;  %s3729_s14 = sld [smem:[#allocation89_spill]] }
 0x102   :  { %3684 = sst [smem:[#allocation30_spill]] %s2926_s3  ;;  %s2988_s3 = sld [smem:[#allocation13 + $0x9]] }
 0x103   :  { %3686 = sst [smem:[#allocation32_spill]] %s2940_s15  ;;  %s3732_s22 = sld [smem:[#allocation90_spill]] }
 0x104   :  { %3687 = sst [smem:[#allocation33_spill]] %s2942_s19  ;;  %s3728_s19 = sld [smem:[#allocation82_spill]] }
 0x105   :  { %3688 = sst [smem:[#allocation35_spill]] %s2950_s30  ;;  %s3735_s15 = sld [smem:[#allocation76_spill]] }
 0x106   :  { %3689 = sst [smem:[#allocation37_spill]] %s2952_s16  ;;  %s2994_s16 = sld [smem:[#allocation13 + $0x13]] }
 0x107   :  { %3690 = sst [smem:[#allocation39_spill]] %s2960_s9  ;;  %s2998_s9 = sld [smem:[#allocation13 + $0x1d]] }
 0x108   :  { %3691 = sst [smem:[#allocation41_spill]] %s2984_s13  ;;  %s3742_s11 = sld [smem:[#allocation85_spill]] }
 0x109   :  { %3692 = sst [smem:[#allocation43_spill]] %s2988_s3  ;;  %s3745_s17 = sld [smem:[#allocation92_spill]] }
 0x10a   :  { %s3750_s29 = sld [smem:[#allocation93_spill]]  ;;  %s3276_s30 = sld [smem:[#allocation13 + $0x58]] }
 0x10c   :  { %3693 = sst [smem:[#allocation44_spill]] %s2994_s16 }
 0x191   :  { %v278_v53 = vpop.f32.mrb[0].mxu0 }
 0x192   :  { %v288_v54 = vmul.f32 %v1435_v51, %v278_v53  ;;  %v1741_v55 = vpop.f32.mrb[1].mxu0 }
 0x194   :  { %v295_v56 = vadd.f32 %v1436_v52, %v288_v54 }
 0x196   :  { %1775 = vmatmul.mubr.f32.vlgmr.msra.gmra.mrb[0].mxu1 %v295_v56  ;;  %v656_v56 = vstv %s3649_s25  ;;  %s2878_s25 = sld [smem:[#allocation13 + $0x7]] }
 0x197   :  { %2011 = vmatpush3.bf16.msra.mxu1 %v2539_v15  ;;  %1856 = vmatprep.mubr.msk.f32.mxu1 %vm2362_vm0, %v3504_v6  ;;  %v497_v15 = vstv %s3604_s4  ;;  %s3629_s4 = sld [smem:[#allocation66_spill]] }
 0x198   :  { %2012 = vmatprep.subr.bf16.mxu1 %v3502_v3 }
 0x19b   :  { %2014 = vmatpush3.bf16.msra.mxu1 %v2543_v18  ;;  %v508_v18 = vstv %s3609_s23  ;;  %s3632_s23 = sld [smem:[#allocation68_spill]] }
 0x19c   :  { %2015 = vmatprep.subr.bf16.mxu1 %v3502_v3 }
 0x19d   :  { %v567_v33 = vstv %s3629_s4  ;;  %s2858_s4 = sld [smem:[#allocation13 + $0x56]] }
 0x19f   :  { %2017 = vmatpush3.bf16.msra.mxu1 %v2548_v24  ;;  %v532_v24 = vstv %s2652_s12  ;;  %s2768_s12 = sld [smem:[#allocation13 + $0x5e]] }
 0x1a0   :  { %2018 = vmatprep.subr.bf16.mxu1 %v3502_v3 }
 0x1a3   :  { %2020 = vmatpush3.bf16.msra.mxu1 %v2553_v30  ;;  %v555_v30 = vstv %s3625_s5  ;;  %s3644_s5 = sld [smem:[#allocation81_spill]]  ;;  %3672 = sst [smem:[#allocation29_spill]] %s2858_s4 }
 0x1a4   :  { %2021 = vmatprep.subr.bf16.mxu1 %v3502_v3  ;;  %s3730_s4 = sld [smem:[#allocation75_spill]] }
 0x1a5   :  { %3639 = sst [smem:[#allocation96_spill]] %s2768_s12  ;;  %s2903_s12 = sld [smem:[#allocation13 + $0x2f]] }
 0x1a7   :  { %2023 = vmatpush3.bf16.msra.mxu1 %v1966_v36  ;;  %v578_v36 = vstv %s3632_s23  ;;  %s3648_s23 = sld [smem:[#allocation87_spill]] }
 0x1a8   :  { %2024 = vmatprep.subr.bf16.mxu1 %v3502_v3 }
 0x1a9   :  { %v629_v49 = vstv %s3644_s5  ;;  %s2818_s5 = sld [smem:[#allocation13 + $0x6]] }
 0x1ab   :  { %2026 = vmatpush3.bf16.msra.mxu1 %v1969_v42  ;;  %v602_v42 = vstv %s2688_s10  ;;  %s2802_s10 = sld [smem:[#allocation13 + $0x41]]  ;;  %3676 = sst [smem:[#allocation34_spill]] %s2903_s12 }
 0x1ac   :  { %2027 = vmatprep.subr.bf16.mxu1 %v3502_v3  ;;  %s3744_s12 = sld [smem:[#allocation86_spill]] }
 0x1ad   :  { %v653_v55 = vstv %s3648_s23  ;;  %s2828_s23 = sld [smem:[#allocation13 + $0x24]] }
 0x1af   :  { %2029 = vmatpush3.bf16.msra.mxu1 %v1972_v46  ;;  %v617_v46 = vstv %s3641_s28  ;;  %s2894_s28 = sld [smem:[#allocation13 + $0x25]] }
 0x1b0   :  { %2030 = vmatprep.subr.bf16.mxu1 %v3502_v3 }
 0x1b1   :  { %3653 = sst [smem:[#allocation101_spill]] %s2802_s10  ;;  %s2932_s10 = sld [smem:[#allocation13 + $0x8]] }
 0x1b3   :  { %2032 = vmatpush3.bf16.msra.mxu1 %v1975_v50 }
 0x1b4   :  { %2057 = vmatprep.subr.bf16.mxu1 %v3502_v3  ;;  %v692_v3 = vstv %s2774_s0  ;;  %s2848_s0 = sld [smem:[#allocation13 + $0x4c]] }
 0x1ba   :  { %3671 = sst [smem:[#allocation28_spill]] %s2848_s0  ;;  %s3736_s0 = sld [smem:[#allocation98_spill]] }
 0x269   :  { %v362_v51 = vpop.f32.mrb[0].mxu1 }
 0x26a   :  { %v368_v44 = vmul.f32 %v367_v57, %v362_v51  ;;  %v381_v52 = vmul.f32 %v380_v59, %v362_v51  ;;  %v394_v53 = vmul.f32 %v393_v60, %v362_v51  ;;  %v407_v6 = vmul.f32 %v406_v63, %v362_v51  ;;  %v1776_v43 = vpop.f32.mrb[1].mxu1 }
 0x26b   :  { %v420_v54 = vmul.f32 %v419_v1, %v362_v51  ;;  %v433_v57 = vmul.f32 %v432_v4, %v362_v51  ;;  %v446_v50 = vmul.f32 %v445_v7, %v362_v51  ;;  %v459_v59 = vmul.f32 %v458_v9, %v362_v51 }
 0x26c   :  { %v2864_v60 = vadd.f32 %v370_v58, %v368_v44  ;;  %v2868_v63 = vadd.f32 %v383_v61, %v381_v52  ;;  %v2872_v1 = vadd.f32 %v396_v62, %v394_v53  ;;  %v2876_v4 = vadd.f32 %v409_v0, %v407_v6 }
 0x26d   :  { %v2884_v7 = vadd.f32 %v422_v2, %v420_v54  ;;  %v2888_v58 = vadd.f32 %v435_v5, %v433_v57  ;;  %v699_v61 = vstv %s2786_s7  ;;  %v2900_v0 = vadd.f32 %v448_v8, %v446_v50  ;;  %s3759_s7 = sld [smem:[#allocation100_spill]] }
 0x26e   :  { %v373_v6 = vmul.f32 1.442695, %v2864_v60  ;;  %v386_v62 = vmul.f32 1.442695, %v2868_v63  ;;  %v399_v5 = vmul.f32 1.442695, %v2872_v1  ;;  %v2909_v44 = vadd.f32 %v461_v10, %v459_v59 }
 0x26f   :  { %v412_v43 = vmul.f32 1.442695, %v2876_v4  ;;  %v425_v8 = vmul.f32 1.442695, %v2884_v7  ;;  %v438_v10 = vmul.f32 1.442695, %v2888_v58  ;;  %v485_v57 = vmul.f32 %v484_v13, %v362_v51 }
 0x270   :  { %2097 = vpow2.f32 %v373_v6  ;;  %v451_v59 = vmul.f32 1.442695, %v2900_v0  ;;  %v472_v6 = vmul.f32 %v471_v11, %v362_v51  ;;  %v809_v54 = vstv %s2932_s10  ;;  %s3379_s10 = sld [smem:[#allocation16 + $0x5]] }
 0x271   :  { %2099 = vpow2.f32 %v386_v62  ;;  %v464_v62 = vmul.f32 1.442695, %v2909_v44  ;;  %v2956_v13 = vadd.f32 %v487_v14, %v485_v57  ;;  %vm372_vm1 = vcmp.gt.f32.partialorder %v2864_v60, 0.0 }
 0x272   :  { %2101 = vpow2.f32 %v399_v5  ;;  %v2946_v11 = vadd.f32 %v474_v12, %v472_v6  ;;  %vm385_vm2 = vcmp.gt.f32.partialorder %v2868_v63, 0.0  ;;  %vm398_vm3 = vcmp.gt.f32.partialorder %v2872_v1, 0.0 }
 0x273   :  { %2103 = vpow2.f32 %v412_v43  ;;  %v490_v14 = vmul.f32 1.442695, %v2956_v13  ;;  %vm411_vm4 = vcmp.gt.f32.partialorder %v2876_v4, 0.0  ;;  %vm424_vm5 = vcmp.gt.f32.partialorder %v2884_v7, 0.0 }
 0x274   :  { %2105 = vpow2.f32 %v425_v8  ;;  %v477_v12 = vmul.f32 1.442695, %v2946_v11  ;;  %vm437_vm6 = vcmp.gt.f32.partialorder %v2888_v58, 0.0  ;;  %vm450_vm7 = vcmp.gt.f32.partialorder %v2900_v0, 0.0 }
 0x275   :  { %2107 = vpow2.f32 %v438_v10  ;;  %vm463_vm8 = vcmp.gt.f32.partialorder %v2909_v44, 0.0  ;;  %vm476_vm9 = vcmp.gt.f32.partialorder %v2946_v11, 0.0  ;;  %vm489_vm10 = vcmp.gt.f32.partialorder %v2956_v13, 0.0 }
 0x276   :  { %2109 = vpow2.f32 %v451_v59 }
 0x277   :  { %2111 = vpow2.f32 %v464_v62 }
 0x278   :  { %2113 = vpow2.f32 %v477_v12 }
 0x279   :  { %2115 = vpow2.f32 %v490_v14 }
 0x27a   :  { %v2098_v62 = vpop.eup %2097 }
 0x27b   :  { %v2100_v57 = vpop.eup %2099  ;;  %v1437_v12 = vadd.f32 -1.0, %v2098_v62 }
 0x27c   :  { %v2102_v51 = vpop.eup %2101  ;;  %v1440_v59 = vadd.f32 -1.0, %v2100_v57 }
 0x27d   :  { %v2104_v8 = vpop.eup %2103  ;;  %v376_v52 = vmul.f32 1.6732632, %v1437_v12  ;;  %v1443_v5 = vadd.f32 -1.0, %v2102_v51 }
 0x27e   :  { %v2106_v10 = vpop.eup %2105  ;;  %v389_v62 = vmul.f32 1.6732632, %v1440_v59  ;;  %v1446_v57 = vadd.f32 -1.0, %v2104_v8 }
 0x27f   :  { %v2108_v14 = vpop.eup %2107  ;;  %v377_v50 = vsel %vm372_vm1, %v2864_v60, %v376_v52  ;;  %v402_v9 = vmul.f32 1.6732632, %v1443_v5  ;;  %v1449_v6 = vadd.f32 -1.0, %v2106_v10 }
 0x280   :  { %v2110_v51 = vpop.eup %2109  ;;  %v390_v12 = vsel %vm385_vm2, %v2868_v63, %v389_v62  ;;  %v415_v2 = vmul.f32 1.6732632, %v1446_v57  ;;  %v1452_v53 = vadd.f32 -1.0, %v2108_v14  ;;  %v3000_v8 = vmul.f32 1.050701, %v377_v50 }
 0x281   :  { %v2112_v59 = vpop.eup %2111  ;;  %v403_v60 = vsel %vm398_vm3, %v2872_v1, %v402_v9  ;;  %v428_v52 = vmul.f32 1.6732632, %v1449_v6  ;;  %v1455_v5 = vadd.f32 -1.0, %v2110_v51  ;;  %v3005_v43 = vmul.f32 1.050701, %v390_v12 }
 0x282   :  { %v2114_v10 = vpop.eup %2113  ;;  %v416_v63 = vsel %vm411_vm4, %v2876_v4, %v415_v2  ;;  %v441_v14 = vmul.f32 1.6732632, %v1452_v53  ;;  %v1458_v62 = vadd.f32 -1.0, %v2112_v59  ;;  %v3012_v9 = vmul.f32 1.050701, %v403_v60 }
 0x283   :  { %v2116_v57 = vpop.eup %2115  ;;  %v454_v50 = vmul.f32 1.6732632, %v1455_v5  ;;  %v1461_v1 = vadd.f32 -1.0, %v2114_v10  ;;  %v429_v6 = vsel %vm424_vm5, %v2884_v7, %v428_v52  ;;  %v3017_v4 = vmul.f32 1.050701, %v416_v63 }
 0x284   :  { %v467_v51 = vmul.f32 1.6732632, %v1458_v62  ;;  %v1464_v12 = vadd.f32 -1.0, %v2116_v57  ;;  %v498_v53 = vmul.f32 %v497_v15, %v3000_v8  ;;  %v442_v59 = vsel %vm437_vm6, %v2888_v58, %v441_v14 }
 0x285   :  { %v480_v2 = vmul.f32 1.6732632, %v1461_v1  ;;  %v455_v60 = vsel %vm450_vm7, %v2900_v0, %v454_v50  ;;  %v501_v7 = vmul.f32 %v500_v16, %v3005_v43  ;;  %v3028_v52 = vmul.f32 1.050701, %v429_v6 }
 0x286   :  { %v493_v5 = vmul.f32 1.6732632, %v1464_v12  ;;  %v468_v10 = vsel %vm463_vm8, %v2909_v44, %v467_v51  ;;  %v505_v63 = vmul.f32 %v504_v17, %v3012_v9  ;;  %v3038_v16 = vmul.f32 1.050701, %v442_v59 }
 0x287   :  { %v481_v15 = vsel %vm476_vm9, %v2946_v11, %v480_v2  ;;  %v502_v0 = vadd.f32 %v501_v7, %v498_v53  ;;  %v3040_v14 = vmul.f32 1.050701, %v455_v60  ;;  %v836_v44 = vstv %s2984_s13  ;;  %s3739_s13 = sld [smem:[#allocation91_spill]] }
 0x288   :  { %v494_v58 = vsel %vm489_vm10, %v2956_v13, %v493_v5  ;;  %v848_v62 = vstv %s2988_s3  ;;  %v509_v11 = vmul.f32 %v508_v18, %v3017_v4  ;;  %v537_v13 = vmul.f32 %v536_v25, %v3000_v8  ;;  %s3738_s3 = sld [smem:[#allocation84_spill]] }
 0x289   :  { %v506_v57 = vadd.f32 %v505_v63, %v502_v0  ;;  %v540_v17 = vmul.f32 %v539_v26, %v3005_v43  ;;  %v3053_v50 = vmul.f32 1.050701, %v468_v10  ;;  %v3055_v1 = vmul.f32 1.050701, %v481_v15 }
 0x28a   :  { %v3057_v6 = vmul.f32 1.050701, %v494_v58  ;;  %v851_v51 = vstv %s2994_s16  ;;  %v513_v25 = vmul.f32 %v512_v19, %v3028_v52  ;;  %v544_v26 = vmul.f32 %v543_v27, %v3012_v9  ;;  %s3160_s16 = sld [smem:[#allocation13 + $0x27]] }
 0x28b   :  { %v510_v18 = vadd.f32 %v509_v11, %v506_v57  ;;  %v541_v12 = vadd.f32 %v540_v17, %v537_v13  ;;  %v517_v2 = vmul.f32 %v516_v20, %v3038_v16  ;;  %v521_v53 = vmul.f32 %v520_v21, %v3040_v14 }
 0x28c   :  { %v576_v59 = vmul.f32 %v575_v35, %v3000_v8  ;;  %v855_v60 = vstv %s2998_s9  ;;  %v548_v27 = vmul.f32 %v547_v28, %v3017_v4  ;;  %v579_v7 = vmul.f32 %v578_v36, %v3005_v43  ;;  %s1563_s9 = sld [smem:[#allocation13 + $0x63]] }
 0x28d   :  { %v514_v19 = vadd.f32 %v513_v25, %v510_v18  ;;  %v545_v5 = vadd.f32 %v544_v26, %v541_v12  ;;  %v525_v20 = vmul.f32 %v524_v22, %v3053_v50  ;;  %v529_v21 = vmul.f32 %v528_v23, %v3055_v1 }
 0x28e   :  { %v533_v35 = vmul.f32 %v532_v24, %v3057_v6  ;;  %v552_v10 = vmul.f32 %v551_v29, %v3028_v52  ;;  %v580_v58 = vadd.f32 %v579_v7, %v576_v59  ;;  %v583_v36 = vmul.f32 %v582_v37, %v3012_v9 }
 0x28f   :  { %v518_v28 = vadd.f32 %v517_v2, %v514_v19  ;;  %v549_v15 = vadd.f32 %v548_v27, %v545_v5  ;;  %v556_v22 = vmul.f32 %v555_v30, %v3038_v16  ;;  %v560_v23 = vmul.f32 %v559_v31, %v3040_v14 }
 0x290   :  { %v615_v24 = vmul.f32 %v614_v45, %v3000_v8  ;;  %v618_v29 = vmul.f32 %v617_v46, %v3005_v43  ;;  %v584_v57 = vadd.f32 %v583_v36, %v580_v58  ;;  %v587_v37 = vmul.f32 %v586_v38, %v3017_v4 }
 0x291   :  { %v522_v0 = vadd.f32 %v521_v53, %v518_v28  ;;  %v553_v63 = vadd.f32 %v552_v10, %v549_v15  ;;  %v564_v30 = vmul.f32 %v563_v32, %v3053_v50  ;;  %v568_v31 = vmul.f32 %v567_v33, %v3055_v1 }
 0x292   :  { %v619_v11 = vadd.f32 %v618_v29, %v615_v24  ;;  %v622_v45 = vmul.f32 %v621_v47, %v3012_v9  ;;  %v588_v17 = vadd.f32 %v587_v37, %v584_v57  ;;  %v591_v38 = vmul.f32 %v590_v39, %v3028_v52 }
 0x293   :  { %v526_v46 = vadd.f32 %v525_v20, %v522_v0  ;;  %v557_v13 = vadd.f32 %v556_v22, %v553_v63  ;;  %v572_v32 = vmul.f32 %v571_v34, %v3057_v6  ;;  %v595_v18 = vmul.f32 %v594_v40, %v3038_v16 }
 0x294   :  { %v623_v33 = vadd.f32 %v622_v45, %v619_v11  ;;  %v626_v25 = vmul.f32 %v625_v48, %v3017_v4  ;;  %v592_v26 = vadd.f32 %v591_v38, %v588_v17  ;;  %v654_v2 = vmul.f32 %v653_v55, %v3000_v8 }
 0x295   :  { %v530_v47 = vadd.f32 %v529_v21, %v526_v46  ;;  %v561_v12 = vadd.f32 %v560_v23, %v557_v13  ;;  %v599_v39 = vmul.f32 %v598_v41, %v3040_v14  ;;  %v630_v40 = vmul.f32 %v629_v49, %v3028_v52 }
 0x296   :  { %v627_v34 = vadd.f32 %v626_v25, %v623_v33  ;;  %v657_v53 = vmul.f32 %v656_v56, %v3005_v43  ;;  %v596_v19 = vadd.f32 %v595_v18, %v592_v26  ;;  %v603_v55 = vmul.f32 %v602_v42, %v3053_v50 }
 0x297   :  { %v534_v48 = vadd.f32 %v533_v35, %v530_v47  ;;  %v565_v59 = vadd.f32 %v564_v30, %v561_v12  ;;  %v3734_v27 = vstv %s3728_s19  ;;  %v3737_v49 = vstv %s3729_s14  ;;  %s3752_s19 = sld [smem:[#allocation94_spill]]  ;;  %s3753_s14 = sld [smem:[#allocation99_spill]] }
 0x298   :  { %v631_v5 = vadd.f32 %v630_v40, %v627_v34  ;;  %v634_v41 = vmul.f32 %v3734_v27, %v3038_v16  ;;  %v658_v7 = vadd.f32 %v657_v53, %v654_v2  ;;  %v661_v20 = vmul.f32 %v3737_v49, %v3012_v9 }
 0x299   :  { %1809 = vmatprep.mubr.f32.mxu0 %v534_v48  ;;  %v569_v56 = vadd.f32 %v568_v31, %v565_v59  ;;  %v600_v21 = vadd.f32 %v599_v39, %v596_v19  ;;  %v3740_v35 = vstv %s3730_s4  ;;  %v3741_v42 = vstv %s3731_s8  ;;  %s3757_s4 = sld [smem:[#allocation95_spill]] }
 0x29a   :  { %v607_v10 = vmul.f32 %v3740_v35, %v3055_v1  ;;  %v638_v28 = vmul.f32 %v3741_v42, %v3040_v14  ;;  %v635_v15 = vadd.f32 %v634_v41, %v631_v5  ;;  %v662_v58 = vadd.f32 %v661_v20, %v658_v7  ;;  %s3771_s8 = sld [smem:[#allocation103_spill]] }
 0x29b   :  { %v3743_v36 = vstv %s3732_s22  ;;  %v693_v23 = vmul.f32 %v692_v3, %v3000_v8  ;;  %v573_v24 = vadd.f32 %v572_v32, %v569_v56  ;;  %v604_v29 = vadd.f32 %v603_v55, %v600_v21  ;;  %s3374_s22 = sld [smem:[#allocation14 + $0x8]] }
 0x29c   :  { %v665_v22 = vmul.f32 %v3743_v36, %v3017_v4  ;;  %v3746_v0 = vstv %s3735_s15  ;;  %v3747_v57 = vstv %s3736_s0  ;;  %v639_v30 = vadd.f32 %v638_v28, %v635_v15  ;;  %s3798_s15 = sld [smem:[#allocation31_spill]]  ;;  %s3800_s0 = sld [smem:[#allocation40_spill]] }
 0x29d   :  { %v611_v63 = vmul.f32 %v3746_v0, %v3057_v6  ;;  %v696_v37 = vmul.f32 %v3747_v57, %v3005_v43  ;;  %v3748_v31 = vstv %s3738_s3  ;;  %v3749_v46 = vstv %s3739_s13  ;;  %1810 = vmatmul.mubr.f32.vlgmr.msra.gmra.mrb[2].mxu0 %v573_v24  ;;  %s3802_s3 = sld [smem:[#allocation35_spill]]  ;;  %s3292_s13 = sld [smem:[#allocation13 + $0x45]] }
 0x29e   :  { %v642_v11 = vmul.f32 %v3748_v31, %v3053_v50  ;;  %v666_v45 = vadd.f32 %v665_v22, %v662_v58  ;;  %v669_v13 = vmul.f32 %v3749_v46, %v3028_v52  ;;  %v608_v3 = vadd.f32 %v607_v10, %v604_v29 }
 0x29f   :  { %v3751_v17 = vstv %s3742_s11  ;;  %v697_v32 = vadd.f32 %v696_v37, %v693_v23  ;;  %v700_v18 = vmul.f32 %v699_v61, %v3012_v9  ;;  %v3754_v25 = vstv %s3744_s12  ;;  %s3804_s11 = sld [smem:[#allocation42_spill]]  ;;  %s3806_s12 = sld [smem:[#allocation37_spill]] }
 0x2a0   :  { %v646_v38 = vmul.f32 %v3751_v17, %v3055_v1  ;;  %v643_v33 = vadd.f32 %v642_v11, %v639_v30  ;;  %v650_v47 = vmul.f32 %v3754_v25, %v3057_v6  ;;  %v670_v12 = vadd.f32 %v669_v13, %v666_v45 }
 0x2a1   :  { %v3755_v26 = vstv %s3745_s17  ;;  %v612_v39 = vadd.f32 %v611_v63, %v608_v3  ;;  %v701_v34 = vadd.f32 %v700_v18, %v697_v32  ;;  %v3756_v40 = vstv %s2788_s24  ;;  %s3764_s24 = sld [smem:[#allocation96_spill]]  ;;  %s3297_s17 = sld [smem:[#allocation13 + $0x62]] }
 0x2a2   :  { %v673_v2 = vmul.f32 %v3755_v26, %v3038_v16  ;;  %v704_v53 = vmul.f32 %v3756_v40, %v3017_v4  ;;  %v3758_v48 = vstv %s2818_s5  ;;  %v647_v59 = vadd.f32 %v646_v38, %v643_v33  ;;  %s3765_s5 = sld [smem:[#allocation101_spill]] }
 0x2a3   :  { %v732_v61 = vmul.f32 %v3758_v48, %v3000_v8  ;;  %v3760_v55 = vstv %s3750_s29  ;;  %v3761_v27 = vstv %s2820_s27  ;;  %1812 = vmatprep.mubr.f32.mxu0 %v612_v39  ;;  %v3762_v7 = vstv %s3752_s19  ;;  %s3770_s27 = sld [smem:[#allocation102_spill]]  ;;  %s3810_s29 = sld [smem:[#allocation39_spill]] }
 0x2a4   :  { %v674_v19 = vadd.f32 %v673_v2, %v670_v12  ;;  %v677_v5 = vmul.f32 %v3760_v55, %v3040_v14  ;;  %v735_v41 = vmul.f32 %v3761_v27, %v3005_v43  ;;  %v681_v49 = vmul.f32 %v3762_v7, %v3053_v50  ;;  %s3311_s19 = sld [smem:[#allocation13 + $0x4f]] }
 0x2a5   :  { %v705_v20 = vadd.f32 %v704_v53, %v701_v34  ;;  %v3763_v56 = vstv %s3753_s14  ;;  %v859_v35 = vstv %s3160_s16  ;;  %v651_v10 = vadd.f32 %v650_v47, %v647_v59  ;;  %s3812_s14 = sld [smem:[#allocation30_spill]]  ;;  %s1565_s16 = sld [smem:[#allocation14 + $0x1]] }
 0x2a6   :  { %v708_v21 = vmul.f32 %v3763_v56, %v3028_v52  ;;  %v678_v42 = vadd.f32 %v677_v5, %v674_v19  ;;  %v736_v28 = vadd.f32 %v735_v41, %v732_v61  ;;  %v3766_v15 = vstv %s2826_s20  ;;  %s3776_s20 = sld [smem:[#allocation104_spill]] }
 0x2a7   :  { %v739_v58 = vmul.f32 %v3766_v15, %v3012_v9  ;;  %v3767_v36 = vstv %s3757_s4  ;;  %v3768_v24 = vstv %s3759_s7  ;;  %v3769_v0 = vstv %s2828_s23  ;;  %1813 = vmatmul.mubr.f32.gmra.mrb[4].mxu0 %v651_v10  ;;  %s3781_s23 = sld [smem:[#allocation34_spill]]  ;;  %s3323_s4 = sld [smem:[#allocation13 + $0x59]] }
 0x2a8   :  { %v685_v22 = vmul.f32 %v3767_v36, %v3055_v1  ;;  %v709_v23 = vadd.f32 %v708_v21, %v705_v20  ;;  %v712_v29 = vmul.f32 %v3768_v24, %v3038_v16  ;;  %v743_v63 = vmul.f32 %v3769_v0, %v3017_v4  ;;  %s2364_s7 = smov [#allocation20]  }
 0x2a9   :  { %v682_v57 = vadd.f32 %v681_v49, %v678_v42  ;;  %v740_v37 = vadd.f32 %v739_v58, %v736_v28  ;;  %v3772_v30 = vstv %s2878_s25  ;;  %v3773_v11 = vstv %s2880_s26  ;;  %s3784_s25 = sld [smem:[#allocation32_spill]]  ;;  %s3787_s26 = sld [smem:[#allocation29_spill]] }
 0x2aa   :  { %v771_v31 = vmul.f32 %v3772_v30, %v3000_v8  ;;  %v774_v45 = vmul.f32 %v3773_v11, %v3005_v43  ;;  %v3774_v46 = vstv %s3764_s24  ;;  %v713_v3 = vadd.f32 %v712_v29, %v709_v23  ;;  %s1001_s24 = sld [smem:[#allocation14]] }
 0x2ab   :  { %v689_v13 = vmul.f32 %v3774_v46, %v3057_v6  ;;  %v3775_v17 = vstv %s3765_s5  ;;  %v3777_v32 = vstv %s2834_s6  ;;  %v686_v33 = vadd.f32 %v685_v22, %v682_v57  ;;  %s3783_s6 = sld [smem:[#allocation28_spill]]  ;;  %s1569_s5 = sld [smem:[#allocation14 + $0x3]] }
 0x2ac   :  { %v716_v38 = vmul.f32 %v3775_v17, %v3040_v14  ;;  %v747_v18 = vmul.f32 %v3777_v32, %v3028_v52  ;;  %v744_v25 = vadd.f32 %v743_v63, %v740_v37  ;;  %v775_v47 = vadd.f32 %v774_v45, %v771_v31 }
 0x2ad   :  { %v3778_v12 = vstv %s2892_s1  ;;  %v3779_v39 = vstv %s3770_s27  ;;  %v3780_v40 = vstv %s3771_s8  ;;  %v3782_v48 = vstv %s2836_s18  ;;  %s3789_s18 = sld [smem:[#allocation36_spill]]  ;;  %s3262_s1 = sld [smem:[#allocation13 + $0x31]] }
 0x2ae   :  { %v778_v26 = vmul.f32 %v3778_v12, %v3012_v9  ;;  %v717_v2 = vadd.f32 %v716_v38, %v713_v3  ;;  %v720_v34 = vmul.f32 %v3779_v39, %v3053_v50  ;;  %v724_v53 = vmul.f32 %v3780_v40, %v3055_v1  ;;  %s1567_s27 = sld [smem:[#allocation14 + $0x2]]  ;;  %s1573_s8 = sld [smem:[#allocation14 + $0x5]] }
 0x2af   :  { %v751_v61 = vmul.f32 %v3782_v48, %v3038_v16  ;;  %v690_v59 = vadd.f32 %v689_v13, %v686_v33  ;;  %v748_v19 = vadd.f32 %v747_v18, %v744_v25  ;;  %v3785_v5 = vstv %s2894_s28  ;;  %s3791_s28 = sld [smem:[#allocation33_spill]] }
 0x2b0   :  { %v779_v55 = vadd.f32 %v778_v26, %v775_v47  ;;  %v782_v27 = vmul.f32 %v3785_v5, %v3017_v4  ;;  %v721_v41 = vadd.f32 %v720_v34, %v717_v2  ;;  %v3786_v7 = vstv %s3776_s20  ;;  %s1571_s20 = sld [smem:[#allocation14 + $0x4]] }
 0x2b1   :  { %v728_v49 = vmul.f32 %v3786_v7, %v3057_v6  ;;  %v810_v20 = vmul.f32 %v809_v54, %v3000_v8  ;;  %v3788_v56 = vstv %s2934_s2  ;;  %1815 = vmatprep.mubr.f32.mxu0 %v690_v59  ;;  %v752_v10 = vadd.f32 %v751_v61, %v748_v19  ;;  %s3795_s2 = sld [smem:[#allocation38_spill]] }
 0x2b2   :  { %v813_v21 = vmul.f32 %v3788_v56, %v3005_v43  ;;  %v3790_v42 = vstv %s2846_s21  ;;  %v783_v15 = vadd.f32 %v782_v27, %v779_v55  ;;  %v3793_v58 = vstv %s3781_s23  ;;  %s3278_s21 = sld [smem:[#allocation13 + $0x3b]]  ;;  %s3355_s23 = sld [smem:[#allocation16 + $0x1]] }
 0x2b3   :  { %v755_v28 = vmul.f32 %v3790_v42, %v3040_v14  ;;  %v786_v36 = vmul.f32 %v3793_v58, %v3028_v52  ;;  %v725_v22 = vadd.f32 %v724_v53, %v721_v41  ;;  %v3794_v54 = vstv %s3783_s6  ;;  %s3357_s6 = sld [smem:[#allocation16]] }
 0x2b4   :  { %v759_v23 = vmul.f32 %v3794_v54, %v3053_v50  ;;  %v814_v24 = vadd.f32 %v813_v21, %v810_v20  ;;  %v3796_v29 = vstv %s3784_s25  ;;  %v3799_v57 = vstv %s3787_s26  ;;  %s3359_s25 = sld [smem:[#allocation14 + $0x7]]  ;;  %s3361_s26 = sld [smem:[#allocation14 + $0x6]] }
 0x2b5   :  { %v817_v0 = vmul.f32 %v3796_v29, %v3012_v9  ;;  %v756_v63 = vadd.f32 %v755_v28, %v752_v10  ;;  %v763_v37 = vmul.f32 %v3799_v57, %v3055_v1  ;;  %v787_v30 = vadd.f32 %v786_v36, %v783_v15 }
 0x2b6   :  { %v3801_v31 = vstv %s3789_s18  ;;  %v729_v45 = vadd.f32 %v728_v49, %v725_v22  ;;  %v3803_v13 = vstv %s3791_s28  ;;  %v849_v17 = vmul.f32 %v848_v62, %v3000_v8  ;;  %s3364_s18 = sld [smem:[#allocation16 + $0x2]]  ;;  %s3371_s28 = sld [smem:[#allocation14 + $0x9]] }
 0x2b7   :  { %v790_v11 = vmul.f32 %v3801_v31, %v3038_v16  ;;  %v818_v46 = vadd.f32 %v817_v0, %v814_v24  ;;  %v821_v3 = vmul.f32 %v3803_v13, %v3017_v4  ;;  %v760_v38 = vadd.f32 %v759_v23, %v756_v63 }
 0x2b8   :  { %v3805_v18 = vstv %s3795_s2  ;;  %v852_v25 = vmul.f32 %v851_v51, %v3005_v43  ;;  %1816 = vmatmul.mubr.f32.gmra.mrb[6].mxu0 %v729_v45  ;;  %v3807_v47 = vstv %s3798_s15  ;;  %v3808_v62 = vstv %s3800_s0  ;;  %s3377_s2 = sld [smem:[#allocation16 + $0x4]]  ;;  %s1590_s15 = sld [smem:[#allocation16 + $0x8]] }
 0x2b9   :  { %v791_v32 = vadd.f32 %v790_v11, %v787_v30  ;;  %v794_v33 = vmul.f32 %v3805_v18, %v3040_v14  ;;  %v767_v8 = vmul.f32 %v3807_v47, %v3057_v6  ;;  %v798_v12 = vmul.f32 %v3808_v62, %v3053_v50  ;;  %v1221_v18 = vld [vmem:[#allocation17 + $0x10] sm:$0xff]  ;;  %s1591_s0 = sld [smem:[#allocation16 + $0x9]] }
 0x2ba   :  { %v822_v26 = vadd.f32 %v821_v3, %v818_v46  ;;  %v3809_v2 = vstv %s3802_s3  ;;  %v764_v34 = vadd.f32 %v763_v37, %v760_v38  ;;  %v853_v43 = vadd.f32 %v852_v25, %v849_v17  ;;  %v1222_v25 = vld [vmem:[#allocation17 + $0x18] sm:$0xff] }
 0x2bb   :  { %v825_v39 = vmul.f32 %v3809_v2, %v3028_v52  ;;  %v795_v40 = vadd.f32 %v794_v33, %v791_v32  ;;  %v856_v51 = vmul.f32 %v855_v60, %v3012_v9  ;;  %v3811_v53 = vstv %s3804_s11  ;;  %v1220_v32 = vld [vmem:[#allocation17 + $0x8] sm:$0xff]  ;;  %s3819_s11 = sld [smem:[#allocation107_spill]] }
 0x2bc   :  { %v802_v48 = vmul.f32 %v3811_v53, %v3055_v1  ;;  %v3813_v59 = vstv %s3806_s12  ;;  %v863_v55 = vstv %s3262_s1  ;;  %v768_v5 = vadd.f32 %v767_v8, %v764_v34  ;;  %s3367_s1 = sld [smem:[#allocation16 + $0x3]] }
 0x2bd   :  { %v826_v61 = vadd.f32 %v825_v39, %v822_v26  ;;  %v829_v19 = vmul.f32 %v3813_v59, %v3038_v16  ;;  %v799_v27 = vadd.f32 %v798_v12, %v795_v40  ;;  %v857_v41 = vadd.f32 %v856_v51, %v853_v43 }
 0x2be   :  { %v860_v9 = vmul.f32 %v859_v35, %v3017_v4  ;;  %v3815_v7 = vstv %s3810_s29  ;;  %v840_v20 = vstv %s3276_s30  ;;  %v867_v56 = vstv %s3278_s21  ;;  %1818 = vmatprep.mubr.f32.mxu0 %v768_v5  ;;  %s1588_s30 = sld [smem:[#allocation16 + $0x6]]  ;;  %s1589_s21 = sld [smem:[#allocation16 + $0x7]] }
 0x2bf   :  { %v830_v60 = vadd.f32 %v829_v19, %v826_v61  ;;  %v833_v49 = vmul.f32 %v3815_v7, %v3040_v14  ;;  %v803_v21 = vadd.f32 %v802_v48, %v799_v27  ;;  %v3816_v10 = vstv %s3812_s14  ;;  %s3820_s29 = sld [smem:[#allocation108_spill]] }
 0x2c0   :  { %v806_v42 = vmul.f32 %v3816_v10, %v3057_v6  ;;  %v861_v28 = vadd.f32 %v860_v9, %v857_v41  ;;  %v864_v15 = vmul.f32 %v863_v55, %v3028_v52  ;;  %v837_v4 = vmul.f32 %v836_v44, %v3053_v50 }
 0x2c1   :  { %v834_v58 = vadd.f32 %v833_v49, %v830_v60  ;;  %v871_v35 = vstv %s3292_s13  ;;  %v844_v22 = vstv %s3297_s17  ;;  %v868_v23 = vmul.f32 %v867_v56, %v3038_v16 }
 0x2c2   :  { %v807_v36 = vadd.f32 %v806_v42, %v803_v21  ;;  %v865_v54 = vadd.f32 %v864_v15, %v861_v28  ;;  %v841_v29 = vmul.f32 %v840_v20, %v3055_v1  ;;  %v875_v0 = vstv %s3311_s19 }
 0x2c3   :  { %v838_v24 = vadd.f32 %v837_v4, %v834_v58  ;;  %v872_v57 = vmul.f32 %v871_v35, %v3040_v14  ;;  %v845_v37 = vmul.f32 %v844_v22, %v3057_v6  ;;  %v879_v30 = vstv %s3323_s4  ;;  %v1219_v14 = vld [vmem:[#allocation17] sm:$0xff]  ;;  %s3821_s4 = sld [smem:[#allocation109_spill]] }
 0x2c4   :  { %1819 = vmatmul.mubr.f32.gmra.mrb[8].mxu0 %v807_v36  ;;  %v869_v63 = vadd.f32 %v868_v23, %v865_v54  ;;  %v876_v44 = vmul.f32 %v875_v0, %v3053_v50  ;;  %v883_v45 = vstv %s1563_s9  ;;  %v880_v16 = vmul.f32 %v879_v30, %v3055_v1  ;;  %s1421_s9 = sshll.u32 %s2364_s7, 4  ;;  %s1422_s9 = int_to_ptr.vmem [resolvable:$true] %s1421_s9 }
 0x2c5   :  { %v842_v52 = vadd.f32 %v841_v29, %v838_v24  ;;  %v884_v3 = vmul.f32 %v883_v45, %v3057_v6  ;;  %v3817_v38 = vmov 0.0   ;;  %v2034_v33 = vpack.c.bf16 %v1220_v32, %v1219_v14  ;;  %p2318_p10 = scmp.lt.s32.totalorder %s1422_s9, %s1422_s9 }
 0x2c6   :  { %v873_v31 = vadd.f32 %v872_v57, %v869_v63  ;;  %v2037_v50 = vpack.c.bf16 %v1222_v25, %v1221_v18  ;;  %v3818_v47 = vmov 0.0|0.0   ;;  %v1012_v1 = vstv %s1565_s16 }
 0x2c7   :  { %v846_v11 = vadd.f32 %v845_v37, %v842_v52  ;;  %2035 = vmatpush3.bf16.msra.mxu0 %v2034_v33  ;;  %v1002_v6 = vstv %s1001_s24  ;;  %v1032_v34 = vstv %s1569_s5  ;;  %v1022_v40 = vstv %s1567_s27  ;;  %s3822_s5 = sld [smem:[#allocation106_spill]] }
 0x2c8   :  { %v877_v46 = vadd.f32 %v876_v44, %v873_v31  ;;  %2036 = vmatprep.subr.bf16.mxu0 %v3818_v47  ;;  %v1052_v27 = vstv %s1573_s8  ;;  %v1042_v9 = vstv %s1571_s20  ;;  %v1105_v10 = vstv %s3355_s23  ;;  %s3823_s20 = sld [smem:[#allocation105_spill]]  ;;  %s2313_s23 = scalar_lea.vmem %s1422_s9, 128 }
 0x2c9   :  { %1821 = vmatprep.mubr.f32.mxu0 %v846_v11  ;;  %v1102_v58 = vstv %s3357_s6  ;;  %v1072_v57 = vstv %s3359_s25  ;;  %v1062_v30 = vstv %s3361_s26  ;;  %v1109_v45 = vstv %s3364_s18  ;;  %p2314_p9 = scmp.ne.s32.totalorder %s1422_s9, %s2313_s23  ;;  %p2319_p11 = scmp.lt.s32.totalorder %s2313_s23, %s2313_s23 }
 0x2ca   :  { %v881_v13 = vadd.f32 %v880_v16, %v877_v46  ;;  %v1113_v14 = vstv %s3367_s1 }
 0x2cb   :  { %2038 = vmatpush3.bf16.msra.mxu0 %v2037_v50  ;;  %p2320_p12 = por %p2319_p11, %p2318_p10 }
 0x2cc   :  { %v885_v17 = vadd.f32 %v884_v3, %v881_v13  ;;  %2039 = vmatprep.subr.bf16.mxu0 %v3818_v47 }
 0x2cd   :  { %p2321_p13 = pnand %p2320_p12, %p2314_p9 }
 0x2ce   :  { %1822 = vmatmul.mubr.f32.gmra.mrb[10].mxu0 %v885_v17 }
 0x2cf   :  { %1891 = vmatprep.mubr.msk.f32.mxu0 %vm2362_vm0, %v3817_v38 }
 0x370   :  { %v1811_v8 = vpop.f32.mrb[2].mxu0 }
 0x371   :  { %v1013_v62 = vadd.f32 %v1811_v8, %v1012_v1  ;;  %v952_v12 = vpop.f32.mrb[3].mxu0 }
 0x372   :  { %v1003_v26 = vadd.f32 %v1002_v6, %v952_v12 }
 0x373   :  { %v1015_v2 = vmul.f32 1.442695, %v1013_v62  ;;  %vm1014_vm11 = vcmp.gt.f32.partialorder %v1013_v62, 0.0 }
 0x374   :  { %v1005_v39 = vmul.f32 1.442695, %v1003_v26  ;;  %vm1004_vm12 = vcmp.gt.f32.partialorder %v1003_v26, 0.0 }
 0x375   :  { %2117 = vpow2.f32 %v1015_v2 }
 0x376   :  { %2119 = vpow2.f32 %v1005_v39  ;;  %v1082_v39 = vstv %s3374_s22 }
 0x37a   :  { %v1814_v43 = vpop.f32.mrb[4].mxu0 }
 0x37b   :  { %v1033_v51 = vadd.f32 %v1814_v43, %v1032_v34  ;;  %v962_v53 = vpop.f32.mrb[5].mxu0 }
 0x37c   :  { %v1023_v48 = vadd.f32 %v1022_v40, %v962_v53 }
 0x37d   :  { %v1035_v61 = vmul.f32 1.442695, %v1033_v51  ;;  %vm1034_vm13 = vcmp.gt.f32.partialorder %v1033_v51, 0.0 }
 0x37e   :  { %v1025_v59 = vmul.f32 1.442695, %v1023_v48  ;;  %vm1024_vm14 = vcmp.gt.f32.partialorder %v1023_v48, 0.0 }
 0x37f   :  { %2121 = vpow2.f32 %v1035_v61  ;;  %v2118_v19 = vpop.eup %2117  ;;  %v1117_v61 = vstv %s3377_s2 }
 0x380   :  { %2123 = vpow2.f32 %v1025_v59  ;;  %v2120_v55 = vpop.eup %2119  ;;  %v1566_v5 = vadd.f32 -1.0, %v2118_v19 }
 0x381   :  { %v1564_v41 = vadd.f32 -1.0, %v2120_v55 }
 0x382   :  { %v1018_v60 = vmul.f32 1.6732632, %v1566_v5 }
 0x383   :  { %v1008_v49 = vmul.f32 1.6732632, %v1564_v41 }
 0x384   :  { %v1019_v21 = vsel %vm1014_vm11, %v1013_v62, %v1018_v60 }
 0x385   :  { %v1020_v28 = vmul.f32 1.050701, %v1019_v21  ;;  %v1009_v15 = vsel %vm1004_vm12, %v1003_v26, %v1008_v49  ;;  %v1092_v26 = vstv %s3371_s28 }
 0x386   :  { %v1010_v36 = vmul.f32 1.050701, %v1009_v15 }
 0x387   :  { %v1106_v23 = vmul.f32 %v1105_v10, %v1020_v28 }
 0x388   :  { %v1103_v29 = vmul.f32 %v1102_v58, %v1010_v36 }
 0x389   :  { %v2122_v35 = vpop.eup %2121 }
 0x38a   :  { %v2124_v54 = vpop.eup %2123  ;;  %v1570_v24 = vadd.f32 -1.0, %v2122_v35  ;;  %v1107_v52 = vadd.f32 %v1106_v23, %v1103_v29 }
 0x38b   :  { %v1817_v7 = vpop.f32.mrb[6].mxu0  ;;  %v1568_v0 = vadd.f32 -1.0, %v2124_v54 }
 0x38c   :  { %v1053_v20 = vadd.f32 %v1817_v7, %v1052_v27  ;;  %v972_v56 = vpop.f32.mrb[7].mxu0  ;;  %v1038_v63 = vmul.f32 1.6732632, %v1570_v24  ;;  %v1121_v27 = vstv %s3379_s10 }
 0x38d   :  { %v1043_v42 = vadd.f32 %v1042_v9, %v972_v56  ;;  %v1028_v37 = vmul.f32 1.6732632, %v1568_v0 }
 0x38e   :  { %v1055_v4 = vmul.f32 1.442695, %v1053_v20  ;;  %v1039_v31 = vsel %vm1034_vm13, %v1033_v51, %v1038_v63  ;;  %vm1054_vm15 = vcmp.gt.f32.partialorder %v1053_v20, 0.0 }
 0x38f   :  { %v1045_v22 = vmul.f32 1.442695, %v1043_v42  ;;  %v1029_v11 = vsel %vm1024_vm14, %v1023_v48, %v1028_v37  ;;  %v1040_v13 = vmul.f32 1.050701, %v1039_v31  ;;  %vm1044_vm1 = vcmp.gt.f32.partialorder %v1043_v42, 0.0 }
 0x390   :  { %2125 = vpow2.f32 %v1055_v4  ;;  %v1030_v3 = vmul.f32 1.050701, %v1029_v11  ;;  %v1125_v4 = vstv %s1588_s30  ;;  %v1133_v11 = vstv %s1590_s15 }
 0x391   :  { %2127 = vpow2.f32 %v1045_v22  ;;  %v1114_v50 = vmul.f32 %v1113_v14, %v1040_v13  ;;  %v1129_v22 = vstv %s1589_s21 }
 0x392   :  { %v1110_v18 = vmul.f32 %v1109_v45, %v1030_v3 }
 0x394   :  { %v1111_v1 = vadd.f32 %v1110_v18, %v1107_v52  ;;  %v1224_v18 = vld [vmem:[#allocation17 + $0x28] sm:$0xff] }
 0x396   :  { %v1115_v12 = vadd.f32 %v1114_v50, %v1111_v1  ;;  %v1226_v50 = vld [vmem:[#allocation17 + $0x38] sm:$0xff]  ;;  %v1227_v1 = vld [vmem:[#allocation17 + $0x40] sm:$0xff] }
 0x397   :  { %v1820_v44 = vpop.f32.mrb[8].mxu0 }
 0x398   :  { %v1073_v46 = vadd.f32 %v1820_v44, %v1072_v57  ;;  %v982_v16 = vpop.f32.mrb[9].mxu0 }
 0x399   :  { %v1063_v17 = vadd.f32 %v1062_v30, %v982_v16  ;;  %v1137_v16 = vstv %s1591_s0 }
 0x39a   :  { %v1075_v32 = vmul.f32 1.442695, %v1073_v46  ;;  %v2126_v25 = vpop.eup %2125  ;;  %vm1074_vm2 = vcmp.gt.f32.partialorder %v1073_v46, 0.0 }
 0x39b   :  { %v1065_v33 = vmul.f32 1.442695, %v1063_v17  ;;  %v2128_v6 = vpop.eup %2127  ;;  %v1574_v8 = vadd.f32 -1.0, %v2126_v25  ;;  %vm1064_vm3 = vcmp.gt.f32.partialorder %v1063_v17, 0.0  ;;  %v1225_v25 = vld [vmem:[#allocation17 + $0x30] sm:$0xff] }
 0x39c   :  { %2129 = vpow2.f32 %v1075_v32  ;;  %v1572_v62 = vadd.f32 -1.0, %v2128_v6  ;;  %v1223_v32 = vld [vmem:[#allocation17 + $0x20] sm:$0xff]  ;;  %v2043_v6 = vpack.c.bf16 %v1226_v50, %v1225_v25  ;;  %v2142_v50 = vld [vmem:[%s3823_s20] ss:$0 sm:$0xff] }
 0x39d   :  { %2131 = vpow2.f32 %v1065_v33  ;;  %v1058_v2 = vmul.f32 1.6732632, %v1574_v8  ;;  %v2040_v33 = vpack.c.bf16 %v1224_v18, %v1223_v32  ;;  %v1228_v8 = vld [vmem:[#allocation17 + $0x48] sm:$0xff] }
 0x39e   :  { %v1048_v34 = vmul.f32 1.6732632, %v1572_v62  ;;  %v2046_v62 = vpack.c.bf16 %v1228_v8, %v1227_v1 }
 0x39f   :  { %v1059_v43 = vsel %vm1054_vm15, %v1053_v20, %v1058_v2  ;;  %2041 = vmatpush3.bf16.msra.mxu0 %v2040_v33  ;;  %v1320_v2 = vld [vmem:[#allocation19 + $0x8] sm:$0xff]  ;;  %v2141_v33 = vld [vmem:[%s3822_s5] ss:$0 sm:$0xff] }
 0x3a0   :  { %v1049_v48 = vsel %vm1044_vm1, %v1043_v42, %v1048_v34  ;;  %v1060_v19 = vmul.f32 1.050701, %v1059_v43  ;;  %2042 = vmatprep.subr.bf16.mxu0 %v3818_v47  ;;  %v1321_v34 = vld [vmem:[#allocation19 + $0x10] sm:$0xff] }
 0x3a1   :  { %v1823_v40 = vpop.f32.mrb[10].mxu0  ;;  %v1050_v55 = vmul.f32 1.050701, %v1049_v48  ;;  %v1232_v48 = vld [vmem:[#allocation17 + $0x68] sm:$0xff] }
 0x3a2   :  { %v1093_v51 = vadd.f32 %v1823_v40, %v1092_v26  ;;  %v992_v53 = vpop.f32.mrb[11].mxu0  ;;  %v1122_v20 = vmul.f32 %v1121_v27, %v1060_v19  ;;  %v1319_v26 = vld [vmem:[#allocation19] sm:$0xff]  ;;  %v1322_v40 = vld [vmem:[#allocation19 + $0x18] sm:$0xff] }
 0x3a3   :  { %v1083_v59 = vadd.f32 %v1082_v39, %v992_v53  ;;  %v1118_v60 = vmul.f32 %v1117_v61, %v1050_v55  ;;  %2044 = vmatpush3.bf16.msra.mxu0 %v2043_v6  ;;  %v1230_v39 = vld [vmem:[#allocation17 + $0x58] sm:$0xff]  ;;  %v2061_v43 = vpack.c.bf16 %v1322_v40, %v1321_v34  ;;  %v1231_v53 = vld [vmem:[#allocation17 + $0x60] sm:$0xff] }
 0x3a4   :  { %v1095_v5 = vmul.f32 1.442695, %v1093_v51  ;;  %vm1094_vm4 = vcmp.gt.f32.partialorder %v1093_v51, 0.0  ;;  %2045 = vmatprep.subr.bf16.mxu0 %v3818_v47  ;;  %v2052_v61 = vpack.c.bf16 %v1232_v48, %v1231_v53  ;;  %v1234_v19 = vld [vmem:[#allocation17 + $0x78] sm:$0xff] }
 0x3a5   :  { %v1085_v41 = vmul.f32 1.442695, %v1083_v59  ;;  %v1119_v56 = vadd.f32 %v1118_v60, %v1115_v12  ;;  %vm1084_vm5 = vcmp.gt.f32.partialorder %v1083_v59, 0.0  ;;  %v1229_v12 = vld [vmem:[#allocation17 + $0x50] sm:$0xff] }
 0x3a6   :  { %v2130_v9 = vpop.eup %2129  ;;  %2133 = vpow2.f32 %v1095_v5  ;;  %v1141_v5 = vstv %s3819_s11 }
 0x3a7   :  { %v2132_v7 = vpop.eup %2131  ;;  %v1578_v49 = vadd.f32 -1.0, %v2130_v9  ;;  %2135 = vpow2.f32 %v1085_v41  ;;  %v1123_v28 = vadd.f32 %v1122_v20, %v1119_v56  ;;  %2047 = vmatpush3.bf16.msra.mxu0 %v2046_v62 }
 0x3a8   :  { %v1576_v21 = vadd.f32 -1.0, %v2132_v7  ;;  %2048 = vmatprep.subr.bf16.mxu0 %v3818_v47 }
 0x3a9   :  { %v1078_v10 = vmul.f32 1.6732632, %v1578_v49 }
 0x3aa   :  { %v1068_v42 = vmul.f32 1.6732632, %v1576_v21 }
 0x3ab   :  { %v1079_v15 = vsel %vm1074_vm2, %v1073_v46, %v1078_v10  ;;  %v1323_v10 = vld [vmem:[#allocation19 + $0x20] sm:$0xff] }
 0x3ac   :  { %v1069_v58 = vsel %vm1064_vm3, %v1063_v17, %v1068_v42  ;;  %v1080_v35 = vmul.f32 1.050701, %v1079_v15  ;;  %v1324_v42 = vld [vmem:[#allocation19 + $0x28] sm:$0xff]  ;;  %v1325_v15 = vld [vmem:[#allocation19 + $0x30] sm:$0xff] }
 0x3ad   :  { %v1070_v36 = vmul.f32 1.050701, %v1069_v58  ;;  %v1326_v58 = vld [vmem:[#allocation19 + $0x38] sm:$0xff] }
 0x3ae   :  { %v1130_v29 = vmul.f32 %v1129_v22, %v1080_v35  ;;  %v2067_v35 = vpack.c.bf16 %v1326_v58, %v1325_v15 }
 0x3af   :  { %v1126_v54 = vmul.f32 %v1125_v4, %v1070_v36  ;;  %v1327_v4 = vld [vmem:[#allocation19 + $0x40] sm:$0xff]  ;;  %v1328_v36 = vld [vmem:[#allocation19 + $0x48] sm:$0xff] }
 0x3b0   :  { %v2134_v23 = vpop.eup %2133  ;;  %v2070_v22 = vpack.c.bf16 %v1328_v36, %v1327_v4 }
 0x3b1   :  { %v2136_v24 = vpop.eup %2135  ;;  %v1127_v0 = vadd.f32 %v1126_v54, %v1123_v28  ;;  %v1582_v63 = vadd.f32 -1.0, %v2134_v23  ;;  %v2064_v28 = vpack.c.bf16 %v1324_v42, %v1323_v10  ;;  %v1329_v54 = vld [vmem:[#allocation19 + $0x50] sm:$0xff]  ;;  %v1330_v23 = vld [vmem:[#allocation19 + $0x58] sm:$0xff] }
 0x3b2   :  { %v1580_v57 = vadd.f32 -1.0, %v2136_v24  ;;  %v2073_v24 = vpack.c.bf16 %v1330_v23, %v1329_v54 }
 0x3b3   :  { %v1098_v52 = vmul.f32 1.6732632, %v1582_v63  ;;  %v1131_v37 = vadd.f32 %v1130_v29, %v1127_v0  ;;  %v1331_v29 = vld [vmem:[#allocation19 + $0x60] sm:$0xff]  ;;  %v1332_v0 = vld [vmem:[#allocation19 + $0x68] sm:$0xff] }
 0x3b4   :  { %v1088_v30 = vmul.f32 1.6732632, %v1580_v57  ;;  %v2076_v63 = vpack.c.bf16 %v1332_v0, %v1331_v29  ;;  %v1333_v57 = vld [vmem:[#allocation19 + $0x70] sm:$0xff] }
 0x3b5   :  { %v1099_v31 = vsel %vm1094_vm4, %v1093_v51, %v1098_v52  ;;  %v2049_v51 = vpack.c.bf16 %v1230_v39, %v1229_v12  ;;  %v1334_v52 = vld [vmem:[#allocation19 + $0x78] sm:$0xff] }
 0x3b6   :  { %v1089_v44 = vsel %vm1084_vm5, %v1083_v59, %v1088_v30  ;;  %v1100_v45 = vmul.f32 1.050701, %v1099_v31  ;;  %v1233_v59 = vld [vmem:[#allocation17 + $0x70] sm:$0xff]  ;;  %v1593_v30 = vld [vmem:[%s3820_s29] ss:$0 sm:$0xff] }
 0x3b7   :  { %v1090_v46 = vmul.f32 1.050701, %v1089_v44  ;;  %2050 = vmatpush3.bf16.msra.mxu0 %v2049_v51  ;;  %v2055_v55 = vpack.c.bf16 %v1234_v19, %v1233_v59 }
 0x3b8   :  { %v1138_v3 = vmul.f32 %v1137_v16, %v1100_v45  ;;  %2051 = vmatprep.subr.bf16.mxu0 %v3818_v47 }
 0x3b9   :  { %v1134_v13 = vmul.f32 %v1133_v11, %v1090_v46 }
 0x3bb   :  { %v1135_v17 = vadd.f32 %v1134_v13, %v1131_v37  ;;  %2053 = vmatpush3.bf16.msra.mxu0 %v2052_v61  ;;  %v2079_v37 = vpack.c.bf16 %v1334_v52, %v1333_v57 }
 0x3bc   :  { %2054 = vmatprep.subr.bf16.mxu0 %v3818_v47 }
 0x3bd   :  { %v1139_v14 = vadd.f32 %v1138_v3, %v1135_v17 }
 0x3bf   :  { %1857 = vmatmul.mubr.f32.vlgmr.msra.gmra.mrb[2].mxu1 %v1139_v14  ;;  %2056 = vmatpush3.bf16.msra.mxu0 %v2055_v55 }
 0x3c0   :  { %1926 = vmatprep.mubr.msk.f32.mxu1 %vm2362_vm0, %v3817_v38  ;;  %v2058_v38 = vpack.c.bf16 %v1320_v2, %v1319_v26 }
 0x3c2   :  { %2059 = vmatpush3.bf16.msra.mxu1 %v2058_v38 }
 0x3c3   :  { %2060 = vmatprep.subr.bf16.mxu1 %v3818_v47 }
 0x3c6   :  { %2062 = vmatpush3.bf16.msra.mxu1 %v2061_v43 }
 0x3c7   :  { %2063 = vmatprep.subr.bf16.mxu1 %v3818_v47 }
 0x3ca   :  { %2065 = vmatpush3.bf16.msra.mxu1 %v2064_v28 }
 0x3cb   :  { %2066 = vmatprep.subr.bf16.mxu1 %v3818_v47 }
 0x3ce   :  { %2068 = vmatpush3.bf16.msra.mxu1 %v2067_v35 }
 0x3cf   :  { %2069 = vmatprep.subr.bf16.mxu1 %v3818_v47 }
 0x3d2   :  { %2071 = vmatpush3.bf16.msra.mxu1 %v2070_v22 }
 0x3d3   :  { %2072 = vmatprep.subr.bf16.mxu1 %v3818_v47 }
 0x3d6   :  { %2074 = vmatpush3.bf16.msra.mxu1 %v2073_v24 }
 0x3d7   :  { %2075 = vmatprep.subr.bf16.mxu1 %v3818_v47 }
 0x3da   :  { %2077 = vmatpush3.bf16.msra.mxu1 %v2076_v63 }
 0x3db   :  { %2078 = vmatprep.subr.bf16.mxu1 %v3818_v47  ;;  %v1595_v47 = vld [vmem:[%s3821_s4] ss:$0 sm:$0xff] }
 0x3de   :  { %2080 = vmatpush3.bf16.msra.mxu1 %v2079_v37 }
 0x492   :  { %v1208_v27 = vpop.f32.mrb[2].mxu1 }
 0x493   :  { %v1209_v41 = vadd.f32 %v1208_v27, %v1141_v5  ;;  %v1858_v9 = vpop.f32.mrb[3].mxu1 }
 0x495   :  { %v1213_v60 = vmul.f32 1.442695, %v1209_v41  ;;  %vm1212_vm0 = vcmp.gt.f32.partialorder %v1209_v41, 0.0 }
 0x497   :  { %2137 = vpow2.f32 %v1213_v60 }
 0x4a1   :  { %v2138_v7 = vpop.eup %2137 }
 0x4a2   :  { %v1592_v49 = vadd.f32 -1.0, %v2138_v7 }
 0x4a4   :  { %v1216_v20 = vmul.f32 1.6732632, %v1592_v49 }
 0x4a6   :  { %v1217_v56 = vsel %vm1212_vm0, %v1209_v41, %v1216_v20 }
 0x4a7   :  { %v1218_v21 = vmul.f32 1.050701, %v1217_v56 }
 0x4a9   :  { %1892 = vmatmul.mubr.f32.vlgmr.msra.gmra.mrb[12].mxu0 %v1218_v21 }
 0x57c   :  { %v1308_v31 = vpop.f32.mrb[12].mxu0 }
 0x57d   :  { %v1309_v44 = vadd.f32 %v1593_v30, %v1308_v31  ;;  %v1893_v11 = vpop.f32.mrb[13].mxu0 }
 0x57f   :  { %v1313_v45 = vmul.f32 1.442695, %v1309_v44  ;;  %vm1312_vm6 = vcmp.gt.f32.partialorder %v1309_v44, 0.0 }
 0x581   :  { %2139 = vpow2.f32 %v1313_v45 }
 0x58b   :  { %v2140_v46 = vpop.eup %2139 }
 0x58c   :  { %v1594_v16 = vadd.f32 -1.0, %v2140_v46 }
 0x58e   :  { %v1316_v13 = vmul.f32 1.6732632, %v1594_v16 }
 0x590   :  { %v1317_v3 = vsel %vm1312_vm6, %v1309_v44, %v1316_v13 }
 0x591   :  { %v1318_v17 = vmul.f32 1.050701, %v1317_v3 }
 0x593   :  { %1927 = vmatmul.mubr.f32.vlgmr.msra.gmra.mrb[4].mxu1 %v1318_v17 }
 0x666   :  { %v1408_v14 = vpop.f32.mrb[4].mxu1 }
 0x667   :  { %v1409_v32 = vadd.f32 %v1595_v47, %v1408_v14  ;;  %v1928_v18 = vpop.f32.mrb[5].mxu1 }
 0x669   :  { %v1412_v25 = vmul.f32 %v2141_v33, %v1409_v32 }
 0x66b   :  { %v1413_v1 = vadd.f32 %v2142_v50, %v1412_v25 }
 0x66d   :  { %1414 = vst [vmem:[#allocation20] sm:$0xff] %v1413_v1 }
 0x66e   :  { %2324 = shalt.err (!%p2321_p13)
}
 0x66f   :  { %s3824_s26 = sld [smem:[#allocation110_spill]] }
 0x675   :  { %s2325_s18 = scalar_lea.hbm %s3824_s26, 128 }
 0x676   :  { %p2326_p0 = scmp.ne.s32.totalorder %s3824_s26, %s2325_s18  ;;  %p2329_p1 = scmp.lt.u32.totalorder %s2325_s18, %s3824_s26 }
 0x678   :  { %p2331_p2 = pnand %p2329_p1, %p2326_p0 }
 0x67a   :  { %2334 = shalt.err (!%p2331_p2)
}
 0x67b   :  { %1424 = dma.vmem_to_hbm [thread:$0]  %s1422_s9, 128, %s3824_s26, [#allocation5]  }
 0x67c   :  { %2347 = dma.done.wait [#allocation5], 128  }
 0x67d   :  { %2348 = vsyncadd [#allocation5], 4294967168 }
 0x67e   :  { %1428 = vsyncpa [#allocation4], 1 }
 0x67f   :  { %1429 = vsyncpa [#allocation8], 1 }
 0x680   :  { %1430 = vsyncpa [#allocation18], 1 }
 0x681   :  { %1431 = vsyncpa [#allocation5], 1 }
 0x682   :  { %1432 = vsyncpa [#allocation6], 1 }
 0x683   :  { %1433 = vsyncpa [#allocation12], 1 }
 0x684   :  { %1434 = vsyncpa [#allocation15], 1 }

</bundles_post_ra>
